<compile_context>
chip_gen: v6e
topology: v6e:2x2x1
jax: 0.10.0
libtpu: 0.0.40
codegen_flags: <defaults>
</compile_context>

<pallas_src>
import functools
import math

import jax
import jax.numpy as jnp
from jax.experimental import pallas as pl
from jax.experimental.pallas import tpu as pltpu

# ----------------------------- synthetic config ------------------------------
BATCH = 2
SEQ_LEN = 8
MODEL_DIM = 32
NUM_HEADS = 4
HEAD_DIM = MODEL_DIM // NUM_HEADS
NUM_LAYERS = 2
OBS_DIM = 24                      # raw per-step observation feature dim
VIDEO_RES = (4, 4)                # -> video head out dim = 3*4*4 = 48
AUDIO_SR = 160                    # -> audio head out dim  = 16
ACTION_DIM = 8
PROPRIO_DIM = 16
VOCAB_SIZE = 64
PRED_HORIZON = 2
LN_EPS = 1e-5                     # torch.nn.LayerNorm default

HEAD_ORDER = ("video", "audio", "actions", "proprioception", "text")
HEAD_HIDDEN = {"video": MODEL_DIM * 2, "audio": MODEL_DIM, "actions": MODEL_DIM,
               "proprioception": MODEL_DIM, "text": MODEL_DIM}
HEAD_OUT = {"video": 3 * VIDEO_RES[0] * VIDEO_RES[1], "audio": AUDIO_SR // 10,
            "actions": ACTION_DIM, "proprioception": PROPRIO_DIM,
            "text": VOCAB_SIZE}
HEAD_HID_TOTAL = sum(HEAD_HIDDEN[m] for m in HEAD_ORDER)    # 192
HEAD_OUT_TOTAL = sum(HEAD_OUT[m] for m in HEAD_ORDER)       # 152
NUM_UV = len(HEAD_ORDER) + 1                                # 5 uncertainty + value


# ------------------------------ in-kernel math --------------------------------
def _erf(x):
    # erf via Abramowitz & Stegun 7.1.26 rational approximation
    # (|abs err| < 1.5e-7); matches exact-erf nn.GELU() to f32 precision.
    a1, a2, a3, a4, a5 = 0.254829592, -0.284496736, 1.421413741, -1.453152027, 1.061405429
    p_c = 0.3275911
    ax = jnp.abs(x)
    t = 1.0 / (1.0 + p_c * ax)
    poly = ((((a5 * t + a4) * t + a3) * t + a2) * t + a1) * t
    y = 1.0 - poly * jnp.exp(-ax * ax)
    return jnp.where(x >= 0.0, y, -y)


def _gelu(x):
    return 0.5 * x * (1.0 + _erf(x * (1.0 / math.sqrt(2.0))))


def _layernorm(x, g, b):
    mean = jnp.mean(x, axis=-1, keepdims=True)
    var = jnp.mean(jnp.square(x - mean), axis=-1, keepdims=True)
    return (x - mean) * jax.lax.rsqrt(var + LN_EPS) * g + b


# ------------------------------ fused kernel ----------------------------------
def _fused_forward_kernel(
        obs_ref, cos_ref, sin_ref, enc_w_ref, enc_b_ref,
        ln1_g_ref, ln1_b_ref, wqkv_ref, bqkv_ref, wo_ref, bo_ref,
        ln2_g_ref, ln2_b_ref, wffn1_ref, bffn1_ref, wffn2_ref, bffn2_ref,
        oln_g_ref, oln_b_ref,
        wl0_ref, bl0_ref, wl1_ref, bl1_ref, wuv_ref, buv_ref,
        latent_ref, heads_ref, uv_ref,
        *, batch, seq):
    num_layers = wqkv_ref.shape[0]
    model_dim = wqkv_ref.shape[1]
    head_dim = cos_ref.shape[1]
    num_heads = model_dim // head_dim
    scale = 1.0 / math.sqrt(head_dim)

    cos = cos_ref[...]        # [S, Dh]
    sin_s = sin_ref[...]      # [S, Dh], rotate-half sign pre-folded in

    # --- multimodal encoder (stand-in: single Linear per token) -------------
    x = (jnp.dot(obs_ref[...], enc_w_ref[...],
                 preferred_element_type=jnp.float32) + enc_b_ref[...])   # [B*S, D]

    # --- transformer layers, all weights VMEM-resident -----------------------
    for l in range(num_layers):
        h = _layernorm(x, ln1_g_ref[l], ln1_b_ref[l])
        # fused Q|K|V projection: one lane-dense [B*S, 3D] matmul
        qkv = (jnp.dot(h, wqkv_ref[l], preferred_element_type=jnp.float32)
               + bqkv_ref[l])

        # per-(batch, head) attention on VMEM values (no HBM traffic,
        # no dispatch) — B*H = 8 static iterations of tiny MXU work.
        attn_rows = []
        for b in range(batch):
            r0 = b * seq
            head_outs = []
            for hd in range(num_heads):
                c = hd * head_dim
                q = qkv[r0:r0 + seq, c:c + head_dim]
                k = qkv[r0:r0 + seq, model_dim + c:model_dim + c + head_dim]
                v = qkv[r0:r0 + seq,
                        2 * model_dim + c:2 * model_dim + c + head_dim]
                # rotate-half RoPE: rot(x) == roll(x, d/2) with sign in sin_s;
                # fold 1/sqrt(Dh) into q before the score matmul.
                q = (q * cos + pltpu.roll(q, head_dim // 2, axis=1) * sin_s) * scale
                k = k * cos + pltpu.roll(k, head_dim // 2, axis=1) * sin_s
                s = jnp.dot(q, k.T, preferred_element_type=jnp.float32)
                s = s - jnp.max(s, axis=-1, keepdims=True)
                p = jnp.exp(s)
                p = p * pl.reciprocal(jnp.sum(p, axis=-1, keepdims=True),
                                      approx=True)
                head_outs.append(
                    jnp.dot(p, v, preferred_element_type=jnp.float32))
            attn_rows.append(jnp.concatenate(head_outs, axis=1))     # [S, D]
        attn = jnp.concatenate(attn_rows, axis=0)                    # [B*S, D]

        x = x + (jnp.dot(attn, wo_ref[l], preferred_element_type=jnp.float32)
                 + bo_ref[l])                                        # residual 1

        h2 = _layernorm(x, ln2_g_ref[l], ln2_b_ref[l])
        ff = _gelu(jnp.dot(h2, wffn1_ref[l], preferred_element_type=jnp.float32)
                   + bffn1_ref[l])
        # nn.Dropout is identity at inference
        x = x + (jnp.dot(ff, wffn2_ref[l], preferred_element_type=jnp.float32)
                 + bffn2_ref[l])                                     # residual 2

    # --- output norm ----------------------------------------------------------
    x = _layernorm(x, oln_g_ref[...], oln_b_ref[...])
    latent_ref[...] = x

    # --- packed heads: 5x (Linear->GELU->Linear) as one l0 matmul + one
    # block-diagonal l1 matmul; 5 uncertainty heads + value head as one [D,6]
    # matmul.  Computed for all tokens (M=16); last token selected outside.
    h0 = _gelu(jnp.dot(x, wl0_ref[...], preferred_element_type=jnp.float32)
               + bl0_ref[...])
    heads_ref[...] = (jnp.dot(h0, wl1_ref[...],
                              preferred_element_type=jnp.float32) + bl1_ref[...])
    uv_ref[...] = (jnp.dot(x, wuv_ref[...],
                           preferred_element_type=jnp.float32) + buv_ref[...])


def _full_spec(shape):
    rank = len(shape)
    return pl.BlockSpec(shape, lambda i, _r=rank: (0,) * _r)


# --------------------------- parameters (synthetic) ----------------------------
def xavier_uniform(key, fan_in, fan_out):
    limit = math.sqrt(6.0 / (fan_in + fan_out))
    return jax.random.uniform(key, (fan_in, fan_out), jnp.float32, -limit, limit)


def make_linear_params(key, fan_in, fan_out):
    # nn.init.xavier_uniform_ weight, zeros bias (as in _init_weights)
    return {"w": xavier_uniform(key, fan_in, fan_out),
            "b": jnp.zeros((fan_out,), jnp.float32)}


def init_params(key):
    keys = iter(jax.random.split(key, 64))
    params = {}
    # TODO(synk): MultiModalEncoder source is not provided; stand-in is a single
    # Linear projecting raw observation features to model_dim (one token / step).
    params["encoder"] = make_linear_params(next(keys), OBS_DIM, MODEL_DIM)
    # TODO(synk): TemporalDynamicsModule is constructed in __init__ but never
    # used in forward(); omitted.
    layers = []
    for _ in range(NUM_LAYERS):
        layers.append({
            "ln1_g": jnp.ones((MODEL_DIM,), jnp.float32),
            "ln1_b": jnp.zeros((MODEL_DIM,), jnp.float32),
            "q": make_linear_params(next(keys), MODEL_DIM, MODEL_DIM),
            "k": make_linear_params(next(keys), MODEL_DIM, MODEL_DIM),
            "v": make_linear_params(next(keys), MODEL_DIM, MODEL_DIM),
            "o": make_linear_params(next(keys), MODEL_DIM, MODEL_DIM),
            "ln2_g": jnp.ones((MODEL_DIM,), jnp.float32),
            "ln2_b": jnp.zeros((MODEL_DIM,), jnp.float32),
            "ffn1": make_linear_params(next(keys), MODEL_DIM, MODEL_DIM * 4),
            "ffn2": make_linear_params(next(keys), MODEL_DIM * 4, MODEL_DIM),
        })
    params["layers"] = layers
    params["out_ln_g"] = jnp.ones((MODEL_DIM,), jnp.float32)
    params["out_ln_b"] = jnp.zeros((MODEL_DIM,), jnp.float32)

    params["heads"] = {}
    params["uncertainty"] = {}
    for name in HEAD_ORDER:
        params["heads"][name] = {
            "l0": make_linear_params(next(keys), MODEL_DIM, HEAD_HIDDEN[name]),
            "l1": make_linear_params(next(keys), HEAD_HIDDEN[name], HEAD_OUT[name]),
        }
        params["uncertainty"][name] = make_linear_params(next(keys), MODEL_DIM, 1)
    params["value"] = make_linear_params(next(keys), MODEL_DIM, 1)
    return params


def _block_diag(mats):
    rows = sum(m.shape[0] for m in mats)
    cols = sum(m.shape[1] for m in mats)
    out = jnp.zeros((rows, cols), jnp.float32)
    r = c = 0
    for m in mats:
        out = out.at[r:r + m.shape[0], c:c + m.shape[1]].set(m)
        r += m.shape[0]
        c += m.shape[1]
    return out


def pack_params(params):
    """Pack per-module params into the stacked / concatenated layout that the
    fused kernel consumes (QKV fused, heads block-diagonal, unc+value fused)."""
    layers = params["layers"]

    def stack(fn):
        return jnp.stack([fn(lp) for lp in layers], axis=0)

    packed = {
        "enc_w": params["encoder"]["w"],
        "enc_b": params["encoder"]["b"].reshape(1, -1),
        "ln1_g": stack(lambda lp: lp["ln1_g"].reshape(1, -1)),
        "ln1_b": stack(lambda lp: lp["ln1_b"].reshape(1, -1)),
        "wqkv": stack(lambda lp: jnp.concatenate(
            [lp["q"]["w"], lp["k"]["w"], lp["v"]["w"]], axis=1)),
        "bqkv": stack(lambda lp: jnp.concatenate(
            [lp["q"]["b"], lp["k"]["b"], lp["v"]["b"]]).reshape(1, -1)),
        "wo": stack(lambda lp: lp["o"]["w"]),
        "bo": stack(lambda lp: lp["o"]["b"].reshape(1, -1)),
        "ln2_g": stack(lambda lp: lp["ln2_g"].reshape(1, -1)),
        "ln2_b": stack(lambda lp: lp["ln2_b"].reshape(1, -1)),
        "wffn1": stack(lambda lp: lp["ffn1"]["w"]),
        "bffn1": stack(lambda lp: lp["ffn1"]["b"].reshape(1, -1)),
        "wffn2": stack(lambda lp: lp["ffn2"]["w"]),
        "bffn2": stack(lambda lp: lp["ffn2"]["b"].reshape(1, -1)),
        "oln_g": params["out_ln_g"].reshape(1, -1),
        "oln_b": params["out_ln_b"].reshape(1, -1),
    }
    packed["wl0"] = jnp.concatenate(
        [params["heads"][m]["l0"]["w"] for m in HEAD_ORDER], axis=1)
    packed["bl0"] = jnp.concatenate(
        [params["heads"][m]["l0"]["b"] for m in HEAD_ORDER]).reshape(1, -1)
    packed["wl1"] = _block_diag(
        [params["heads"][m]["l1"]["w"] for m in HEAD_ORDER])
    packed["bl1"] = jnp.concatenate(
        [params["heads"][m]["l1"]["b"] for m in HEAD_ORDER]).reshape(1, -1)
    packed["wuv"] = jnp.concatenate(
        [params["uncertainty"][m]["w"] for m in HEAD_ORDER]
        + [params["value"]["w"]], axis=1)
    packed["buv"] = jnp.concatenate(
        [params["uncertainty"][m]["b"] for m in HEAD_ORDER]
        + [params["value"]["b"]]).reshape(1, -1)
    return packed


# ------------------------------- model forward --------------------------------
def rope_tables(seq_len, dim):
    # TODO(synk): RotaryPositionalEncoding source not provided; standard
    # rotate-half RoPE with base 10000 is used.
    inv_freq = 1.0 / (10000.0 ** (jnp.arange(0, dim, 2, dtype=jnp.float32) / dim))
    t = jnp.arange(seq_len, dtype=jnp.float32)
    freqs = jnp.outer(t, inv_freq)                     # [S, dim/2]
    emb = jnp.concatenate([freqs, freqs], axis=-1)     # [S, dim]
    return jnp.cos(emb), jnp.sin(emb)


def world_model_forward(params, inputs, prediction_horizon=1,
                        target_modalities=None):
    obs = inputs["observations"]                        # [B, S, OBS_DIM]
    B, S, obs_dim = obs.shape
    modality_info = {"observations": {"start": 0, "length": S}}

    packed = pack_params(params)
    cos, sin = rope_tables(S, HEAD_DIM)
    # fold rotate-half sign (-1 on first half) into sin once, host-side
    sign = jnp.where(jnp.arange(HEAD_DIM) < HEAD_DIM // 2, -1.0, 1.0)
    sin_signed = sin * sign[None, :]

    args = [
        obs.reshape(B * S, obs_dim).astype(jnp.float32),
        cos, sin_signed,
        packed["enc_w"], packed["enc_b"],
        packed["ln1_g"], packed["ln1_b"], packed["wqkv"], packed["bqkv"],
        packed["wo"], packed["bo"],
        packed["ln2_g"], packed["ln2_b"], packed["wffn1"], packed["bffn1"],
        packed["wffn2"], packed["bffn2"],
        packed["oln_g"], packed["oln_b"],
        packed["wl0"], packed["bl0"], packed["wl1"], packed["bl1"],
        packed["wuv"], packed["buv"],
    ]
    out_shape = (
        jax.ShapeDtypeStruct((B * S, MODEL_DIM), jnp.float32),
        jax.ShapeDtypeStruct((B * S, HEAD_OUT_TOTAL), jnp.float32),
        jax.ShapeDtypeStruct((B * S, NUM_UV), jnp.float32),
    )

    latent2d, heads_all, uv_all = pl.pallas_call(
        functools.partial(_fused_forward_kernel, batch=B, seq=S),
        out_shape=out_shape,
        grid=(1,),
        in_specs=[_full_spec(a.shape) for a in args],
        out_specs=tuple(_full_spec(s.shape) for s in out_shape),
        compiler_params=pltpu.CompilerParams(
            dimension_semantics=("arbitrary",)),
    )(*args)

    hidden = latent2d.reshape(B, S, MODEL_DIM)
    heads_last = heads_all.reshape(B, S, HEAD_OUT_TOTAL)[:, -1, :]   # [B, 152]
    uv_last = uv_all.reshape(B, S, NUM_UV)[:, -1, :]                 # [B, 6]

    if target_modalities is None:
        target_modalities = list(HEAD_ORDER)

    offsets = {}
    off = 0
    for m in HEAD_ORDER:
        offsets[m] = off
        off += HEAD_OUT[m]

    predictions = {}
    uncertainties = {}
    for modality in target_modalities:
        if modality in HEAD_OUT:
            o = offsets[modality]
            d = HEAD_OUT[modality]
            pred = heads_last[:, o:o + d]                            # [B, d]
            # dropout disabled (eval) -> each horizon step is identical, as in
            # the reference loop over prediction_horizon; broadcast, don't copy
            predictions[modality] = jnp.broadcast_to(
                pred[:, None, :], (B, prediction_horizon, d))
            idx = HEAD_ORDER.index(modality)
            unc = uv_last[:, idx:idx + 1]                            # [B, 1]
            uncertainties[modality] = jnp.broadcast_to(
                unc, (B, prediction_horizon))

    value = uv_last[:, NUM_UV - 1:NUM_UV]                            # [B, 1]

    return {
        "predictions": predictions,          # each [B, horizon, out_dim]
        "latent_states": hidden,             # [B, S, MODEL_DIM]
        "attention_weights": None,           # return_attention=False path
        "uncertainty_estimates": uncertainties,
        "value_estimate": value,             # [B, 1]
        "modality_info": modality_info,
    }


# ------------------------------------ main -------------------------------------
if __name__ == "__main__":
    key = jax.random.PRNGKey(0)
    pkey, dkey = jax.random.split(key)
    params = init_params(pkey)
    obs = jax.random.normal(dkey, (BATCH, SEQ_LEN, OBS_DIM), jnp.float32)

    out = world_model_forward(params, {"observations": obs},
                              prediction_horizon=PRED_HORIZON)
    jax.block_until_ready((out["predictions"], out["latent_states"],
                           out["uncertainty_estimates"], out["value_estimate"]))
    print("KERNEL_OK")
</pallas_src>

<mosaic_0001>
module attributes {stable_mosaic.version = 11 : i64} {
  func.func @_fused_forward_kernel(%arg0: i32, %arg1: memref<16x24xf32, #tpu.memory_space<vmem>>, %arg2: memref<8x8xf32, #tpu.memory_space<vmem>>, %arg3: memref<8x8xf32, #tpu.memory_space<vmem>>, %arg4: memref<24x32xf32, #tpu.memory_space<vmem>>, %arg5: memref<1x32xf32, #tpu.memory_space<vmem>>, %arg6: memref<2x1x32xf32, #tpu.memory_space<vmem>>, %arg7: memref<2x1x32xf32, #tpu.memory_space<vmem>>, %arg8: memref<2x32x96xf32, #tpu.memory_space<vmem>>, %arg9: memref<2x1x96xf32, #tpu.memory_space<vmem>>, %arg10: memref<2x32x32xf32, #tpu.memory_space<vmem>>, %arg11: memref<2x1x32xf32, #tpu.memory_space<vmem>>, %arg12: memref<2x1x32xf32, #tpu.memory_space<vmem>>, %arg13: memref<2x1x32xf32, #tpu.memory_space<vmem>>, %arg14: memref<2x32x128xf32, #tpu.memory_space<vmem>>, %arg15: memref<2x1x128xf32, #tpu.memory_space<vmem>>, %arg16: memref<2x128x32xf32, #tpu.memory_space<vmem>>, %arg17: memref<2x1x32xf32, #tpu.memory_space<vmem>>, %arg18: memref<1x32xf32, #tpu.memory_space<vmem>>, %arg19: memref<1x32xf32, #tpu.memory_space<vmem>>, %arg20: memref<32x192xf32, #tpu.memory_space<vmem>>, %arg21: memref<1x192xf32, #tpu.memory_space<vmem>>, %arg22: memref<192x152xf32, #tpu.memory_space<vmem>>, %arg23: memref<1x152xf32, #tpu.memory_space<vmem>>, %arg24: memref<32x6xf32, #tpu.memory_space<vmem>>, %arg25: memref<1x6xf32, #tpu.memory_space<vmem>>, %arg26: memref<16x32xf32, #tpu.memory_space<vmem>>, %arg27: memref<16x152xf32, #tpu.memory_space<vmem>>, %arg28: memref<16x6xf32, #tpu.memory_space<vmem>>) attributes {dimension_semantics = [#tpu.dimension_semantics<arbitrary>], iteration_bounds = array<i64: 1>, scalar_prefetch = 0 : i64, scratch_operands = 0 : i64, tpu.core_type = #tpu.core_type<tc>, window_params = [{pipeline_mode = #tpu.pipeline_mode<synchronous>, transform_indices = @transform_0, window_bounds = array<i64: 16, 24>}, {pipeline_mode = #tpu.pipeline_mode<synchronous>, transform_indices = @transform_1, window_bounds = array<i64: 8, 8>}, {pipeline_mode = #tpu.pipeline_mode<synchronous>, transform_indices = @transform_2, window_bounds = array<i64: 8, 8>}, {pipeline_mode = #tpu.pipeline_mode<synchronous>, transform_indices = @transform_3, window_bounds = array<i64: 24, 32>}, {pipeline_mode = #tpu.pipeline_mode<synchronous>, transform_indices = @transform_4, window_bounds = array<i64: 1, 32>}, {pipeline_mode = #tpu.pipeline_mode<synchronous>, transform_indices = @transform_5, window_bounds = array<i64: 2, 1, 32>}, {pipeline_mode = #tpu.pipeline_mode<synchronous>, transform_indices = @transform_6, window_bounds = array<i64: 2, 1, 32>}, {pipeline_mode = #tpu.pipeline_mode<synchronous>, transform_indices = @transform_7, window_bounds = array<i64: 2, 32, 96>}, {pipeline_mode = #tpu.pipeline_mode<synchronous>, transform_indices = @transform_8, window_bounds = array<i64: 2, 1, 96>}, {pipeline_mode = #tpu.pipeline_mode<synchronous>, transform_indices = @transform_9, window_bounds = array<i64: 2, 32, 32>}, {pipeline_mode = #tpu.pipeline_mode<synchronous>, transform_indices = @transform_10, window_bounds = array<i64: 2, 1, 32>}, {pipeline_mode = #tpu.pipeline_mode<synchronous>, transform_indices = @transform_11, window_bounds = array<i64: 2, 1, 32>}, {pipeline_mode = #tpu.pipeline_mode<synchronous>, transform_indices = @transform_12, window_bounds = array<i64: 2, 1, 32>}, {pipeline_mode = #tpu.pipeline_mode<synchronous>, transform_indices = @transform_13, window_bounds = array<i64: 2, 32, 128>}, {pipeline_mode = #tpu.pipeline_mode<synchronous>, transform_indices = @transform_14, window_bounds = array<i64: 2, 1, 128>}, {pipeline_mode = #tpu.pipeline_mode<synchronous>, transform_indices = @transform_15, window_bounds = array<i64: 2, 128, 32>}, {pipeline_mode = #tpu.pipeline_mode<synchronous>, transform_indices = @transform_16, window_bounds = array<i64: 2, 1, 32>}, {pipeline_mode = #tpu.pipeline_mode<synchronous>, transform_indices = @transform_17, window_bounds = array<i64: 1, 32>}, {pipeline_mode = #tpu.pipeline_mode<synchronous>, transform_indices = @transform_18, window_bounds = array<i64: 1, 32>}, {pipeline_mode = #tpu.pipeline_mode<synchronous>, transform_indices = @transform_19, window_bounds = array<i64: 32, 192>}, {pipeline_mode = #tpu.pipeline_mode<synchronous>, transform_indices = @transform_20, window_bounds = array<i64: 1, 192>}, {pipeline_mode = #tpu.pipeline_mode<synchronous>, transform_indices = @transform_21, window_bounds = array<i64: 192, 152>}, {pipeline_mode = #tpu.pipeline_mode<synchronous>, transform_indices = @transform_22, window_bounds = array<i64: 1, 152>}, {pipeline_mode = #tpu.pipeline_mode<synchronous>, transform_indices = @transform_23, window_bounds = array<i64: 32, 6>}, {pipeline_mode = #tpu.pipeline_mode<synchronous>, transform_indices = @transform_24, window_bounds = array<i64: 1, 6>}, {pipeline_mode = #tpu.pipeline_mode<synchronous>, transform_indices = @transform_25, window_bounds = array<i64: 16, 32>}, {pipeline_mode = #tpu.pipeline_mode<synchronous>, transform_indices = @transform_26, window_bounds = array<i64: 16, 152>}, {pipeline_mode = #tpu.pipeline_mode<synchronous>, transform_indices = @transform_27, window_bounds = array<i64: 16, 6>}]} {
    %c0 = arith.constant 0 : index
    %c0_0 = arith.constant 0 : index
    %0 = vector.load %arg2[%c0, %c0_0] : memref<8x8xf32, #tpu.memory_space<vmem>>, vector<8x8xf32>
    %c0_1 = arith.constant 0 : index
    %c0_2 = arith.constant 0 : index
    %1 = vector.load %arg3[%c0_1, %c0_2] : memref<8x8xf32, #tpu.memory_space<vmem>>, vector<8x8xf32>
    %c0_3 = arith.constant 0 : index
    %c0_4 = arith.constant 0 : index
    %2 = vector.load %arg1[%c0_3, %c0_4] : memref<16x24xf32, #tpu.memory_space<vmem>>, vector<16x24xf32>
    %c0_5 = arith.constant 0 : index
    %c0_6 = arith.constant 0 : index
    %3 = vector.load %arg4[%c0_5, %c0_6] : memref<24x32xf32, #tpu.memory_space<vmem>>, vector<24x32xf32>
    %cst = arith.constant dense<0.000000e+00> : vector<16x32xf32>
    %4 = tpu.matmul %2, %3, %cst {dimension_numbers = #tpu.dot_dimension_numbers<[1], [0], [0], [1], [0, 0, 1, 1], [], []>} : vector<16x24xf32>, vector<24x32xf32>, vector<16x32xf32> -> vector<16x32xf32>
    %c0_7 = arith.constant 0 : index
    %c0_8 = arith.constant 0 : index
    %5 = vector.load %arg5[%c0_7, %c0_8] : memref<1x32xf32, #tpu.memory_space<vmem>>, vector<1x32xf32>
    %6 = vector.broadcast %5 : vector<1x32xf32> to vector<16x32xf32>
    %7 = arith.addf %4, %6 : vector<16x32xf32>
    %c0_9 = arith.constant 0 : index
    %c0_10 = arith.constant 0 : index
    %c0_11 = arith.constant 0 : index
    %8 = vector.load %arg6[%c0_9, %c0_10, %c0_11] : memref<2x1x32xf32, #tpu.memory_space<vmem>>, vector<1x1x32xf32>
    %9 = vector.shape_cast %8 : vector<1x1x32xf32> to vector<1x32xf32>
    %c0_12 = arith.constant 0 : index
    %c0_13 = arith.constant 0 : index
    %c0_14 = arith.constant 0 : index
    %10 = vector.load %arg7[%c0_12, %c0_13, %c0_14] : memref<2x1x32xf32, #tpu.memory_space<vmem>>, vector<1x1x32xf32>
    %11 = vector.shape_cast %10 : vector<1x1x32xf32> to vector<1x32xf32>
    %cst_15 = arith.constant dense<0.000000e+00> : vector<16xf32>
    %12 = vector.multi_reduction <add>, %7, %cst_15 [1] : vector<16x32xf32> to vector<16xf32>
    %13 = vector.shape_cast %12 : vector<16xf32> to vector<16x1xf32>
    %cst_16 = arith.constant 3.200000e+01 : f32
    %14 = vector.broadcast %cst_16 : f32 to vector<16x1xf32>
    %15 = arith.divf %13, %14 : vector<16x1xf32>
    %16 = vector.broadcast %15 : vector<16x1xf32> to vector<16x32xf32>
    %17 = arith.subf %7, %16 : vector<16x32xf32>
    %18 = arith.mulf %17, %17 : vector<16x32xf32>
    %cst_17 = arith.constant dense<0.000000e+00> : vector<16xf32>
    %19 = vector.multi_reduction <add>, %18, %cst_17 [1] : vector<16x32xf32> to vector<16xf32>
    %20 = vector.shape_cast %19 : vector<16xf32> to vector<16x1xf32>
    %cst_18 = arith.constant 3.200000e+01 : f32
    %21 = vector.broadcast %cst_18 : f32 to vector<16x1xf32>
    %22 = arith.divf %20, %21 : vector<16x1xf32>
    %23 = vector.broadcast %15 : vector<16x1xf32> to vector<16x32xf32>
    %24 = arith.subf %7, %23 : vector<16x32xf32>
    %cst_19 = arith.constant 9.99999974E-6 : f32
    %25 = vector.broadcast %cst_19 : f32 to vector<16x1xf32>
    %26 = arith.addf %22, %25 : vector<16x1xf32>
    %27 = math.rsqrt %26 : vector<16x1xf32>
    %28 = vector.broadcast %27 : vector<16x1xf32> to vector<16x32xf32>
    %29 = arith.mulf %24, %28 : vector<16x32xf32>
    %30 = vector.broadcast %9 : vector<1x32xf32> to vector<16x32xf32>
    %31 = arith.mulf %29, %30 : vector<16x32xf32>
    %32 = vector.broadcast %11 : vector<1x32xf32> to vector<16x32xf32>
    %33 = arith.addf %31, %32 : vector<16x32xf32>
    %c0_20 = arith.constant 0 : index
    %c0_21 = arith.constant 0 : index
    %c0_22 = arith.constant 0 : index
    %34 = vector.load %arg8[%c0_20, %c0_21, %c0_22] : memref<2x32x96xf32, #tpu.memory_space<vmem>>, vector<1x32x96xf32>
    %35 = vector.shape_cast %34 : vector<1x32x96xf32> to vector<32x96xf32>
    %cst_23 = arith.constant dense<0.000000e+00> : vector<16x96xf32>
    %36 = tpu.matmul %33, %35, %cst_23 {dimension_numbers = #tpu.dot_dimension_numbers<[1], [0], [0], [1], [0, 0, 1, 1], [], []>} : vector<16x32xf32>, vector<32x96xf32>, vector<16x96xf32> -> vector<16x96xf32>
    %c0_24 = arith.constant 0 : index
    %c0_25 = arith.constant 0 : index
    %c0_26 = arith.constant 0 : index
    %37 = vector.load %arg9[%c0_24, %c0_25, %c0_26] : memref<2x1x96xf32, #tpu.memory_space<vmem>>, vector<1x1x96xf32>
    %38 = vector.shape_cast %37 : vector<1x1x96xf32> to vector<1x96xf32>
    %39 = vector.broadcast %38 : vector<1x96xf32> to vector<16x96xf32>
    %40 = arith.addf %36, %39 : vector<16x96xf32>
    %41 = vector.extract_strided_slice %40 {offsets = [0, 0], sizes = [8, 8], strides = [1, 1]} : vector<16x96xf32> to vector<8x8xf32>
    %42 = vector.extract_strided_slice %40 {offsets = [0, 32], sizes = [8, 8], strides = [1, 1]} : vector<16x96xf32> to vector<8x8xf32>
    %43 = vector.extract_strided_slice %40 {offsets = [0, 64], sizes = [8, 8], strides = [1, 1]} : vector<16x96xf32> to vector<8x8xf32>
    %44 = arith.mulf %41, %0 : vector<8x8xf32>
    %c4_i32 = arith.constant 4 : i32
    %45 = tpu.dynamic_rotate %41 by %c4_i32 dim 1 : vector<8x8xf32>, i32 -> vector<8x8xf32>
    %46 = arith.mulf %45, %1 : vector<8x8xf32>
    %47 = arith.addf %44, %46 : vector<8x8xf32>
    %cst_27 = arith.constant 0.353553385 : f32
    %48 = vector.broadcast %cst_27 : f32 to vector<8x8xf32>
    %49 = arith.mulf %47, %48 : vector<8x8xf32>
    %50 = arith.mulf %42, %0 : vector<8x8xf32>
    %c4_i32_28 = arith.constant 4 : i32
    %51 = tpu.dynamic_rotate %42 by %c4_i32_28 dim 1 : vector<8x8xf32>, i32 -> vector<8x8xf32>
    %52 = arith.mulf %51, %1 : vector<8x8xf32>
    %53 = arith.addf %50, %52 : vector<8x8xf32>
    %54 = tpu.transpose %53, [1, 0] : vector<8x8xf32> -> vector<8x8xf32>
    %cst_29 = arith.constant dense<0.000000e+00> : vector<8x8xf32>
    %55 = tpu.matmul %49, %54, %cst_29 {dimension_numbers = #tpu.dot_dimension_numbers<[1], [0], [0], [1], [0, 0, 1, 1], [], []>} : vector<8x8xf32>, vector<8x8xf32>, vector<8x8xf32> -> vector<8x8xf32>
    %cst_30 = arith.constant dense<0xFF800000> : vector<8xf32>
    %56 = vector.multi_reduction <maximumf>, %55, %cst_30 [1] : vector<8x8xf32> to vector<8xf32>
    %57 = vector.shape_cast %56 : vector<8xf32> to vector<8x1xf32>
    %58 = vector.broadcast %57 : vector<8x1xf32> to vector<8x8xf32>
    %59 = arith.subf %55, %58 : vector<8x8xf32>
    %60 = math.exp %59 : vector<8x8xf32>
    %cst_31 = arith.constant dense<0.000000e+00> : vector<8xf32>
    %61 = vector.multi_reduction <add>, %60, %cst_31 [1] : vector<8x8xf32> to vector<8xf32>
    %62 = vector.shape_cast %61 : vector<8xf32> to vector<8x1xf32>
    %63 = tpu.reciprocal %62 {approx = true} : vector<8x1xf32> -> vector<8x1xf32>
    %64 = vector.broadcast %63 : vector<8x1xf32> to vector<8x8xf32>
    %65 = arith.mulf %60, %64 : vector<8x8xf32>
    %cst_32 = arith.constant dense<0.000000e+00> : vector<8x8xf32>
    %66 = tpu.matmul %65, %43, %cst_32 {dimension_numbers = #tpu.dot_dimension_numbers<[1], [0], [0], [1], [0, 0, 1, 1], [], []>} : vector<8x8xf32>, vector<8x8xf32>, vector<8x8xf32> -> vector<8x8xf32>
    %67 = vector.extract_strided_slice %40 {offsets = [0, 8], sizes = [8, 8], strides = [1, 1]} : vector<16x96xf32> to vector<8x8xf32>
    %68 = vector.extract_strided_slice %40 {offsets = [0, 40], sizes = [8, 8], strides = [1, 1]} : vector<16x96xf32> to vector<8x8xf32>
    %69 = vector.extract_strided_slice %40 {offsets = [0, 72], sizes = [8, 8], strides = [1, 1]} : vector<16x96xf32> to vector<8x8xf32>
    %70 = arith.mulf %67, %0 : vector<8x8xf32>
    %c4_i32_33 = arith.constant 4 : i32
    %71 = tpu.dynamic_rotate %67 by %c4_i32_33 dim 1 : vector<8x8xf32>, i32 -> vector<8x8xf32>
    %72 = arith.mulf %71, %1 : vector<8x8xf32>
    %73 = arith.addf %70, %72 : vector<8x8xf32>
    %cst_34 = arith.constant 0.353553385 : f32
    %74 = vector.broadcast %cst_34 : f32 to vector<8x8xf32>
    %75 = arith.mulf %73, %74 : vector<8x8xf32>
    %76 = arith.mulf %68, %0 : vector<8x8xf32>
    %c4_i32_35 = arith.constant 4 : i32
    %77 = tpu.dynamic_rotate %68 by %c4_i32_35 dim 1 : vector<8x8xf32>, i32 -> vector<8x8xf32>
    %78 = arith.mulf %77, %1 : vector<8x8xf32>
    %79 = arith.addf %76, %78 : vector<8x8xf32>
    %80 = tpu.transpose %79, [1, 0] : vector<8x8xf32> -> vector<8x8xf32>
    %cst_36 = arith.constant dense<0.000000e+00> : vector<8x8xf32>
    %81 = tpu.matmul %75, %80, %cst_36 {dimension_numbers = #tpu.dot_dimension_numbers<[1], [0], [0], [1], [0, 0, 1, 1], [], []>} : vector<8x8xf32>, vector<8x8xf32>, vector<8x8xf32> -> vector<8x8xf32>
    %cst_37 = arith.constant dense<0xFF800000> : vector<8xf32>
    %82 = vector.multi_reduction <maximumf>, %81, %cst_37 [1] : vector<8x8xf32> to vector<8xf32>
    %83 = vector.shape_cast %82 : vector<8xf32> to vector<8x1xf32>
    %84 = vector.broadcast %83 : vector<8x1xf32> to vector<8x8xf32>
    %85 = arith.subf %81, %84 : vector<8x8xf32>
    %86 = math.exp %85 : vector<8x8xf32>
    %cst_38 = arith.constant dense<0.000000e+00> : vector<8xf32>
    %87 = vector.multi_reduction <add>, %86, %cst_38 [1] : vector<8x8xf32> to vector<8xf32>
    %88 = vector.shape_cast %87 : vector<8xf32> to vector<8x1xf32>
    %89 = tpu.reciprocal %88 {approx = true} : vector<8x1xf32> -> vector<8x1xf32>
    %90 = vector.broadcast %89 : vector<8x1xf32> to vector<8x8xf32>
    %91 = arith.mulf %86, %90 : vector<8x8xf32>
    %cst_39 = arith.constant dense<0.000000e+00> : vector<8x8xf32>
    %92 = tpu.matmul %91, %69, %cst_39 {dimension_numbers = #tpu.dot_dimension_numbers<[1], [0], [0], [1], [0, 0, 1, 1], [], []>} : vector<8x8xf32>, vector<8x8xf32>, vector<8x8xf32> -> vector<8x8xf32>
    %93 = vector.extract_strided_slice %40 {offsets = [0, 16], sizes = [8, 8], strides = [1, 1]} : vector<16x96xf32> to vector<8x8xf32>
    %94 = vector.extract_strided_slice %40 {offsets = [0, 48], sizes = [8, 8], strides = [1, 1]} : vector<16x96xf32> to vector<8x8xf32>
    %95 = vector.extract_strided_slice %40 {offsets = [0, 80], sizes = [8, 8], strides = [1, 1]} : vector<16x96xf32> to vector<8x8xf32>
    %96 = arith.mulf %93, %0 : vector<8x8xf32>
    %c4_i32_40 = arith.constant 4 : i32
    %97 = tpu.dynamic_rotate %93 by %c4_i32_40 dim 1 : vector<8x8xf32>, i32 -> vector<8x8xf32>
    %98 = arith.mulf %97, %1 : vector<8x8xf32>
    %99 = arith.addf %96, %98 : vector<8x8xf32>
    %cst_41 = arith.constant 0.353553385 : f32
    %100 = vector.broadcast %cst_41 : f32 to vector<8x8xf32>
    %101 = arith.mulf %99, %100 : vector<8x8xf32>
    %102 = arith.mulf %94, %0 : vector<8x8xf32>
    %c4_i32_42 = arith.constant 4 : i32
    %103 = tpu.dynamic_rotate %94 by %c4_i32_42 dim 1 : vector<8x8xf32>, i32 -> vector<8x8xf32>
    %104 = arith.mulf %103, %1 : vector<8x8xf32>
    %105 = arith.addf %102, %104 : vector<8x8xf32>
    %106 = tpu.transpose %105, [1, 0] : vector<8x8xf32> -> vector<8x8xf32>
    %cst_43 = arith.constant dense<0.000000e+00> : vector<8x8xf32>
    %107 = tpu.matmul %101, %106, %cst_43 {dimension_numbers = #tpu.dot_dimension_numbers<[1], [0], [0], [1], [0, 0, 1, 1], [], []>} : vector<8x8xf32>, vector<8x8xf32>, vector<8x8xf32> -> vector<8x8xf32>
    %cst_44 = arith.constant dense<0xFF800000> : vector<8xf32>
    %108 = vector.multi_reduction <maximumf>, %107, %cst_44 [1] : vector<8x8xf32> to vector<8xf32>
    %109 = vector.shape_cast %108 : vector<8xf32> to vector<8x1xf32>
    %110 = vector.broadcast %109 : vector<8x1xf32> to vector<8x8xf32>
    %111 = arith.subf %107, %110 : vector<8x8xf32>
    %112 = math.exp %111 : vector<8x8xf32>
    %cst_45 = arith.constant dense<0.000000e+00> : vector<8xf32>
    %113 = vector.multi_reduction <add>, %112, %cst_45 [1] : vector<8x8xf32> to vector<8xf32>
    %114 = vector.shape_cast %113 : vector<8xf32> to vector<8x1xf32>
    %115 = tpu.reciprocal %114 {approx = true} : vector<8x1xf32> -> vector<8x1xf32>
    %116 = vector.broadcast %115 : vector<8x1xf32> to vector<8x8xf32>
    %117 = arith.mulf %112, %116 : vector<8x8xf32>
    %cst_46 = arith.constant dense<0.000000e+00> : vector<8x8xf32>
    %118 = tpu.matmul %117, %95, %cst_46 {dimension_numbers = #tpu.dot_dimension_numbers<[1], [0], [0], [1], [0, 0, 1, 1], [], []>} : vector<8x8xf32>, vector<8x8xf32>, vector<8x8xf32> -> vector<8x8xf32>
    %119 = vector.extract_strided_slice %40 {offsets = [0, 24], sizes = [8, 8], strides = [1, 1]} : vector<16x96xf32> to vector<8x8xf32>
    %120 = vector.extract_strided_slice %40 {offsets = [0, 56], sizes = [8, 8], strides = [1, 1]} : vector<16x96xf32> to vector<8x8xf32>
    %121 = vector.extract_strided_slice %40 {offsets = [0, 88], sizes = [8, 8], strides = [1, 1]} : vector<16x96xf32> to vector<8x8xf32>
    %122 = arith.mulf %119, %0 : vector<8x8xf32>
    %c4_i32_47 = arith.constant 4 : i32
    %123 = tpu.dynamic_rotate %119 by %c4_i32_47 dim 1 : vector<8x8xf32>, i32 -> vector<8x8xf32>
    %124 = arith.mulf %123, %1 : vector<8x8xf32>
    %125 = arith.addf %122, %124 : vector<8x8xf32>
    %cst_48 = arith.constant 0.353553385 : f32
    %126 = vector.broadcast %cst_48 : f32 to vector<8x8xf32>
    %127 = arith.mulf %125, %126 : vector<8x8xf32>
    %128 = arith.mulf %120, %0 : vector<8x8xf32>
    %c4_i32_49 = arith.constant 4 : i32
    %129 = tpu.dynamic_rotate %120 by %c4_i32_49 dim 1 : vector<8x8xf32>, i32 -> vector<8x8xf32>
    %130 = arith.mulf %129, %1 : vector<8x8xf32>
    %131 = arith.addf %128, %130 : vector<8x8xf32>
    %132 = tpu.transpose %131, [1, 0] : vector<8x8xf32> -> vector<8x8xf32>
    %cst_50 = arith.constant dense<0.000000e+00> : vector<8x8xf32>
    %133 = tpu.matmul %127, %132, %cst_50 {dimension_numbers = #tpu.dot_dimension_numbers<[1], [0], [0], [1], [0, 0, 1, 1], [], []>} : vector<8x8xf32>, vector<8x8xf32>, vector<8x8xf32> -> vector<8x8xf32>
    %cst_51 = arith.constant dense<0xFF800000> : vector<8xf32>
    %134 = vector.multi_reduction <maximumf>, %133, %cst_51 [1] : vector<8x8xf32> to vector<8xf32>
    %135 = vector.shape_cast %134 : vector<8xf32> to vector<8x1xf32>
    %136 = vector.broadcast %135 : vector<8x1xf32> to vector<8x8xf32>
    %137 = arith.subf %133, %136 : vector<8x8xf32>
    %138 = math.exp %137 : vector<8x8xf32>
    %cst_52 = arith.constant dense<0.000000e+00> : vector<8xf32>
    %139 = vector.multi_reduction <add>, %138, %cst_52 [1] : vector<8x8xf32> to vector<8xf32>
    %140 = vector.shape_cast %139 : vector<8xf32> to vector<8x1xf32>
    %141 = tpu.reciprocal %140 {approx = true} : vector<8x1xf32> -> vector<8x1xf32>
    %142 = vector.broadcast %141 : vector<8x1xf32> to vector<8x8xf32>
    %143 = arith.mulf %138, %142 : vector<8x8xf32>
    %cst_53 = arith.constant dense<0.000000e+00> : vector<8x8xf32>
    %144 = tpu.matmul %143, %121, %cst_53 {dimension_numbers = #tpu.dot_dimension_numbers<[1], [0], [0], [1], [0, 0, 1, 1], [], []>} : vector<8x8xf32>, vector<8x8xf32>, vector<8x8xf32> -> vector<8x8xf32>
    %145 = tpu.concatenate %66, %92, %118, %144 in 1 : vector<8x8xf32>, vector<8x8xf32>, vector<8x8xf32>, vector<8x8xf32> -> vector<8x32xf32>
    %146 = vector.extract_strided_slice %40 {offsets = [8, 0], sizes = [8, 8], strides = [1, 1]} : vector<16x96xf32> to vector<8x8xf32>
    %147 = vector.extract_strided_slice %40 {offsets = [8, 32], sizes = [8, 8], strides = [1, 1]} : vector<16x96xf32> to vector<8x8xf32>
    %148 = vector.extract_strided_slice %40 {offsets = [8, 64], sizes = [8, 8], strides = [1, 1]} : vector<16x96xf32> to vector<8x8xf32>
    %149 = arith.mulf %146, %0 : vector<8x8xf32>
    %c4_i32_54 = arith.constant 4 : i32
    %150 = tpu.dynamic_rotate %146 by %c4_i32_54 dim 1 : vector<8x8xf32>, i32 -> vector<8x8xf32>
    %151 = arith.mulf %150, %1 : vector<8x8xf32>
    %152 = arith.addf %149, %151 : vector<8x8xf32>
    %cst_55 = arith.constant 0.353553385 : f32
    %153 = vector.broadcast %cst_55 : f32 to vector<8x8xf32>
    %154 = arith.mulf %152, %153 : vector<8x8xf32>
    %155 = arith.mulf %147, %0 : vector<8x8xf32>
    %c4_i32_56 = arith.constant 4 : i32
    %156 = tpu.dynamic_rotate %147 by %c4_i32_56 dim 1 : vector<8x8xf32>, i32 -> vector<8x8xf32>
    %157 = arith.mulf %156, %1 : vector<8x8xf32>
    %158 = arith.addf %155, %157 : vector<8x8xf32>
    %159 = tpu.transpose %158, [1, 0] : vector<8x8xf32> -> vector<8x8xf32>
    %cst_57 = arith.constant dense<0.000000e+00> : vector<8x8xf32>
    %160 = tpu.matmul %154, %159, %cst_57 {dimension_numbers = #tpu.dot_dimension_numbers<[1], [0], [0], [1], [0, 0, 1, 1], [], []>} : vector<8x8xf32>, vector<8x8xf32>, vector<8x8xf32> -> vector<8x8xf32>
    %cst_58 = arith.constant dense<0xFF800000> : vector<8xf32>
    %161 = vector.multi_reduction <maximumf>, %160, %cst_58 [1] : vector<8x8xf32> to vector<8xf32>
    %162 = vector.shape_cast %161 : vector<8xf32> to vector<8x1xf32>
    %163 = vector.broadcast %162 : vector<8x1xf32> to vector<8x8xf32>
    %164 = arith.subf %160, %163 : vector<8x8xf32>
    %165 = math.exp %164 : vector<8x8xf32>
    %cst_59 = arith.constant dense<0.000000e+00> : vector<8xf32>
    %166 = vector.multi_reduction <add>, %165, %cst_59 [1] : vector<8x8xf32> to vector<8xf32>
    %167 = vector.shape_cast %166 : vector<8xf32> to vector<8x1xf32>
    %168 = tpu.reciprocal %167 {approx = true} : vector<8x1xf32> -> vector<8x1xf32>
    %169 = vector.broadcast %168 : vector<8x1xf32> to vector<8x8xf32>
    %170 = arith.mulf %165, %169 : vector<8x8xf32>
    %cst_60 = arith.constant dense<0.000000e+00> : vector<8x8xf32>
    %171 = tpu.matmul %170, %148, %cst_60 {dimension_numbers = #tpu.dot_dimension_numbers<[1], [0], [0], [1], [0, 0, 1, 1], [], []>} : vector<8x8xf32>, vector<8x8xf32>, vector<8x8xf32> -> vector<8x8xf32>
    %172 = vector.extract_strided_slice %40 {offsets = [8, 8], sizes = [8, 8], strides = [1, 1]} : vector<16x96xf32> to vector<8x8xf32>
    %173 = vector.extract_strided_slice %40 {offsets = [8, 40], sizes = [8, 8], strides = [1, 1]} : vector<16x96xf32> to vector<8x8xf32>
    %174 = vector.extract_strided_slice %40 {offsets = [8, 72], sizes = [8, 8], strides = [1, 1]} : vector<16x96xf32> to vector<8x8xf32>
    %175 = arith.mulf %172, %0 : vector<8x8xf32>
    %c4_i32_61 = arith.constant 4 : i32
    %176 = tpu.dynamic_rotate %172 by %c4_i32_61 dim 1 : vector<8x8xf32>, i32 -> vector<8x8xf32>
    %177 = arith.mulf %176, %1 : vector<8x8xf32>
    %178 = arith.addf %175, %177 : vector<8x8xf32>
    %cst_62 = arith.constant 0.353553385 : f32
    %179 = vector.broadcast %cst_62 : f32 to vector<8x8xf32>
    %180 = arith.mulf %178, %179 : vector<8x8xf32>
    %181 = arith.mulf %173, %0 : vector<8x8xf32>
    %c4_i32_63 = arith.constant 4 : i32
    %182 = tpu.dynamic_rotate %173 by %c4_i32_63 dim 1 : vector<8x8xf32>, i32 -> vector<8x8xf32>
    %183 = arith.mulf %182, %1 : vector<8x8xf32>
    %184 = arith.addf %181, %183 : vector<8x8xf32>
    %185 = tpu.transpose %184, [1, 0] : vector<8x8xf32> -> vector<8x8xf32>
    %cst_64 = arith.constant dense<0.000000e+00> : vector<8x8xf32>
    %186 = tpu.matmul %180, %185, %cst_64 {dimension_numbers = #tpu.dot_dimension_numbers<[1], [0], [0], [1], [0, 0, 1, 1], [], []>} : vector<8x8xf32>, vector<8x8xf32>, vector<8x8xf32> -> vector<8x8xf32>
    %cst_65 = arith.constant dense<0xFF800000> : vector<8xf32>
    %187 = vector.multi_reduction <maximumf>, %186, %cst_65 [1] : vector<8x8xf32> to vector<8xf32>
    %188 = vector.shape_cast %187 : vector<8xf32> to vector<8x1xf32>
    %189 = vector.broadcast %188 : vector<8x1xf32> to vector<8x8xf32>
    %190 = arith.subf %186, %189 : vector<8x8xf32>
    %191 = math.exp %190 : vector<8x8xf32>
    %cst_66 = arith.constant dense<0.000000e+00> : vector<8xf32>
    %192 = vector.multi_reduction <add>, %191, %cst_66 [1] : vector<8x8xf32> to vector<8xf32>
    %193 = vector.shape_cast %192 : vector<8xf32> to vector<8x1xf32>
    %194 = tpu.reciprocal %193 {approx = true} : vector<8x1xf32> -> vector<8x1xf32>
    %195 = vector.broadcast %194 : vector<8x1xf32> to vector<8x8xf32>
    %196 = arith.mulf %191, %195 : vector<8x8xf32>
    %cst_67 = arith.constant dense<0.000000e+00> : vector<8x8xf32>
    %197 = tpu.matmul %196, %174, %cst_67 {dimension_numbers = #tpu.dot_dimension_numbers<[1], [0], [0], [1], [0, 0, 1, 1], [], []>} : vector<8x8xf32>, vector<8x8xf32>, vector<8x8xf32> -> vector<8x8xf32>
    %198 = vector.extract_strided_slice %40 {offsets = [8, 16], sizes = [8, 8], strides = [1, 1]} : vector<16x96xf32> to vector<8x8xf32>
    %199 = vector.extract_strided_slice %40 {offsets = [8, 48], sizes = [8, 8], strides = [1, 1]} : vector<16x96xf32> to vector<8x8xf32>
    %200 = vector.extract_strided_slice %40 {offsets = [8, 80], sizes = [8, 8], strides = [1, 1]} : vector<16x96xf32> to vector<8x8xf32>
    %201 = arith.mulf %198, %0 : vector<8x8xf32>
    %c4_i32_68 = arith.constant 4 : i32
    %202 = tpu.dynamic_rotate %198 by %c4_i32_68 dim 1 : vector<8x8xf32>, i32 -> vector<8x8xf32>
    %203 = arith.mulf %202, %1 : vector<8x8xf32>
    %204 = arith.addf %201, %203 : vector<8x8xf32>
    %cst_69 = arith.constant 0.353553385 : f32
    %205 = vector.broadcast %cst_69 : f32 to vector<8x8xf32>
    %206 = arith.mulf %204, %205 : vector<8x8xf32>
    %207 = arith.mulf %199, %0 : vector<8x8xf32>
    %c4_i32_70 = arith.constant 4 : i32
    %208 = tpu.dynamic_rotate %199 by %c4_i32_70 dim 1 : vector<8x8xf32>, i32 -> vector<8x8xf32>
    %209 = arith.mulf %208, %1 : vector<8x8xf32>
    %210 = arith.addf %207, %209 : vector<8x8xf32>
    %211 = tpu.transpose %210, [1, 0] : vector<8x8xf32> -> vector<8x8xf32>
    %cst_71 = arith.constant dense<0.000000e+00> : vector<8x8xf32>
    %212 = tpu.matmul %206, %211, %cst_71 {dimension_numbers = #tpu.dot_dimension_numbers<[1], [0], [0], [1], [0, 0, 1, 1], [], []>} : vector<8x8xf32>, vector<8x8xf32>, vector<8x8xf32> -> vector<8x8xf32>
    %cst_72 = arith.constant dense<0xFF800000> : vector<8xf32>
    %213 = vector.multi_reduction <maximumf>, %212, %cst_72 [1] : vector<8x8xf32> to vector<8xf32>
    %214 = vector.shape_cast %213 : vector<8xf32> to vector<8x1xf32>
    %215 = vector.broadcast %214 : vector<8x1xf32> to vector<8x8xf32>
    %216 = arith.subf %212, %215 : vector<8x8xf32>
    %217 = math.exp %216 : vector<8x8xf32>
    %cst_73 = arith.constant dense<0.000000e+00> : vector<8xf32>
    %218 = vector.multi_reduction <add>, %217, %cst_73 [1] : vector<8x8xf32> to vector<8xf32>
    %219 = vector.shape_cast %218 : vector<8xf32> to vector<8x1xf32>
    %220 = tpu.reciprocal %219 {approx = true} : vector<8x1xf32> -> vector<8x1xf32>
    %221 = vector.broadcast %220 : vector<8x1xf32> to vector<8x8xf32>
    %222 = arith.mulf %217, %221 : vector<8x8xf32>
    %cst_74 = arith.constant dense<0.000000e+00> : vector<8x8xf32>
    %223 = tpu.matmul %222, %200, %cst_74 {dimension_numbers = #tpu.dot_dimension_numbers<[1], [0], [0], [1], [0, 0, 1, 1], [], []>} : vector<8x8xf32>, vector<8x8xf32>, vector<8x8xf32> -> vector<8x8xf32>
    %224 = vector.extract_strided_slice %40 {offsets = [8, 24], sizes = [8, 8], strides = [1, 1]} : vector<16x96xf32> to vector<8x8xf32>
    %225 = vector.extract_strided_slice %40 {offsets = [8, 56], sizes = [8, 8], strides = [1, 1]} : vector<16x96xf32> to vector<8x8xf32>
    %226 = vector.extract_strided_slice %40 {offsets = [8, 88], sizes = [8, 8], strides = [1, 1]} : vector<16x96xf32> to vector<8x8xf32>
    %227 = arith.mulf %224, %0 : vector<8x8xf32>
    %c4_i32_75 = arith.constant 4 : i32
    %228 = tpu.dynamic_rotate %224 by %c4_i32_75 dim 1 : vector<8x8xf32>, i32 -> vector<8x8xf32>
    %229 = arith.mulf %228, %1 : vector<8x8xf32>
    %230 = arith.addf %227, %229 : vector<8x8xf32>
    %cst_76 = arith.constant 0.353553385 : f32
    %231 = vector.broadcast %cst_76 : f32 to vector<8x8xf32>
    %232 = arith.mulf %230, %231 : vector<8x8xf32>
    %233 = arith.mulf %225, %0 : vector<8x8xf32>
    %c4_i32_77 = arith.constant 4 : i32
    %234 = tpu.dynamic_rotate %225 by %c4_i32_77 dim 1 : vector<8x8xf32>, i32 -> vector<8x8xf32>
    %235 = arith.mulf %234, %1 : vector<8x8xf32>
    %236 = arith.addf %233, %235 : vector<8x8xf32>
    %237 = tpu.transpose %236, [1, 0] : vector<8x8xf32> -> vector<8x8xf32>
    %cst_78 = arith.constant dense<0.000000e+00> : vector<8x8xf32>
    %238 = tpu.matmul %232, %237, %cst_78 {dimension_numbers = #tpu.dot_dimension_numbers<[1], [0], [0], [1], [0, 0, 1, 1], [], []>} : vector<8x8xf32>, vector<8x8xf32>, vector<8x8xf32> -> vector<8x8xf32>
    %cst_79 = arith.constant dense<0xFF800000> : vector<8xf32>
    %239 = vector.multi_reduction <maximumf>, %238, %cst_79 [1] : vector<8x8xf32> to vector<8xf32>
    %240 = vector.shape_cast %239 : vector<8xf32> to vector<8x1xf32>
    %241 = vector.broadcast %240 : vector<8x1xf32> to vector<8x8xf32>
    %242 = arith.subf %238, %241 : vector<8x8xf32>
    %243 = math.exp %242 : vector<8x8xf32>
    %cst_80 = arith.constant dense<0.000000e+00> : vector<8xf32>
    %244 = vector.multi_reduction <add>, %243, %cst_80 [1] : vector<8x8xf32> to vector<8xf32>
    %245 = vector.shape_cast %244 : vector<8xf32> to vector<8x1xf32>
    %246 = tpu.reciprocal %245 {approx = true} : vector<8x1xf32> -> vector<8x1xf32>
    %247 = vector.broadcast %246 : vector<8x1xf32> to vector<8x8xf32>
    %248 = arith.mulf %243, %247 : vector<8x8xf32>
    %cst_81 = arith.constant dense<0.000000e+00> : vector<8x8xf32>
    %249 = tpu.matmul %248, %226, %cst_81 {dimension_numbers = #tpu.dot_dimension_numbers<[1], [0], [0], [1], [0, 0, 1, 1], [], []>} : vector<8x8xf32>, vector<8x8xf32>, vector<8x8xf32> -> vector<8x8xf32>
    %250 = tpu.concatenate %171, %197, %223, %249 in 1 : vector<8x8xf32>, vector<8x8xf32>, vector<8x8xf32>, vector<8x8xf32> -> vector<8x32xf32>
    %251 = tpu.concatenate %145, %250 in 0 : vector<8x32xf32>, vector<8x32xf32> -> vector<16x32xf32>
    %c0_82 = arith.constant 0 : index
    %c0_83 = arith.constant 0 : index
    %c0_84 = arith.constant 0 : index
    %252 = vector.load %arg10[%c0_82, %c0_83, %c0_84] : memref<2x32x32xf32, #tpu.memory_space<vmem>>, vector<1x32x32xf32>
    %253 = vector.shape_cast %252 : vector<1x32x32xf32> to vector<32x32xf32>
    %cst_85 = arith.constant dense<0.000000e+00> : vector<16x32xf32>
    %254 = tpu.matmul %251, %253, %cst_85 {dimension_numbers = #tpu.dot_dimension_numbers<[1], [0], [0], [1], [0, 0, 1, 1], [], []>} : vector<16x32xf32>, vector<32x32xf32>, vector<16x32xf32> -> vector<16x32xf32>
    %c0_86 = arith.constant 0 : index
    %c0_87 = arith.constant 0 : index
    %c0_88 = arith.constant 0 : index
    %255 = vector.load %arg11[%c0_86, %c0_87, %c0_88] : memref<2x1x32xf32, #tpu.memory_space<vmem>>, vector<1x1x32xf32>
    %256 = vector.shape_cast %255 : vector<1x1x32xf32> to vector<1x32xf32>
    %257 = vector.broadcast %256 : vector<1x32xf32> to vector<16x32xf32>
    %258 = arith.addf %254, %257 : vector<16x32xf32>
    %259 = arith.addf %7, %258 : vector<16x32xf32>
    %c0_89 = arith.constant 0 : index
    %c0_90 = arith.constant 0 : index
    %c0_91 = arith.constant 0 : index
    %260 = vector.load %arg12[%c0_89, %c0_90, %c0_91] : memref<2x1x32xf32, #tpu.memory_space<vmem>>, vector<1x1x32xf32>
    %261 = vector.shape_cast %260 : vector<1x1x32xf32> to vector<1x32xf32>
    %c0_92 = arith.constant 0 : index
    %c0_93 = arith.constant 0 : index
    %c0_94 = arith.constant 0 : index
    %262 = vector.load %arg13[%c0_92, %c0_93, %c0_94] : memref<2x1x32xf32, #tpu.memory_space<vmem>>, vector<1x1x32xf32>
    %263 = vector.shape_cast %262 : vector<1x1x32xf32> to vector<1x32xf32>
    %cst_95 = arith.constant dense<0.000000e+00> : vector<16xf32>
    %264 = vector.multi_reduction <add>, %259, %cst_95 [1] : vector<16x32xf32> to vector<16xf32>
    %265 = vector.shape_cast %264 : vector<16xf32> to vector<16x1xf32>
    %cst_96 = arith.constant 3.200000e+01 : f32
    %266 = vector.broadcast %cst_96 : f32 to vector<16x1xf32>
    %267 = arith.divf %265, %266 : vector<16x1xf32>
    %268 = vector.broadcast %267 : vector<16x1xf32> to vector<16x32xf32>
    %269 = arith.subf %259, %268 : vector<16x32xf32>
    %270 = arith.mulf %269, %269 : vector<16x32xf32>
    %cst_97 = arith.constant dense<0.000000e+00> : vector<16xf32>
    %271 = vector.multi_reduction <add>, %270, %cst_97 [1] : vector<16x32xf32> to vector<16xf32>
    %272 = vector.shape_cast %271 : vector<16xf32> to vector<16x1xf32>
    %cst_98 = arith.constant 3.200000e+01 : f32
    %273 = vector.broadcast %cst_98 : f32 to vector<16x1xf32>
    %274 = arith.divf %272, %273 : vector<16x1xf32>
    %275 = vector.broadcast %267 : vector<16x1xf32> to vector<16x32xf32>
    %276 = arith.subf %259, %275 : vector<16x32xf32>
    %cst_99 = arith.constant 9.99999974E-6 : f32
    %277 = vector.broadcast %cst_99 : f32 to vector<16x1xf32>
    %278 = arith.addf %274, %277 : vector<16x1xf32>
    %279 = math.rsqrt %278 : vector<16x1xf32>
    %280 = vector.broadcast %279 : vector<16x1xf32> to vector<16x32xf32>
    %281 = arith.mulf %276, %280 : vector<16x32xf32>
    %282 = vector.broadcast %261 : vector<1x32xf32> to vector<16x32xf32>
    %283 = arith.mulf %281, %282 : vector<16x32xf32>
    %284 = vector.broadcast %263 : vector<1x32xf32> to vector<16x32xf32>
    %285 = arith.addf %283, %284 : vector<16x32xf32>
    %c0_100 = arith.constant 0 : index
    %c0_101 = arith.constant 0 : index
    %c0_102 = arith.constant 0 : index
    %286 = vector.load %arg14[%c0_100, %c0_101, %c0_102] : memref<2x32x128xf32, #tpu.memory_space<vmem>>, vector<1x32x128xf32>
    %287 = vector.shape_cast %286 : vector<1x32x128xf32> to vector<32x128xf32>
    %cst_103 = arith.constant dense<0.000000e+00> : vector<16x128xf32>
    %288 = tpu.matmul %285, %287, %cst_103 {dimension_numbers = #tpu.dot_dimension_numbers<[1], [0], [0], [1], [0, 0, 1, 1], [], []>} : vector<16x32xf32>, vector<32x128xf32>, vector<16x128xf32> -> vector<16x128xf32>
    %c0_104 = arith.constant 0 : index
    %c0_105 = arith.constant 0 : index
    %c0_106 = arith.constant 0 : index
    %289 = vector.load %arg15[%c0_104, %c0_105, %c0_106] : memref<2x1x128xf32, #tpu.memory_space<vmem>>, vector<1x1x128xf32>
    %290 = vector.shape_cast %289 : vector<1x1x128xf32> to vector<1x128xf32>
    %291 = vector.broadcast %290 : vector<1x128xf32> to vector<16x128xf32>
    %292 = arith.addf %288, %291 : vector<16x128xf32>
    %cst_107 = arith.constant 5.000000e-01 : f32
    %293 = vector.broadcast %cst_107 : f32 to vector<16x128xf32>
    %294 = arith.mulf %293, %292 : vector<16x128xf32>
    %cst_108 = arith.constant 0.707106769 : f32
    %295 = vector.broadcast %cst_108 : f32 to vector<16x128xf32>
    %296 = arith.mulf %292, %295 : vector<16x128xf32>
    %297 = math.absf %296 : vector<16x128xf32>
    %cst_109 = arith.constant 0.327591091 : f32
    %298 = vector.broadcast %cst_109 : f32 to vector<16x128xf32>
    %299 = arith.mulf %298, %297 : vector<16x128xf32>
    %cst_110 = arith.constant 1.000000e+00 : f32
    %300 = vector.broadcast %cst_110 : f32 to vector<16x128xf32>
    %301 = arith.addf %300, %299 : vector<16x128xf32>
    %cst_111 = arith.constant 1.000000e+00 : f32
    %302 = vector.broadcast %cst_111 : f32 to vector<16x128xf32>
    %303 = arith.divf %302, %301 : vector<16x128xf32>
    %cst_112 = arith.constant 1.06140542 : f32
    %304 = vector.broadcast %cst_112 : f32 to vector<16x128xf32>
    %305 = arith.mulf %304, %303 : vector<16x128xf32>
    %cst_113 = arith.constant -1.45315206 : f32
    %306 = vector.broadcast %cst_113 : f32 to vector<16x128xf32>
    %307 = arith.addf %305, %306 : vector<16x128xf32>
    %308 = arith.mulf %307, %303 : vector<16x128xf32>
    %cst_114 = arith.constant 1.42141378 : f32
    %309 = vector.broadcast %cst_114 : f32 to vector<16x128xf32>
    %310 = arith.addf %308, %309 : vector<16x128xf32>
    %311 = arith.mulf %310, %303 : vector<16x128xf32>
    %cst_115 = arith.constant -0.284496725 : f32
    %312 = vector.broadcast %cst_115 : f32 to vector<16x128xf32>
    %313 = arith.addf %311, %312 : vector<16x128xf32>
    %314 = arith.mulf %313, %303 : vector<16x128xf32>
    %cst_116 = arith.constant 0.254829586 : f32
    %315 = vector.broadcast %cst_116 : f32 to vector<16x128xf32>
    %316 = arith.addf %314, %315 : vector<16x128xf32>
    %317 = arith.mulf %316, %303 : vector<16x128xf32>
    %cst_117 = arith.constant 0.000000e+00 : f32
    %318 = vector.broadcast %cst_117 : f32 to vector<16x128xf32>
    %319 = arith.subf %318, %297 : vector<16x128xf32>
    %320 = arith.mulf %319, %297 : vector<16x128xf32>
    %321 = math.exp %320 : vector<16x128xf32>
    %322 = arith.mulf %317, %321 : vector<16x128xf32>
    %cst_118 = arith.constant 1.000000e+00 : f32
    %323 = vector.broadcast %cst_118 : f32 to vector<16x128xf32>
    %324 = arith.subf %323, %322 : vector<16x128xf32>
    %cst_119 = arith.constant 0.000000e+00 : f32
    %325 = vector.broadcast %cst_119 : f32 to vector<16x128xf32>
    %326 = arith.cmpf oge, %296, %325 : vector<16x128xf32>
    %cst_120 = arith.constant 0.000000e+00 : f32
    %327 = vector.broadcast %cst_120 : f32 to vector<16x128xf32>
    %328 = arith.subf %327, %324 : vector<16x128xf32>
    %329 = arith.select %326, %324, %328 : vector<16x128xi1>, vector<16x128xf32>
    %cst_121 = arith.constant 1.000000e+00 : f32
    %330 = vector.broadcast %cst_121 : f32 to vector<16x128xf32>
    %331 = arith.addf %330, %329 : vector<16x128xf32>
    %332 = arith.mulf %294, %331 : vector<16x128xf32>
    %c0_122 = arith.constant 0 : index
    %c0_123 = arith.constant 0 : index
    %c0_124 = arith.constant 0 : index
    %333 = vector.load %arg16[%c0_122, %c0_123, %c0_124] : memref<2x128x32xf32, #tpu.memory_space<vmem>>, vector<1x128x32xf32>
    %334 = vector.shape_cast %333 : vector<1x128x32xf32> to vector<128x32xf32>
    %cst_125 = arith.constant dense<0.000000e+00> : vector<16x32xf32>
    %335 = tpu.matmul %332, %334, %cst_125 {dimension_numbers = #tpu.dot_dimension_numbers<[1], [0], [0], [1], [0, 0, 1, 1], [], []>} : vector<16x128xf32>, vector<128x32xf32>, vector<16x32xf32> -> vector<16x32xf32>
    %c0_126 = arith.constant 0 : index
    %c0_127 = arith.constant 0 : index
    %c0_128 = arith.constant 0 : index
    %336 = vector.load %arg17[%c0_126, %c0_127, %c0_128] : memref<2x1x32xf32, #tpu.memory_space<vmem>>, vector<1x1x32xf32>
    %337 = vector.shape_cast %336 : vector<1x1x32xf32> to vector<1x32xf32>
    %338 = vector.broadcast %337 : vector<1x32xf32> to vector<16x32xf32>
    %339 = arith.addf %335, %338 : vector<16x32xf32>
    %340 = arith.addf %259, %339 : vector<16x32xf32>
    %c1 = arith.constant 1 : index
    %c0_129 = arith.constant 0 : index
    %c0_130 = arith.constant 0 : index
    %341 = vector.load %arg6[%c1, %c0_129, %c0_130] : memref<2x1x32xf32, #tpu.memory_space<vmem>>, vector<1x1x32xf32>
    %342 = vector.shape_cast %341 : vector<1x1x32xf32> to vector<1x32xf32>
    %c1_131 = arith.constant 1 : index
    %c0_132 = arith.constant 0 : index
    %c0_133 = arith.constant 0 : index
    %343 = vector.load %arg7[%c1_131, %c0_132, %c0_133] : memref<2x1x32xf32, #tpu.memory_space<vmem>>, vector<1x1x32xf32>
    %344 = vector.shape_cast %343 : vector<1x1x32xf32> to vector<1x32xf32>
    %cst_134 = arith.constant dense<0.000000e+00> : vector<16xf32>
    %345 = vector.multi_reduction <add>, %340, %cst_134 [1] : vector<16x32xf32> to vector<16xf32>
    %346 = vector.shape_cast %345 : vector<16xf32> to vector<16x1xf32>
    %cst_135 = arith.constant 3.200000e+01 : f32
    %347 = vector.broadcast %cst_135 : f32 to vector<16x1xf32>
    %348 = arith.divf %346, %347 : vector<16x1xf32>
    %349 = vector.broadcast %348 : vector<16x1xf32> to vector<16x32xf32>
    %350 = arith.subf %340, %349 : vector<16x32xf32>
    %351 = arith.mulf %350, %350 : vector<16x32xf32>
    %cst_136 = arith.constant dense<0.000000e+00> : vector<16xf32>
    %352 = vector.multi_reduction <add>, %351, %cst_136 [1] : vector<16x32xf32> to vector<16xf32>
    %353 = vector.shape_cast %352 : vector<16xf32> to vector<16x1xf32>
    %cst_137 = arith.constant 3.200000e+01 : f32
    %354 = vector.broadcast %cst_137 : f32 to vector<16x1xf32>
    %355 = arith.divf %353, %354 : vector<16x1xf32>
    %356 = vector.broadcast %348 : vector<16x1xf32> to vector<16x32xf32>
    %357 = arith.subf %340, %356 : vector<16x32xf32>
    %cst_138 = arith.constant 9.99999974E-6 : f32
    %358 = vector.broadcast %cst_138 : f32 to vector<16x1xf32>
    %359 = arith.addf %355, %358 : vector<16x1xf32>
    %360 = math.rsqrt %359 : vector<16x1xf32>
    %361 = vector.broadcast %360 : vector<16x1xf32> to vector<16x32xf32>
    %362 = arith.mulf %357, %361 : vector<16x32xf32>
    %363 = vector.broadcast %342 : vector<1x32xf32> to vector<16x32xf32>
    %364 = arith.mulf %362, %363 : vector<16x32xf32>
    %365 = vector.broadcast %344 : vector<1x32xf32> to vector<16x32xf32>
    %366 = arith.addf %364, %365 : vector<16x32xf32>
    %c1_139 = arith.constant 1 : index
    %c0_140 = arith.constant 0 : index
    %c0_141 = arith.constant 0 : index
    %367 = vector.load %arg8[%c1_139, %c0_140, %c0_141] : memref<2x32x96xf32, #tpu.memory_space<vmem>>, vector<1x32x96xf32>
    %368 = vector.shape_cast %367 : vector<1x32x96xf32> to vector<32x96xf32>
    %cst_142 = arith.constant dense<0.000000e+00> : vector<16x96xf32>
    %369 = tpu.matmul %366, %368, %cst_142 {dimension_numbers = #tpu.dot_dimension_numbers<[1], [0], [0], [1], [0, 0, 1, 1], [], []>} : vector<16x32xf32>, vector<32x96xf32>, vector<16x96xf32> -> vector<16x96xf32>
    %c1_143 = arith.constant 1 : index
    %c0_144 = arith.constant 0 : index
    %c0_145 = arith.constant 0 : index
    %370 = vector.load %arg9[%c1_143, %c0_144, %c0_145] : memref<2x1x96xf32, #tpu.memory_space<vmem>>, vector<1x1x96xf32>
    %371 = vector.shape_cast %370 : vector<1x1x96xf32> to vector<1x96xf32>
    %372 = vector.broadcast %371 : vector<1x96xf32> to vector<16x96xf32>
    %373 = arith.addf %369, %372 : vector<16x96xf32>
    %374 = vector.extract_strided_slice %373 {offsets = [0, 0], sizes = [8, 8], strides = [1, 1]} : vector<16x96xf32> to vector<8x8xf32>
    %375 = vector.extract_strided_slice %373 {offsets = [0, 32], sizes = [8, 8], strides = [1, 1]} : vector<16x96xf32> to vector<8x8xf32>
    %376 = vector.extract_strided_slice %373 {offsets = [0, 64], sizes = [8, 8], strides = [1, 1]} : vector<16x96xf32> to vector<8x8xf32>
    %377 = arith.mulf %374, %0 : vector<8x8xf32>
    %c4_i32_146 = arith.constant 4 : i32
    %378 = tpu.dynamic_rotate %374 by %c4_i32_146 dim 1 : vector<8x8xf32>, i32 -> vector<8x8xf32>
    %379 = arith.mulf %378, %1 : vector<8x8xf32>
    %380 = arith.addf %377, %379 : vector<8x8xf32>
    %cst_147 = arith.constant 0.353553385 : f32
    %381 = vector.broadcast %cst_147 : f32 to vector<8x8xf32>
    %382 = arith.mulf %380, %381 : vector<8x8xf32>
    %383 = arith.mulf %375, %0 : vector<8x8xf32>
    %c4_i32_148 = arith.constant 4 : i32
    %384 = tpu.dynamic_rotate %375 by %c4_i32_148 dim 1 : vector<8x8xf32>, i32 -> vector<8x8xf32>
    %385 = arith.mulf %384, %1 : vector<8x8xf32>
    %386 = arith.addf %383, %385 : vector<8x8xf32>
    %387 = tpu.transpose %386, [1, 0] : vector<8x8xf32> -> vector<8x8xf32>
    %cst_149 = arith.constant dense<0.000000e+00> : vector<8x8xf32>
    %388 = tpu.matmul %382, %387, %cst_149 {dimension_numbers = #tpu.dot_dimension_numbers<[1], [0], [0], [1], [0, 0, 1, 1], [], []>} : vector<8x8xf32>, vector<8x8xf32>, vector<8x8xf32> -> vector<8x8xf32>
    %cst_150 = arith.constant dense<0xFF800000> : vector<8xf32>
    %389 = vector.multi_reduction <maximumf>, %388, %cst_150 [1] : vector<8x8xf32> to vector<8xf32>
    %390 = vector.shape_cast %389 : vector<8xf32> to vector<8x1xf32>
    %391 = vector.broadcast %390 : vector<8x1xf32> to vector<8x8xf32>
    %392 = arith.subf %388, %391 : vector<8x8xf32>
    %393 = math.exp %392 : vector<8x8xf32>
    %cst_151 = arith.constant dense<0.000000e+00> : vector<8xf32>
    %394 = vector.multi_reduction <add>, %393, %cst_151 [1] : vector<8x8xf32> to vector<8xf32>
    %395 = vector.shape_cast %394 : vector<8xf32> to vector<8x1xf32>
    %396 = tpu.reciprocal %395 {approx = true} : vector<8x1xf32> -> vector<8x1xf32>
    %397 = vector.broadcast %396 : vector<8x1xf32> to vector<8x8xf32>
    %398 = arith.mulf %393, %397 : vector<8x8xf32>
    %cst_152 = arith.constant dense<0.000000e+00> : vector<8x8xf32>
    %399 = tpu.matmul %398, %376, %cst_152 {dimension_numbers = #tpu.dot_dimension_numbers<[1], [0], [0], [1], [0, 0, 1, 1], [], []>} : vector<8x8xf32>, vector<8x8xf32>, vector<8x8xf32> -> vector<8x8xf32>
    %400 = vector.extract_strided_slice %373 {offsets = [0, 8], sizes = [8, 8], strides = [1, 1]} : vector<16x96xf32> to vector<8x8xf32>
    %401 = vector.extract_strided_slice %373 {offsets = [0, 40], sizes = [8, 8], strides = [1, 1]} : vector<16x96xf32> to vector<8x8xf32>
    %402 = vector.extract_strided_slice %373 {offsets = [0, 72], sizes = [8, 8], strides = [1, 1]} : vector<16x96xf32> to vector<8x8xf32>
    %403 = arith.mulf %400, %0 : vector<8x8xf32>
    %c4_i32_153 = arith.constant 4 : i32
    %404 = tpu.dynamic_rotate %400 by %c4_i32_153 dim 1 : vector<8x8xf32>, i32 -> vector<8x8xf32>
    %405 = arith.mulf %404, %1 : vector<8x8xf32>
    %406 = arith.addf %403, %405 : vector<8x8xf32>
    %cst_154 = arith.constant 0.353553385 : f32
    %407 = vector.broadcast %cst_154 : f32 to vector<8x8xf32>
    %408 = arith.mulf %406, %407 : vector<8x8xf32>
    %409 = arith.mulf %401, %0 : vector<8x8xf32>
    %c4_i32_155 = arith.constant 4 : i32
    %410 = tpu.dynamic_rotate %401 by %c4_i32_155 dim 1 : vector<8x8xf32>, i32 -> vector<8x8xf32>
    %411 = arith.mulf %410, %1 : vector<8x8xf32>
    %412 = arith.addf %409, %411 : vector<8x8xf32>
    %413 = tpu.transpose %412, [1, 0] : vector<8x8xf32> -> vector<8x8xf32>
    %cst_156 = arith.constant dense<0.000000e+00> : vector<8x8xf32>
    %414 = tpu.matmul %408, %413, %cst_156 {dimension_numbers = #tpu.dot_dimension_numbers<[1], [0], [0], [1], [0, 0, 1, 1], [], []>} : vector<8x8xf32>, vector<8x8xf32>, vector<8x8xf32> -> vector<8x8xf32>
    %cst_157 = arith.constant dense<0xFF800000> : vector<8xf32>
    %415 = vector.multi_reduction <maximumf>, %414, %cst_157 [1] : vector<8x8xf32> to vector<8xf32>
    %416 = vector.shape_cast %415 : vector<8xf32> to vector<8x1xf32>
    %417 = vector.broadcast %416 : vector<8x1xf32> to vector<8x8xf32>
    %418 = arith.subf %414, %417 : vector<8x8xf32>
    %419 = math.exp %418 : vector<8x8xf32>
    %cst_158 = arith.constant dense<0.000000e+00> : vector<8xf32>
    %420 = vector.multi_reduction <add>, %419, %cst_158 [1] : vector<8x8xf32> to vector<8xf32>
    %421 = vector.shape_cast %420 : vector<8xf32> to vector<8x1xf32>
    %422 = tpu.reciprocal %421 {approx = true} : vector<8x1xf32> -> vector<8x1xf32>
    %423 = vector.broadcast %422 : vector<8x1xf32> to vector<8x8xf32>
    %424 = arith.mulf %419, %423 : vector<8x8xf32>
    %cst_159 = arith.constant dense<0.000000e+00> : vector<8x8xf32>
    %425 = tpu.matmul %424, %402, %cst_159 {dimension_numbers = #tpu.dot_dimension_numbers<[1], [0], [0], [1], [0, 0, 1, 1], [], []>} : vector<8x8xf32>, vector<8x8xf32>, vector<8x8xf32> -> vector<8x8xf32>
    %426 = vector.extract_strided_slice %373 {offsets = [0, 16], sizes = [8, 8], strides = [1, 1]} : vector<16x96xf32> to vector<8x8xf32>
    %427 = vector.extract_strided_slice %373 {offsets = [0, 48], sizes = [8, 8], strides = [1, 1]} : vector<16x96xf32> to vector<8x8xf32>
    %428 = vector.extract_strided_slice %373 {offsets = [0, 80], sizes = [8, 8], strides = [1, 1]} : vector<16x96xf32> to vector<8x8xf32>
    %429 = arith.mulf %426, %0 : vector<8x8xf32>
    %c4_i32_160 = arith.constant 4 : i32
    %430 = tpu.dynamic_rotate %426 by %c4_i32_160 dim 1 : vector<8x8xf32>, i32 -> vector<8x8xf32>
    %431 = arith.mulf %430, %1 : vector<8x8xf32>
    %432 = arith.addf %429, %431 : vector<8x8xf32>
    %cst_161 = arith.constant 0.353553385 : f32
    %433 = vector.broadcast %cst_161 : f32 to vector<8x8xf32>
    %434 = arith.mulf %432, %433 : vector<8x8xf32>
    %435 = arith.mulf %427, %0 : vector<8x8xf32>
    %c4_i32_162 = arith.constant 4 : i32
    %436 = tpu.dynamic_rotate %427 by %c4_i32_162 dim 1 : vector<8x8xf32>, i32 -> vector<8x8xf32>
    %437 = arith.mulf %436, %1 : vector<8x8xf32>
    %438 = arith.addf %435, %437 : vector<8x8xf32>
    %439 = tpu.transpose %438, [1, 0] : vector<8x8xf32> -> vector<8x8xf32>
    %cst_163 = arith.constant dense<0.000000e+00> : vector<8x8xf32>
    %440 = tpu.matmul %434, %439, %cst_163 {dimension_numbers = #tpu.dot_dimension_numbers<[1], [0], [0], [1], [0, 0, 1, 1], [], []>} : vector<8x8xf32>, vector<8x8xf32>, vector<8x8xf32> -> vector<8x8xf32>
    %cst_164 = arith.constant dense<0xFF800000> : vector<8xf32>
    %441 = vector.multi_reduction <maximumf>, %440, %cst_164 [1] : vector<8x8xf32> to vector<8xf32>
    %442 = vector.shape_cast %441 : vector<8xf32> to vector<8x1xf32>
    %443 = vector.broadcast %442 : vector<8x1xf32> to vector<8x8xf32>
    %444 = arith.subf %440, %443 : vector<8x8xf32>
    %445 = math.exp %444 : vector<8x8xf32>
    %cst_165 = arith.constant dense<0.000000e+00> : vector<8xf32>
    %446 = vector.multi_reduction <add>, %445, %cst_165 [1] : vector<8x8xf32> to vector<8xf32>
    %447 = vector.shape_cast %446 : vector<8xf32> to vector<8x1xf32>
    %448 = tpu.reciprocal %447 {approx = true} : vector<8x1xf32> -> vector<8x1xf32>
    %449 = vector.broadcast %448 : vector<8x1xf32> to vector<8x8xf32>
    %450 = arith.mulf %445, %449 : vector<8x8xf32>
    %cst_166 = arith.constant dense<0.000000e+00> : vector<8x8xf32>
    %451 = tpu.matmul %450, %428, %cst_166 {dimension_numbers = #tpu.dot_dimension_numbers<[1], [0], [0], [1], [0, 0, 1, 1], [], []>} : vector<8x8xf32>, vector<8x8xf32>, vector<8x8xf32> -> vector<8x8xf32>
    %452 = vector.extract_strided_slice %373 {offsets = [0, 24], sizes = [8, 8], strides = [1, 1]} : vector<16x96xf32> to vector<8x8xf32>
    %453 = vector.extract_strided_slice %373 {offsets = [0, 56], sizes = [8, 8], strides = [1, 1]} : vector<16x96xf32> to vector<8x8xf32>
    %454 = vector.extract_strided_slice %373 {offsets = [0, 88], sizes = [8, 8], strides = [1, 1]} : vector<16x96xf32> to vector<8x8xf32>
    %455 = arith.mulf %452, %0 : vector<8x8xf32>
    %c4_i32_167 = arith.constant 4 : i32
    %456 = tpu.dynamic_rotate %452 by %c4_i32_167 dim 1 : vector<8x8xf32>, i32 -> vector<8x8xf32>
    %457 = arith.mulf %456, %1 : vector<8x8xf32>
    %458 = arith.addf %455, %457 : vector<8x8xf32>
    %cst_168 = arith.constant 0.353553385 : f32
    %459 = vector.broadcast %cst_168 : f32 to vector<8x8xf32>
    %460 = arith.mulf %458, %459 : vector<8x8xf32>
    %461 = arith.mulf %453, %0 : vector<8x8xf32>
    %c4_i32_169 = arith.constant 4 : i32
    %462 = tpu.dynamic_rotate %453 by %c4_i32_169 dim 1 : vector<8x8xf32>, i32 -> vector<8x8xf32>
    %463 = arith.mulf %462, %1 : vector<8x8xf32>
    %464 = arith.addf %461, %463 : vector<8x8xf32>
    %465 = tpu.transpose %464, [1, 0] : vector<8x8xf32> -> vector<8x8xf32>
    %cst_170 = arith.constant dense<0.000000e+00> : vector<8x8xf32>
    %466 = tpu.matmul %460, %465, %cst_170 {dimension_numbers = #tpu.dot_dimension_numbers<[1], [0], [0], [1], [0, 0, 1, 1], [], []>} : vector<8x8xf32>, vector<8x8xf32>, vector<8x8xf32> -> vector<8x8xf32>
    %cst_171 = arith.constant dense<0xFF800000> : vector<8xf32>
    %467 = vector.multi_reduction <maximumf>, %466, %cst_171 [1] : vector<8x8xf32> to vector<8xf32>
    %468 = vector.shape_cast %467 : vector<8xf32> to vector<8x1xf32>
    %469 = vector.broadcast %468 : vector<8x1xf32> to vector<8x8xf32>
    %470 = arith.subf %466, %469 : vector<8x8xf32>
    %471 = math.exp %470 : vector<8x8xf32>
    %cst_172 = arith.constant dense<0.000000e+00> : vector<8xf32>
    %472 = vector.multi_reduction <add>, %471, %cst_172 [1] : vector<8x8xf32> to vector<8xf32>
    %473 = vector.shape_cast %472 : vector<8xf32> to vector<8x1xf32>
    %474 = tpu.reciprocal %473 {approx = true} : vector<8x1xf32> -> vector<8x1xf32>
    %475 = vector.broadcast %474 : vector<8x1xf32> to vector<8x8xf32>
    %476 = arith.mulf %471, %475 : vector<8x8xf32>
    %cst_173 = arith.constant dense<0.000000e+00> : vector<8x8xf32>
    %477 = tpu.matmul %476, %454, %cst_173 {dimension_numbers = #tpu.dot_dimension_numbers<[1], [0], [0], [1], [0, 0, 1, 1], [], []>} : vector<8x8xf32>, vector<8x8xf32>, vector<8x8xf32> -> vector<8x8xf32>
    %478 = tpu.concatenate %399, %425, %451, %477 in 1 : vector<8x8xf32>, vector<8x8xf32>, vector<8x8xf32>, vector<8x8xf32> -> vector<8x32xf32>
    %479 = vector.extract_strided_slice %373 {offsets = [8, 0], sizes = [8, 8], strides = [1, 1]} : vector<16x96xf32> to vector<8x8xf32>
    %480 = vector.extract_strided_slice %373 {offsets = [8, 32], sizes = [8, 8], strides = [1, 1]} : vector<16x96xf32> to vector<8x8xf32>
    %481 = vector.extract_strided_slice %373 {offsets = [8, 64], sizes = [8, 8], strides = [1, 1]} : vector<16x96xf32> to vector<8x8xf32>
    %482 = arith.mulf %479, %0 : vector<8x8xf32>
    %c4_i32_174 = arith.constant 4 : i32
    %483 = tpu.dynamic_rotate %479 by %c4_i32_174 dim 1 : vector<8x8xf32>, i32 -> vector<8x8xf32>
    %484 = arith.mulf %483, %1 : vector<8x8xf32>
    %485 = arith.addf %482, %484 : vector<8x8xf32>
    %cst_175 = arith.constant 0.353553385 : f32
    %486 = vector.broadcast %cst_175 : f32 to vector<8x8xf32>
    %487 = arith.mulf %485, %486 : vector<8x8xf32>
    %488 = arith.mulf %480, %0 : vector<8x8xf32>
    %c4_i32_176 = arith.constant 4 : i32
    %489 = tpu.dynamic_rotate %480 by %c4_i32_176 dim 1 : vector<8x8xf32>, i32 -> vector<8x8xf32>
    %490 = arith.mulf %489, %1 : vector<8x8xf32>
    %491 = arith.addf %488, %490 : vector<8x8xf32>
    %492 = tpu.transpose %491, [1, 0] : vector<8x8xf32> -> vector<8x8xf32>
    %cst_177 = arith.constant dense<0.000000e+00> : vector<8x8xf32>
    %493 = tpu.matmul %487, %492, %cst_177 {dimension_numbers = #tpu.dot_dimension_numbers<[1], [0], [0], [1], [0, 0, 1, 1], [], []>} : vector<8x8xf32>, vector<8x8xf32>, vector<8x8xf32> -> vector<8x8xf32>
    %cst_178 = arith.constant dense<0xFF800000> : vector<8xf32>
    %494 = vector.multi_reduction <maximumf>, %493, %cst_178 [1] : vector<8x8xf32> to vector<8xf32>
    %495 = vector.shape_cast %494 : vector<8xf32> to vector<8x1xf32>
    %496 = vector.broadcast %495 : vector<8x1xf32> to vector<8x8xf32>
    %497 = arith.subf %493, %496 : vector<8x8xf32>
    %498 = math.exp %497 : vector<8x8xf32>
    %cst_179 = arith.constant dense<0.000000e+00> : vector<8xf32>
    %499 = vector.multi_reduction <add>, %498, %cst_179 [1] : vector<8x8xf32> to vector<8xf32>
    %500 = vector.shape_cast %499 : vector<8xf32> to vector<8x1xf32>
    %501 = tpu.reciprocal %500 {approx = true} : vector<8x1xf32> -> vector<8x1xf32>
    %502 = vector.broadcast %501 : vector<8x1xf32> to vector<8x8xf32>
    %503 = arith.mulf %498, %502 : vector<8x8xf32>
    %cst_180 = arith.constant dense<0.000000e+00> : vector<8x8xf32>
    %504 = tpu.matmul %503, %481, %cst_180 {dimension_numbers = #tpu.dot_dimension_numbers<[1], [0], [0], [1], [0, 0, 1, 1], [], []>} : vector<8x8xf32>, vector<8x8xf32>, vector<8x8xf32> -> vector<8x8xf32>
    %505 = vector.extract_strided_slice %373 {offsets = [8, 8], sizes = [8, 8], strides = [1, 1]} : vector<16x96xf32> to vector<8x8xf32>
    %506 = vector.extract_strided_slice %373 {offsets = [8, 40], sizes = [8, 8], strides = [1, 1]} : vector<16x96xf32> to vector<8x8xf32>
    %507 = vector.extract_strided_slice %373 {offsets = [8, 72], sizes = [8, 8], strides = [1, 1]} : vector<16x96xf32> to vector<8x8xf32>
    %508 = arith.mulf %505, %0 : vector<8x8xf32>
    %c4_i32_181 = arith.constant 4 : i32
    %509 = tpu.dynamic_rotate %505 by %c4_i32_181 dim 1 : vector<8x8xf32>, i32 -> vector<8x8xf32>
    %510 = arith.mulf %509, %1 : vector<8x8xf32>
    %511 = arith.addf %508, %510 : vector<8x8xf32>
    %cst_182 = arith.constant 0.353553385 : f32
    %512 = vector.broadcast %cst_182 : f32 to vector<8x8xf32>
    %513 = arith.mulf %511, %512 : vector<8x8xf32>
    %514 = arith.mulf %506, %0 : vector<8x8xf32>
    %c4_i32_183 = arith.constant 4 : i32
    %515 = tpu.dynamic_rotate %506 by %c4_i32_183 dim 1 : vector<8x8xf32>, i32 -> vector<8x8xf32>
    %516 = arith.mulf %515, %1 : vector<8x8xf32>
    %517 = arith.addf %514, %516 : vector<8x8xf32>
    %518 = tpu.transpose %517, [1, 0] : vector<8x8xf32> -> vector<8x8xf32>
    %cst_184 = arith.constant dense<0.000000e+00> : vector<8x8xf32>
    %519 = tpu.matmul %513, %518, %cst_184 {dimension_numbers = #tpu.dot_dimension_numbers<[1], [0], [0], [1], [0, 0, 1, 1], [], []>} : vector<8x8xf32>, vector<8x8xf32>, vector<8x8xf32> -> vector<8x8xf32>
    %cst_185 = arith.constant dense<0xFF800000> : vector<8xf32>
    %520 = vector.multi_reduction <maximumf>, %519, %cst_185 [1] : vector<8x8xf32> to vector<8xf32>
    %521 = vector.shape_cast %520 : vector<8xf32> to vector<8x1xf32>
    %522 = vector.broadcast %521 : vector<8x1xf32> to vector<8x8xf32>
    %523 = arith.subf %519, %522 : vector<8x8xf32>
    %524 = math.exp %523 : vector<8x8xf32>
    %cst_186 = arith.constant dense<0.000000e+00> : vector<8xf32>
    %525 = vector.multi_reduction <add>, %524, %cst_186 [1] : vector<8x8xf32> to vector<8xf32>
    %526 = vector.shape_cast %525 : vector<8xf32> to vector<8x1xf32>
    %527 = tpu.reciprocal %526 {approx = true} : vector<8x1xf32> -> vector<8x1xf32>
    %528 = vector.broadcast %527 : vector<8x1xf32> to vector<8x8xf32>
    %529 = arith.mulf %524, %528 : vector<8x8xf32>
    %cst_187 = arith.constant dense<0.000000e+00> : vector<8x8xf32>
    %530 = tpu.matmul %529, %507, %cst_187 {dimension_numbers = #tpu.dot_dimension_numbers<[1], [0], [0], [1], [0, 0, 1, 1], [], []>} : vector<8x8xf32>, vector<8x8xf32>, vector<8x8xf32> -> vector<8x8xf32>
    %531 = vector.extract_strided_slice %373 {offsets = [8, 16], sizes = [8, 8], strides = [1, 1]} : vector<16x96xf32> to vector<8x8xf32>
    %532 = vector.extract_strided_slice %373 {offsets = [8, 48], sizes = [8, 8], strides = [1, 1]} : vector<16x96xf32> to vector<8x8xf32>
    %533 = vector.extract_strided_slice %373 {offsets = [8, 80], sizes = [8, 8], strides = [1, 1]} : vector<16x96xf32> to vector<8x8xf32>
    %534 = arith.mulf %531, %0 : vector<8x8xf32>
    %c4_i32_188 = arith.constant 4 : i32
    %535 = tpu.dynamic_rotate %531 by %c4_i32_188 dim 1 : vector<8x8xf32>, i32 -> vector<8x8xf32>
    %536 = arith.mulf %535, %1 : vector<8x8xf32>
    %537 = arith.addf %534, %536 : vector<8x8xf32>
    %cst_189 = arith.constant 0.353553385 : f32
    %538 = vector.broadcast %cst_189 : f32 to vector<8x8xf32>
    %539 = arith.mulf %537, %538 : vector<8x8xf32>
    %540 = arith.mulf %532, %0 : vector<8x8xf32>
    %c4_i32_190 = arith.constant 4 : i32
    %541 = tpu.dynamic_rotate %532 by %c4_i32_190 dim 1 : vector<8x8xf32>, i32 -> vector<8x8xf32>
    %542 = arith.mulf %541, %1 : vector<8x8xf32>
    %543 = arith.addf %540, %542 : vector<8x8xf32>
    %544 = tpu.transpose %543, [1, 0] : vector<8x8xf32> -> vector<8x8xf32>
    %cst_191 = arith.constant dense<0.000000e+00> : vector<8x8xf32>
    %545 = tpu.matmul %539, %544, %cst_191 {dimension_numbers = #tpu.dot_dimension_numbers<[1], [0], [0], [1], [0, 0, 1, 1], [], []>} : vector<8x8xf32>, vector<8x8xf32>, vector<8x8xf32> -> vector<8x8xf32>
    %cst_192 = arith.constant dense<0xFF800000> : vector<8xf32>
    %546 = vector.multi_reduction <maximumf>, %545, %cst_192 [1] : vector<8x8xf32> to vector<8xf32>
    %547 = vector.shape_cast %546 : vector<8xf32> to vector<8x1xf32>
    %548 = vector.broadcast %547 : vector<8x1xf32> to vector<8x8xf32>
    %549 = arith.subf %545, %548 : vector<8x8xf32>
    %550 = math.exp %549 : vector<8x8xf32>
    %cst_193 = arith.constant dense<0.000000e+00> : vector<8xf32>
    %551 = vector.multi_reduction <add>, %550, %cst_193 [1] : vector<8x8xf32> to vector<8xf32>
    %552 = vector.shape_cast %551 : vector<8xf32> to vector<8x1xf32>
    %553 = tpu.reciprocal %552 {approx = true} : vector<8x1xf32> -> vector<8x1xf32>
    %554 = vector.broadcast %553 : vector<8x1xf32> to vector<8x8xf32>
    %555 = arith.mulf %550, %554 : vector<8x8xf32>
    %cst_194 = arith.constant dense<0.000000e+00> : vector<8x8xf32>
    %556 = tpu.matmul %555, %533, %cst_194 {dimension_numbers = #tpu.dot_dimension_numbers<[1], [0], [0], [1], [0, 0, 1, 1], [], []>} : vector<8x8xf32>, vector<8x8xf32>, vector<8x8xf32> -> vector<8x8xf32>
    %557 = vector.extract_strided_slice %373 {offsets = [8, 24], sizes = [8, 8], strides = [1, 1]} : vector<16x96xf32> to vector<8x8xf32>
    %558 = vector.extract_strided_slice %373 {offsets = [8, 56], sizes = [8, 8], strides = [1, 1]} : vector<16x96xf32> to vector<8x8xf32>
    %559 = vector.extract_strided_slice %373 {offsets = [8, 88], sizes = [8, 8], strides = [1, 1]} : vector<16x96xf32> to vector<8x8xf32>
    %560 = arith.mulf %557, %0 : vector<8x8xf32>
    %c4_i32_195 = arith.constant 4 : i32
    %561 = tpu.dynamic_rotate %557 by %c4_i32_195 dim 1 : vector<8x8xf32>, i32 -> vector<8x8xf32>
    %562 = arith.mulf %561, %1 : vector<8x8xf32>
    %563 = arith.addf %560, %562 : vector<8x8xf32>
    %cst_196 = arith.constant 0.353553385 : f32
    %564 = vector.broadcast %cst_196 : f32 to vector<8x8xf32>
    %565 = arith.mulf %563, %564 : vector<8x8xf32>
    %566 = arith.mulf %558, %0 : vector<8x8xf32>
    %c4_i32_197 = arith.constant 4 : i32
    %567 = tpu.dynamic_rotate %558 by %c4_i32_197 dim 1 : vector<8x8xf32>, i32 -> vector<8x8xf32>
    %568 = arith.mulf %567, %1 : vector<8x8xf32>
    %569 = arith.addf %566, %568 : vector<8x8xf32>
    %570 = tpu.transpose %569, [1, 0] : vector<8x8xf32> -> vector<8x8xf32>
    %cst_198 = arith.constant dense<0.000000e+00> : vector<8x8xf32>
    %571 = tpu.matmul %565, %570, %cst_198 {dimension_numbers = #tpu.dot_dimension_numbers<[1], [0], [0], [1], [0, 0, 1, 1], [], []>} : vector<8x8xf32>, vector<8x8xf32>, vector<8x8xf32> -> vector<8x8xf32>
    %cst_199 = arith.constant dense<0xFF800000> : vector<8xf32>
    %572 = vector.multi_reduction <maximumf>, %571, %cst_199 [1] : vector<8x8xf32> to vector<8xf32>
    %573 = vector.shape_cast %572 : vector<8xf32> to vector<8x1xf32>
    %574 = vector.broadcast %573 : vector<8x1xf32> to vector<8x8xf32>
    %575 = arith.subf %571, %574 : vector<8x8xf32>
    %576 = math.exp %575 : vector<8x8xf32>
    %cst_200 = arith.constant dense<0.000000e+00> : vector<8xf32>
    %577 = vector.multi_reduction <add>, %576, %cst_200 [1] : vector<8x8xf32> to vector<8xf32>
    %578 = vector.shape_cast %577 : vector<8xf32> to vector<8x1xf32>
    %579 = tpu.reciprocal %578 {approx = true} : vector<8x1xf32> -> vector<8x1xf32>
    %580 = vector.broadcast %579 : vector<8x1xf32> to vector<8x8xf32>
    %581 = arith.mulf %576, %580 : vector<8x8xf32>
    %cst_201 = arith.constant dense<0.000000e+00> : vector<8x8xf32>
    %582 = tpu.matmul %581, %559, %cst_201 {dimension_numbers = #tpu.dot_dimension_numbers<[1], [0], [0], [1], [0, 0, 1, 1], [], []>} : vector<8x8xf32>, vector<8x8xf32>, vector<8x8xf32> -> vector<8x8xf32>
    %583 = tpu.concatenate %504, %530, %556, %582 in 1 : vector<8x8xf32>, vector<8x8xf32>, vector<8x8xf32>, vector<8x8xf32> -> vector<8x32xf32>
    %584 = tpu.concatenate %478, %583 in 0 : vector<8x32xf32>, vector<8x32xf32> -> vector<16x32xf32>
    %c1_202 = arith.constant 1 : index
    %c0_203 = arith.constant 0 : index
    %c0_204 = arith.constant 0 : index
    %585 = vector.load %arg10[%c1_202, %c0_203, %c0_204] : memref<2x32x32xf32, #tpu.memory_space<vmem>>, vector<1x32x32xf32>
    %586 = vector.shape_cast %585 : vector<1x32x32xf32> to vector<32x32xf32>
    %cst_205 = arith.constant dense<0.000000e+00> : vector<16x32xf32>
    %587 = tpu.matmul %584, %586, %cst_205 {dimension_numbers = #tpu.dot_dimension_numbers<[1], [0], [0], [1], [0, 0, 1, 1], [], []>} : vector<16x32xf32>, vector<32x32xf32>, vector<16x32xf32> -> vector<16x32xf32>
    %c1_206 = arith.constant 1 : index
    %c0_207 = arith.constant 0 : index
    %c0_208 = arith.constant 0 : index
    %588 = vector.load %arg11[%c1_206, %c0_207, %c0_208] : memref<2x1x32xf32, #tpu.memory_space<vmem>>, vector<1x1x32xf32>
    %589 = vector.shape_cast %588 : vector<1x1x32xf32> to vector<1x32xf32>
    %590 = vector.broadcast %589 : vector<1x32xf32> to vector<16x32xf32>
    %591 = arith.addf %587, %590 : vector<16x32xf32>
    %592 = arith.addf %340, %591 : vector<16x32xf32>
    %c1_209 = arith.constant 1 : index
    %c0_210 = arith.constant 0 : index
    %c0_211 = arith.constant 0 : index
    %593 = vector.load %arg12[%c1_209, %c0_210, %c0_211] : memref<2x1x32xf32, #tpu.memory_space<vmem>>, vector<1x1x32xf32>
    %594 = vector.shape_cast %593 : vector<1x1x32xf32> to vector<1x32xf32>
    %c1_212 = arith.constant 1 : index
    %c0_213 = arith.constant 0 : index
    %c0_214 = arith.constant 0 : index
    %595 = vector.load %arg13[%c1_212, %c0_213, %c0_214] : memref<2x1x32xf32, #tpu.memory_space<vmem>>, vector<1x1x32xf32>
    %596 = vector.shape_cast %595 : vector<1x1x32xf32> to vector<1x32xf32>
    %cst_215 = arith.constant dense<0.000000e+00> : vector<16xf32>
    %597 = vector.multi_reduction <add>, %592, %cst_215 [1] : vector<16x32xf32> to vector<16xf32>
    %598 = vector.shape_cast %597 : vector<16xf32> to vector<16x1xf32>
    %cst_216 = arith.constant 3.200000e+01 : f32
    %599 = vector.broadcast %cst_216 : f32 to vector<16x1xf32>
    %600 = arith.divf %598, %599 : vector<16x1xf32>
    %601 = vector.broadcast %600 : vector<16x1xf32> to vector<16x32xf32>
    %602 = arith.subf %592, %601 : vector<16x32xf32>
    %603 = arith.mulf %602, %602 : vector<16x32xf32>
    %cst_217 = arith.constant dense<0.000000e+00> : vector<16xf32>
    %604 = vector.multi_reduction <add>, %603, %cst_217 [1] : vector<16x32xf32> to vector<16xf32>
    %605 = vector.shape_cast %604 : vector<16xf32> to vector<16x1xf32>
    %cst_218 = arith.constant 3.200000e+01 : f32
    %606 = vector.broadcast %cst_218 : f32 to vector<16x1xf32>
    %607 = arith.divf %605, %606 : vector<16x1xf32>
    %608 = vector.broadcast %600 : vector<16x1xf32> to vector<16x32xf32>
    %609 = arith.subf %592, %608 : vector<16x32xf32>
    %cst_219 = arith.constant 9.99999974E-6 : f32
    %610 = vector.broadcast %cst_219 : f32 to vector<16x1xf32>
    %611 = arith.addf %607, %610 : vector<16x1xf32>
    %612 = math.rsqrt %611 : vector<16x1xf32>
    %613 = vector.broadcast %612 : vector<16x1xf32> to vector<16x32xf32>
    %614 = arith.mulf %609, %613 : vector<16x32xf32>
    %615 = vector.broadcast %594 : vector<1x32xf32> to vector<16x32xf32>
    %616 = arith.mulf %614, %615 : vector<16x32xf32>
    %617 = vector.broadcast %596 : vector<1x32xf32> to vector<16x32xf32>
    %618 = arith.addf %616, %617 : vector<16x32xf32>
    %c1_220 = arith.constant 1 : index
    %c0_221 = arith.constant 0 : index
    %c0_222 = arith.constant 0 : index
    %619 = vector.load %arg14[%c1_220, %c0_221, %c0_222] : memref<2x32x128xf32, #tpu.memory_space<vmem>>, vector<1x32x128xf32>
    %620 = vector.shape_cast %619 : vector<1x32x128xf32> to vector<32x128xf32>
    %cst_223 = arith.constant dense<0.000000e+00> : vector<16x128xf32>
    %621 = tpu.matmul %618, %620, %cst_223 {dimension_numbers = #tpu.dot_dimension_numbers<[1], [0], [0], [1], [0, 0, 1, 1], [], []>} : vector<16x32xf32>, vector<32x128xf32>, vector<16x128xf32> -> vector<16x128xf32>
    %c1_224 = arith.constant 1 : index
    %c0_225 = arith.constant 0 : index
    %c0_226 = arith.constant 0 : index
    %622 = vector.load %arg15[%c1_224, %c0_225, %c0_226] : memref<2x1x128xf32, #tpu.memory_space<vmem>>, vector<1x1x128xf32>
    %623 = vector.shape_cast %622 : vector<1x1x128xf32> to vector<1x128xf32>
    %624 = vector.broadcast %623 : vector<1x128xf32> to vector<16x128xf32>
    %625 = arith.addf %621, %624 : vector<16x128xf32>
    %cst_227 = arith.constant 5.000000e-01 : f32
    %626 = vector.broadcast %cst_227 : f32 to vector<16x128xf32>
    %627 = arith.mulf %626, %625 : vector<16x128xf32>
    %cst_228 = arith.constant 0.707106769 : f32
    %628 = vector.broadcast %cst_228 : f32 to vector<16x128xf32>
    %629 = arith.mulf %625, %628 : vector<16x128xf32>
    %630 = math.absf %629 : vector<16x128xf32>
    %cst_229 = arith.constant 0.327591091 : f32
    %631 = vector.broadcast %cst_229 : f32 to vector<16x128xf32>
    %632 = arith.mulf %631, %630 : vector<16x128xf32>
    %cst_230 = arith.constant 1.000000e+00 : f32
    %633 = vector.broadcast %cst_230 : f32 to vector<16x128xf32>
    %634 = arith.addf %633, %632 : vector<16x128xf32>
    %cst_231 = arith.constant 1.000000e+00 : f32
    %635 = vector.broadcast %cst_231 : f32 to vector<16x128xf32>
    %636 = arith.divf %635, %634 : vector<16x128xf32>
    %cst_232 = arith.constant 1.06140542 : f32
    %637 = vector.broadcast %cst_232 : f32 to vector<16x128xf32>
    %638 = arith.mulf %637, %636 : vector<16x128xf32>
    %cst_233 = arith.constant -1.45315206 : f32
    %639 = vector.broadcast %cst_233 : f32 to vector<16x128xf32>
    %640 = arith.addf %638, %639 : vector<16x128xf32>
    %641 = arith.mulf %640, %636 : vector<16x128xf32>
    %cst_234 = arith.constant 1.42141378 : f32
    %642 = vector.broadcast %cst_234 : f32 to vector<16x128xf32>
    %643 = arith.addf %641, %642 : vector<16x128xf32>
    %644 = arith.mulf %643, %636 : vector<16x128xf32>
    %cst_235 = arith.constant -0.284496725 : f32
    %645 = vector.broadcast %cst_235 : f32 to vector<16x128xf32>
    %646 = arith.addf %644, %645 : vector<16x128xf32>
    %647 = arith.mulf %646, %636 : vector<16x128xf32>
    %cst_236 = arith.constant 0.254829586 : f32
    %648 = vector.broadcast %cst_236 : f32 to vector<16x128xf32>
    %649 = arith.addf %647, %648 : vector<16x128xf32>
    %650 = arith.mulf %649, %636 : vector<16x128xf32>
    %cst_237 = arith.constant 0.000000e+00 : f32
    %651 = vector.broadcast %cst_237 : f32 to vector<16x128xf32>
    %652 = arith.subf %651, %630 : vector<16x128xf32>
    %653 = arith.mulf %652, %630 : vector<16x128xf32>
    %654 = math.exp %653 : vector<16x128xf32>
    %655 = arith.mulf %650, %654 : vector<16x128xf32>
    %cst_238 = arith.constant 1.000000e+00 : f32
    %656 = vector.broadcast %cst_238 : f32 to vector<16x128xf32>
    %657 = arith.subf %656, %655 : vector<16x128xf32>
    %cst_239 = arith.constant 0.000000e+00 : f32
    %658 = vector.broadcast %cst_239 : f32 to vector<16x128xf32>
    %659 = arith.cmpf oge, %629, %658 : vector<16x128xf32>
    %cst_240 = arith.constant 0.000000e+00 : f32
    %660 = vector.broadcast %cst_240 : f32 to vector<16x128xf32>
    %661 = arith.subf %660, %657 : vector<16x128xf32>
    %662 = arith.select %659, %657, %661 : vector<16x128xi1>, vector<16x128xf32>
    %cst_241 = arith.constant 1.000000e+00 : f32
    %663 = vector.broadcast %cst_241 : f32 to vector<16x128xf32>
    %664 = arith.addf %663, %662 : vector<16x128xf32>
    %665 = arith.mulf %627, %664 : vector<16x128xf32>
    %c1_242 = arith.constant 1 : index
    %c0_243 = arith.constant 0 : index
    %c0_244 = arith.constant 0 : index
    %666 = vector.load %arg16[%c1_242, %c0_243, %c0_244] : memref<2x128x32xf32, #tpu.memory_space<vmem>>, vector<1x128x32xf32>
    %667 = vector.shape_cast %666 : vector<1x128x32xf32> to vector<128x32xf32>
    %cst_245 = arith.constant dense<0.000000e+00> : vector<16x32xf32>
    %668 = tpu.matmul %665, %667, %cst_245 {dimension_numbers = #tpu.dot_dimension_numbers<[1], [0], [0], [1], [0, 0, 1, 1], [], []>} : vector<16x128xf32>, vector<128x32xf32>, vector<16x32xf32> -> vector<16x32xf32>
    %c1_246 = arith.constant 1 : index
    %c0_247 = arith.constant 0 : index
    %c0_248 = arith.constant 0 : index
    %669 = vector.load %arg17[%c1_246, %c0_247, %c0_248] : memref<2x1x32xf32, #tpu.memory_space<vmem>>, vector<1x1x32xf32>
    %670 = vector.shape_cast %669 : vector<1x1x32xf32> to vector<1x32xf32>
    %671 = vector.broadcast %670 : vector<1x32xf32> to vector<16x32xf32>
    %672 = arith.addf %668, %671 : vector<16x32xf32>
    %673 = arith.addf %592, %672 : vector<16x32xf32>
    %c0_249 = arith.constant 0 : index
    %c0_250 = arith.constant 0 : index
    %674 = vector.load %arg18[%c0_249, %c0_250] : memref<1x32xf32, #tpu.memory_space<vmem>>, vector<1x32xf32>
    %c0_251 = arith.constant 0 : index
    %c0_252 = arith.constant 0 : index
    %675 = vector.load %arg19[%c0_251, %c0_252] : memref<1x32xf32, #tpu.memory_space<vmem>>, vector<1x32xf32>
    %cst_253 = arith.constant dense<0.000000e+00> : vector<16xf32>
    %676 = vector.multi_reduction <add>, %673, %cst_253 [1] : vector<16x32xf32> to vector<16xf32>
    %677 = vector.shape_cast %676 : vector<16xf32> to vector<16x1xf32>
    %cst_254 = arith.constant 3.200000e+01 : f32
    %678 = vector.broadcast %cst_254 : f32 to vector<16x1xf32>
    %679 = arith.divf %677, %678 : vector<16x1xf32>
    %680 = vector.broadcast %679 : vector<16x1xf32> to vector<16x32xf32>
    %681 = arith.subf %673, %680 : vector<16x32xf32>
    %682 = arith.mulf %681, %681 : vector<16x32xf32>
    %cst_255 = arith.constant dense<0.000000e+00> : vector<16xf32>
    %683 = vector.multi_reduction <add>, %682, %cst_255 [1] : vector<16x32xf32> to vector<16xf32>
    %684 = vector.shape_cast %683 : vector<16xf32> to vector<16x1xf32>
    %cst_256 = arith.constant 3.200000e+01 : f32
    %685 = vector.broadcast %cst_256 : f32 to vector<16x1xf32>
    %686 = arith.divf %684, %685 : vector<16x1xf32>
    %687 = vector.broadcast %679 : vector<16x1xf32> to vector<16x32xf32>
    %688 = arith.subf %673, %687 : vector<16x32xf32>
    %cst_257 = arith.constant 9.99999974E-6 : f32
    %689 = vector.broadcast %cst_257 : f32 to vector<16x1xf32>
    %690 = arith.addf %686, %689 : vector<16x1xf32>
    %691 = math.rsqrt %690 : vector<16x1xf32>
    %692 = vector.broadcast %691 : vector<16x1xf32> to vector<16x32xf32>
    %693 = arith.mulf %688, %692 : vector<16x32xf32>
    %694 = vector.broadcast %674 : vector<1x32xf32> to vector<16x32xf32>
    %695 = arith.mulf %693, %694 : vector<16x32xf32>
    %696 = vector.broadcast %675 : vector<1x32xf32> to vector<16x32xf32>
    %697 = arith.addf %695, %696 : vector<16x32xf32>
    %c0_258 = arith.constant 0 : index
    %c0_259 = arith.constant 0 : index
    %698 = vector.load %arg26[%c0_258, %c0_259] : memref<16x32xf32, #tpu.memory_space<vmem>>, vector<16x32xf32>
    tpu.vector_store %arg26[%c0_258, %c0_259], %697 {strides = array<i32>} : memref<16x32xf32, #tpu.memory_space<vmem>>, vector<16x32xf32>,
    %c0_260 = arith.constant 0 : index
    %c0_261 = arith.constant 0 : index
    %699 = vector.load %arg20[%c0_260, %c0_261] : memref<32x192xf32, #tpu.memory_space<vmem>>, vector<32x192xf32>
    %cst_262 = arith.constant dense<0.000000e+00> : vector<16x192xf32>
    %700 = tpu.matmul %697, %699, %cst_262 {dimension_numbers = #tpu.dot_dimension_numbers<[1], [0], [0], [1], [0, 0, 1, 1], [], []>} : vector<16x32xf32>, vector<32x192xf32>, vector<16x192xf32> -> vector<16x192xf32>
    %c0_263 = arith.constant 0 : index
    %c0_264 = arith.constant 0 : index
    %701 = vector.load %arg21[%c0_263, %c0_264] : memref<1x192xf32, #tpu.memory_space<vmem>>, vector<1x192xf32>
    %702 = vector.broadcast %701 : vector<1x192xf32> to vector<16x192xf32>
    %703 = arith.addf %700, %702 : vector<16x192xf32>
    %cst_265 = arith.constant 5.000000e-01 : f32
    %704 = vector.broadcast %cst_265 : f32 to vector<16x192xf32>
    %705 = arith.mulf %704, %703 : vector<16x192xf32>
    %cst_266 = arith.constant 0.707106769 : f32
    %706 = vector.broadcast %cst_266 : f32 to vector<16x192xf32>
    %707 = arith.mulf %703, %706 : vector<16x192xf32>
    %708 = math.absf %707 : vector<16x192xf32>
    %cst_267 = arith.constant 0.327591091 : f32
    %709 = vector.broadcast %cst_267 : f32 to vector<16x192xf32>
    %710 = arith.mulf %709, %708 : vector<16x192xf32>
    %cst_268 = arith.constant 1.000000e+00 : f32
    %711 = vector.broadcast %cst_268 : f32 to vector<16x192xf32>
    %712 = arith.addf %711, %710 : vector<16x192xf32>
    %cst_269 = arith.constant 1.000000e+00 : f32
    %713 = vector.broadcast %cst_269 : f32 to vector<16x192xf32>
    %714 = arith.divf %713, %712 : vector<16x192xf32>
    %cst_270 = arith.constant 1.06140542 : f32
    %715 = vector.broadcast %cst_270 : f32 to vector<16x192xf32>
    %716 = arith.mulf %715, %714 : vector<16x192xf32>
    %cst_271 = arith.constant -1.45315206 : f32
    %717 = vector.broadcast %cst_271 : f32 to vector<16x192xf32>
    %718 = arith.addf %716, %717 : vector<16x192xf32>
    %719 = arith.mulf %718, %714 : vector<16x192xf32>
    %cst_272 = arith.constant 1.42141378 : f32
    %720 = vector.broadcast %cst_272 : f32 to vector<16x192xf32>
    %721 = arith.addf %719, %720 : vector<16x192xf32>
    %722 = arith.mulf %721, %714 : vector<16x192xf32>
    %cst_273 = arith.constant -0.284496725 : f32
    %723 = vector.broadcast %cst_273 : f32 to vector<16x192xf32>
    %724 = arith.addf %722, %723 : vector<16x192xf32>
    %725 = arith.mulf %724, %714 : vector<16x192xf32>
    %cst_274 = arith.constant 0.254829586 : f32
    %726 = vector.broadcast %cst_274 : f32 to vector<16x192xf32>
    %727 = arith.addf %725, %726 : vector<16x192xf32>
    %728 = arith.mulf %727, %714 : vector<16x192xf32>
    %cst_275 = arith.constant 0.000000e+00 : f32
    %729 = vector.broadcast %cst_275 : f32 to vector<16x192xf32>
    %730 = arith.subf %729, %708 : vector<16x192xf32>
    %731 = arith.mulf %730, %708 : vector<16x192xf32>
    %732 = math.exp %731 : vector<16x192xf32>
    %733 = arith.mulf %728, %732 : vector<16x192xf32>
    %cst_276 = arith.constant 1.000000e+00 : f32
    %734 = vector.broadcast %cst_276 : f32 to vector<16x192xf32>
    %735 = arith.subf %734, %733 : vector<16x192xf32>
    %cst_277 = arith.constant 0.000000e+00 : f32
    %736 = vector.broadcast %cst_277 : f32 to vector<16x192xf32>
    %737 = arith.cmpf oge, %707, %736 : vector<16x192xf32>
    %cst_278 = arith.constant 0.000000e+00 : f32
    %738 = vector.broadcast %cst_278 : f32 to vector<16x192xf32>
    %739 = arith.subf %738, %735 : vector<16x192xf32>
    %740 = arith.select %737, %735, %739 : vector<16x192xi1>, vector<16x192xf32>
    %cst_279 = arith.constant 1.000000e+00 : f32
    %741 = vector.broadcast %cst_279 : f32 to vector<16x192xf32>
    %742 = arith.addf %741, %740 : vector<16x192xf32>
    %743 = arith.mulf %705, %742 : vector<16x192xf32>
    %c0_280 = arith.constant 0 : index
    %c0_281 = arith.constant 0 : index
    %744 = vector.load %arg22[%c0_280, %c0_281] : memref<192x152xf32, #tpu.memory_space<vmem>>, vector<192x152xf32>
    %cst_282 = arith.constant dense<0.000000e+00> : vector<16x152xf32>
    %745 = tpu.matmul %743, %744, %cst_282 {dimension_numbers = #tpu.dot_dimension_numbers<[1], [0], [0], [1], [0, 0, 1, 1], [], []>} : vector<16x192xf32>, vector<192x152xf32>, vector<16x152xf32> -> vector<16x152xf32>
    %c0_283 = arith.constant 0 : index
    %c0_284 = arith.constant 0 : index
    %746 = vector.load %arg23[%c0_283, %c0_284] : memref<1x152xf32, #tpu.memory_space<vmem>>, vector<1x152xf32>
    %747 = vector.broadcast %746 : vector<1x152xf32> to vector<16x152xf32>
    %748 = arith.addf %745, %747 : vector<16x152xf32>
    %c0_285 = arith.constant 0 : index
    %c0_286 = arith.constant 0 : index
    %749 = vector.load %arg27[%c0_285, %c0_286] : memref<16x152xf32, #tpu.memory_space<vmem>>, vector<16x152xf32>
    tpu.vector_store %arg27[%c0_285, %c0_286], %748 {strides = array<i32>} : memref<16x152xf32, #tpu.memory_space<vmem>>, vector<16x152xf32>,
    %c0_287 = arith.constant 0 : index
    %c0_288 = arith.constant 0 : index
    %750 = vector.load %arg24[%c0_287, %c0_288] : memref<32x6xf32, #tpu.memory_space<vmem>>, vector<32x6xf32>
    %cst_289 = arith.constant dense<0.000000e+00> : vector<16x6xf32>
    %751 = tpu.matmul %697, %750, %cst_289 {dimension_numbers = #tpu.dot_dimension_numbers<[1], [0], [0], [1], [0, 0, 1, 1], [], []>} : vector<16x32xf32>, vector<32x6xf32>, vector<16x6xf32> -> vector<16x6xf32>
    %c0_290 = arith.constant 0 : index
    %c0_291 = arith.constant 0 : index
    %752 = vector.load %arg25[%c0_290, %c0_291] : memref<1x6xf32, #tpu.memory_space<vmem>>, vector<1x6xf32>
    %753 = vector.broadcast %752 : vector<1x6xf32> to vector<16x6xf32>
    %754 = arith.addf %751, %753 : vector<16x6xf32>
    %c0_292 = arith.constant 0 : index
    %c0_293 = arith.constant 0 : index
    %755 = vector.load %arg28[%c0_292, %c0_293] : memref<16x6xf32, #tpu.memory_space<vmem>>, vector<16x6xf32>
    tpu.vector_store %arg28[%c0_292, %c0_293], %754 {strides = array<i32>} : memref<16x6xf32, #tpu.memory_space<vmem>>, vector<16x6xf32>,
    return
  }
  func.func @transform_0(%arg0: i32) -> (i32, i32) {
    %c0_i32 = arith.constant 0 : i32
    %c0_i32_0 = arith.constant 0 : i32
    %c0_i32_1 = arith.constant 0 : i32
    return %c0_i32, %c0_i32_0 : i32, i32
  }
  func.func @transform_1(%arg0: i32) -> (i32, i32) {
    %c0_i32 = arith.constant 0 : i32
    %c0_i32_0 = arith.constant 0 : i32
    %c0_i32_1 = arith.constant 0 : i32
    return %c0_i32, %c0_i32_0 : i32, i32
  }
  func.func @transform_2(%arg0: i32) -> (i32, i32) {
    %c0_i32 = arith.constant 0 : i32
    %c0_i32_0 = arith.constant 0 : i32
    %c0_i32_1 = arith.constant 0 : i32
    return %c0_i32, %c0_i32_0 : i32, i32
  }
  func.func @transform_3(%arg0: i32) -> (i32, i32) {
    %c0_i32 = arith.constant 0 : i32
    %c0_i32_0 = arith.constant 0 : i32
    %c0_i32_1 = arith.constant 0 : i32
    return %c0_i32, %c0_i32_0 : i32, i32
  }
  func.func @transform_4(%arg0: i32) -> (i32, i32) {
    %c0_i32 = arith.constant 0 : i32
    %c0_i32_0 = arith.constant 0 : i32
    %c0_i32_1 = arith.constant 0 : i32
    return %c0_i32, %c0_i32_0 : i32, i32
  }
  func.func @transform_5(%arg0: i32) -> (i32, i32, i32) {
    %c0_i32 = arith.constant 0 : i32
    %c0_i32_0 = arith.constant 0 : i32
    %c0_i32_1 = arith.constant 0 : i32
    %c0_i32_2 = arith.constant 0 : i32
    return %c0_i32, %c0_i32_0, %c0_i32_1 : i32, i32, i32
  }
  func.func @transform_6(%arg0: i32) -> (i32, i32, i32) {
    %c0_i32 = arith.constant 0 : i32
    %c0_i32_0 = arith.constant 0 : i32
    %c0_i32_1 = arith.constant 0 : i32
    %c0_i32_2 = arith.constant 0 : i32
    return %c0_i32, %c0_i32_0, %c0_i32_1 : i32, i32, i32
  }
  func.func @transform_7(%arg0: i32) -> (i32, i32, i32) {
    %c0_i32 = arith.constant 0 : i32
    %c0_i32_0 = arith.constant 0 : i32
    %c0_i32_1 = arith.constant 0 : i32
    %c0_i32_2 = arith.constant 0 : i32
    return %c0_i32, %c0_i32_0, %c0_i32_1 : i32, i32, i32
  }
  func.func @transform_8(%arg0: i32) -> (i32, i32, i32) {
    %c0_i32 = arith.constant 0 : i32
    %c0_i32_0 = arith.constant 0 : i32
    %c0_i32_1 = arith.constant 0 : i32
    %c0_i32_2 = arith.constant 0 : i32
    return %c0_i32, %c0_i32_0, %c0_i32_1 : i32, i32, i32
  }
  func.func @transform_9(%arg0: i32) -> (i32, i32, i32) {
    %c0_i32 = arith.constant 0 : i32
    %c0_i32_0 = arith.constant 0 : i32
    %c0_i32_1 = arith.constant 0 : i32
    %c0_i32_2 = arith.constant 0 : i32
    return %c0_i32, %c0_i32_0, %c0_i32_1 : i32, i32, i32
  }
  func.func @transform_10(%arg0: i32) -> (i32, i32, i32) {
    %c0_i32 = arith.constant 0 : i32
    %c0_i32_0 = arith.constant 0 : i32
    %c0_i32_1 = arith.constant 0 : i32
    %c0_i32_2 = arith.constant 0 : i32
    return %c0_i32, %c0_i32_0, %c0_i32_1 : i32, i32, i32
  }
  func.func @transform_11(%arg0: i32) -> (i32, i32, i32) {
    %c0_i32 = arith.constant 0 : i32
    %c0_i32_0 = arith.constant 0 : i32
    %c0_i32_1 = arith.constant 0 : i32
    %c0_i32_2 = arith.constant 0 : i32
    return %c0_i32, %c0_i32_0, %c0_i32_1 : i32, i32, i32
  }
  func.func @transform_12(%arg0: i32) -> (i32, i32, i32) {
    %c0_i32 = arith.constant 0 : i32
    %c0_i32_0 = arith.constant 0 : i32
    %c0_i32_1 = arith.constant 0 : i32
    %c0_i32_2 = arith.constant 0 : i32
    return %c0_i32, %c0_i32_0, %c0_i32_1 : i32, i32, i32
  }
  func.func @transform_13(%arg0: i32) -> (i32, i32, i32) {
    %c0_i32 = arith.constant 0 : i32
    %c0_i32_0 = arith.constant 0 : i32
    %c0_i32_1 = arith.constant 0 : i32
    %c0_i32_2 = arith.constant 0 : i32
    return %c0_i32, %c0_i32_0, %c0_i32_1 : i32, i32, i32
  }
  func.func @transform_14(%arg0: i32) -> (i32, i32, i32) {
    %c0_i32 = arith.constant 0 : i32
    %c0_i32_0 = arith.constant 0 : i32
    %c0_i32_1 = arith.constant 0 : i32
    %c0_i32_2 = arith.constant 0 : i32
    return %c0_i32, %c0_i32_0, %c0_i32_1 : i32, i32, i32
  }
  func.func @transform_15(%arg0: i32) -> (i32, i32, i32) {
    %c0_i32 = arith.constant 0 : i32
    %c0_i32_0 = arith.constant 0 : i32
    %c0_i32_1 = arith.constant 0 : i32
    %c0_i32_2 = arith.constant 0 : i32
    return %c0_i32, %c0_i32_0, %c0_i32_1 : i32, i32, i32
  }
  func.func @transform_16(%arg0: i32) -> (i32, i32, i32) {
    %c0_i32 = arith.constant 0 : i32
    %c0_i32_0 = arith.constant 0 : i32
    %c0_i32_1 = arith.constant 0 : i32
    %c0_i32_2 = arith.constant 0 : i32
    return %c0_i32, %c0_i32_0, %c0_i32_1 : i32, i32, i32
  }
  func.func @transform_17(%arg0: i32) -> (i32, i32) {
    %c0_i32 = arith.constant 0 : i32
    %c0_i32_0 = arith.constant 0 : i32
    %c0_i32_1 = arith.constant 0 : i32
    return %c0_i32, %c0_i32_0 : i32, i32
  }
  func.func @transform_18(%arg0: i32) -> (i32, i32) {
    %c0_i32 = arith.constant 0 : i32
    %c0_i32_0 = arith.constant 0 : i32
    %c0_i32_1 = arith.constant 0 : i32
    return %c0_i32, %c0_i32_0 : i32, i32
  }
  func.func @transform_19(%arg0: i32) -> (i32, i32) {
    %c0_i32 = arith.constant 0 : i32
    %c0_i32_0 = arith.constant 0 : i32
    %c0_i32_1 = arith.constant 0 : i32
    return %c0_i32, %c0_i32_0 : i32, i32
  }
  func.func @transform_20(%arg0: i32) -> (i32, i32) {
    %c0_i32 = arith.constant 0 : i32
    %c0_i32_0 = arith.constant 0 : i32
    %c0_i32_1 = arith.constant 0 : i32
    return %c0_i32, %c0_i32_0 : i32, i32
  }
  func.func @transform_21(%arg0: i32) -> (i32, i32) {
    %c0_i32 = arith.constant 0 : i32
    %c0_i32_0 = arith.constant 0 : i32
    %c0_i32_1 = arith.constant 0 : i32
    return %c0_i32, %c0_i32_0 : i32, i32
  }
  func.func @transform_22(%arg0: i32) -> (i32, i32) {
    %c0_i32 = arith.constant 0 : i32
    %c0_i32_0 = arith.constant 0 : i32
    %c0_i32_1 = arith.constant 0 : i32
    return %c0_i32, %c0_i32_0 : i32, i32
  }
  func.func @transform_23(%arg0: i32) -> (i32, i32) {
    %c0_i32 = arith.constant 0 : i32
    %c0_i32_0 = arith.constant 0 : i32
    %c0_i32_1 = arith.constant 0 : i32
    return %c0_i32, %c0_i32_0 : i32, i32
  }
  func.func @transform_24(%arg0: i32) -> (i32, i32) {
    %c0_i32 = arith.constant 0 : i32
    %c0_i32_0 = arith.constant 0 : i32
    %c0_i32_1 = arith.constant 0 : i32
    return %c0_i32, %c0_i32_0 : i32, i32
  }
  func.func @transform_25(%arg0: i32) -> (i32, i32) {
    %c0_i32 = arith.constant 0 : i32
    %c0_i32_0 = arith.constant 0 : i32
    %c0_i32_1 = arith.constant 0 : i32
    return %c0_i32, %c0_i32_0 : i32, i32
  }
  func.func @transform_26(%arg0: i32) -> (i32, i32) {
    %c0_i32 = arith.constant 0 : i32
    %c0_i32_0 = arith.constant 0 : i32
    %c0_i32_1 = arith.constant 0 : i32
    return %c0_i32, %c0_i32_0 : i32, i32
  }
  func.func @transform_27(%arg0: i32) -> (i32, i32) {
    %c0_i32 = arith.constant 0 : i32
    %c0_i32_0 = arith.constant 0 : i32
    %c0_i32_1 = arith.constant 0 : i32
    return %c0_i32, %c0_i32_0 : i32, i32
  }
}

</mosaic_0001>

<bundles_post_ra>
// kernel: tpu_custom_call.1
= control target key start
LH: loop header
LB: loop body
LE: loop exit
PB: predicated region body
PF: predicated region fallthrough
CT: control target
= control target key end

     0   :  { %s7342_s0 = inlined_call_operand.vmem [shape: f32[16,24], index: 0, kind: input, shape index: {}]   ;;  %s7343_s1 = inlined_call_operand.vmem [shape: f32[8,8], index: 1, kind: input, shape index: {}]   ;;  %s7344_s2 = inlined_call_operand.vmem [shape: f32[8,8], index: 2, kind: input, shape index: {}]   ;;  %s7345_s3 = inlined_call_operand.vmem [shape: f32[24,32], index: 3, kind: input, shape index: {}]   ;;  %s7346_s4 = inlined_call_operand.vmem [shape: f32[1,32], index: 4, kind: input, shape index: {}]   ;;  %s7347_s5 = inlined_call_operand.vmem [shape: f32[2,1,32], index: 5, kind: input, shape index: {}]   ;;  %s7348_s6 = inlined_call_operand.vmem [shape: f32[2,1,32], index: 6, kind: input, shape index: {}]   ;;  %s7349_s7 = inlined_call_operand.vmem [shape: f32[2,32,96], index: 7, kind: input, shape index: {}]   ;;  %s7350_s8 = inlined_call_operand.vmem [shape: f32[2,1,96], index: 8, kind: input, shape index: {}]   ;;  %s7351_s9 = inlined_call_operand.vmem [shape: f32[2,32,32], index: 9, kind: input, shape index: {}]   ;;  %s7352_s10 = inlined_call_operand.vmem [shape: f32[2,1,32], index: 10, kind: input, shape index: {}]   ;;  %s7353_s11 = inlined_call_operand.vmem [shape: f32[2,1,32], index: 11, kind: input, shape index: {}]   ;;  %s7354_s12 = inlined_call_operand.vmem [shape: f32[2,1,32], index: 12, kind: input, shape index: {}]   ;;  %s7355_s13 = inlined_call_operand.vmem [shape: f32[2,32,128], index: 13, kind: input, shape index: {}]   ;;  %s7356_s14 = inlined_call_operand.vmem [shape: f32[2,1,128], index: 14, kind: input, shape index: {}]   ;;  %s7357_s15 = inlined_call_operand.vmem [shape: f32[2,128,32], index: 15, kind: input, shape index: {}]   ;;  %s7358_s16 = inlined_call_operand.vmem [shape: f32[2,1,32], index: 16, kind: input, shape index: {}]   ;;  %s7359_s17 = inlined_call_operand.vmem [shape: f32[1,32], index: 17, kind: input, shape index: {}]   ;;  %s7360_s18 = inlined_call_operand.vmem [shape: f32[1,32], index: 18, kind: input, shape index: {}]   ;;  %s7361_s19 = inlined_call_operand.vmem [shape: f32[32,192], index: 19, kind: input, shape index: {}]   ;;  %s7362_s20 = inlined_call_operand.vmem [shape: f32[1,192], index: 20, kind: input, shape index: {}]   ;;  %s7363_s21 = inlined_call_operand.vmem [shape: f32[192,152], index: 21, kind: input, shape index: {}]   ;;  %s7364_s22 = inlined_call_operand.vmem [shape: f32[1,152], index: 22, kind: input, shape index: {}]   ;;  %s7365_s23 = inlined_call_operand.vmem [shape: f32[32,6], index: 23, kind: input, shape index: {}]   ;;  %s7366_s24 = inlined_call_operand.vmem [shape: f32[1,6], index: 24, kind: input, shape index: {}]   ;;  %s7367_s25 = inlined_call_operand.hbm [shape: f32[16,32], index: 25, kind: output, shape index: {0}]   ;;  %s7368_s26 = inlined_call_operand.hbm [shape: f32[16,152], index: 26, kind: output, shape index: {1}]   ;;  %s7369_s27 = inlined_call_operand.vmem [shape: f32[16,6], index: 27, kind: output, shape index: {2}]  }
   0x1   :  { %7429 = sst [smem:[#allocation8_spill]] %s7342_s0 }
   0x2   :  { %7430 = sst [smem:[#allocation9_spill]] %s7343_s1 }
   0x3   :  { %7431 = sst [smem:[#allocation10_spill]] %s7344_s2 }
   0x4   :  { %7432 = sst [smem:[#allocation11_spill]] %s7345_s3 }
   0x5   :  { %7433 = sst [smem:[#allocation12_spill]] %s7346_s4 }
   0x6   :  { %7434 = sst [smem:[#allocation13_spill]] %s7347_s5 }
   0x7   :  { %7435 = sst [smem:[#allocation14_spill]] %s7348_s6 }
   0x8   :  { %7436 = sst [smem:[#allocation15_spill]] %s7349_s7 }
   0x9   :  { %7437 = sst [smem:[#allocation16_spill]] %s7350_s8 }
   0xa   :  { %7438 = sst [smem:[#allocation17_spill]] %s7351_s9 }
   0xb   :  { %7439 = sst [smem:[#allocation18_spill]] %s7352_s10 }
   0xc   :  { %7440 = sst [smem:[#allocation19_spill]] %s7353_s11 }
   0xd   :  { %7441 = sst [smem:[#allocation20_spill]] %s7354_s12 }
   0xe   :  { %7442 = sst [smem:[#allocation21_spill]] %s7359_s17 }
   0xf   :  { %7443 = sst [smem:[#allocation22_spill]] %s7360_s18 }
  0x10   :  { %7444 = sst [smem:[#allocation23_spill]] %s7361_s19 }
  0x11   :  { %7445 = sst [smem:[#allocation24_spill]] %s7362_s20 }
  0x12   :  { %7446 = sst [smem:[#allocation25_spill]] %s7363_s21 }
  0x13   :  { %7447 = sst [smem:[#allocation26_spill]] %s7364_s22 }
  0x14   :  { %7448 = sst [smem:[#allocation27_spill]] %s7365_s23 }
  0x15   :  { %7449 = sst [smem:[#allocation28_spill]] %s7366_s24 }
  0x16   :  { %7450 = sst [smem:[#allocation29_spill]] %s7367_s25 }
  0x17   :  { %7451 = sst [smem:[#allocation30_spill]] %s7368_s26 }
  0x18   :  { %7452 = sst [smem:[#allocation31_spill]] %s7369_s27 }
  0x19   :  { %33 = vsyncpa [#allocation3], 0  ;;  %s7453_s8 = sld [smem:[#allocation11_spill]]  ;;  %vm99_vm0 = vcmask 195584  }
  0x1a   :  { %s7454_s0 = sld [smem:[#allocation8_spill]] }
  0x1f   :  { %v91_v0 = vld [vmem:[%s7453_s8 + $0x10] sm:$0xff]  ;;  %v90_v1 = vld [vmem:[%s7453_s8 + $0x8] sm:$0xff] }
  0x20   :  { %5309 = vmatprep.subr.mxu0 %v91_v0  ;;  %v87_v2 = vld [vmem:[%s7454_s0] sm:$0xff] }
  0x21   :  { %34 = vsyncpa [#allocation5], 0  ;;  %5310 = vmatpush3.msra.mxu0 %v91_v0  ;;  %v89_v3 = vld [vmem:[%s7453_s8] sm:$0xff]  ;;  %5315 = vmatprep.mubr.msk.f32.mxu0 %vm99_vm0, %v87_v2  ;;  %v88_v4 = vld [vmem:[%s7454_s0 + $0x8] sm:$0xff]  ;;  %s7455_s3 = sld [smem:[#allocation12_spill]]  ;;  %vm183_vm1 = vcmask 261120  }
  0x22   :  { %5311 = vmatprep.subr.mxu0 %v90_v1  ;;  %s7456_s8 = sld [smem:[#allocation15_spill]]  ;;  %s7412_s9 = smov 88   ;;  %vm320_vm2 = vcmask 1047616   ;;  %vm5838_vm3 = vmmov 0   ;;  %vm362_vm4 = vcmask 64512   ;;  %vm1156_vm5 = vcmask 130048  }
  0x23   :  { %5312 = vmatpush3.msra.mxu0 %v90_v1  ;;  %s7457_s6 = sld [smem:[#allocation13_spill]]  ;;  %s7420_s5 = smov 96   ;;  %vm4999_vm10 = vcmask 48128   ;;  %vm4825_vm14 = vcmask 523264  }
  0x24   :  { %5313 = vmatprep.subr.mxu0 %v89_v3  ;;  %s7459_s30 = sld [smem:[#allocation16_spill]]  ;;  %s7388_s28 = smov 120  }
  0x25   :  { %5314 = vmatpush3.msra.mxu0 %v89_v3  ;;  %s7384_s0 = smov 112   ;;  %s7386_s10 = smov 80  }
  0x26   :  { %5316 = vmatmul.mubr.msk.f32.vlgmr.msra.gmra.mxu0 %vm99_vm0, %v88_v4  ;;  %s7380_s29 = smov 104   ;;  %s7382_s1 = smov 72  }
  0x27   :  { %v5038_v6 = vld [vmem:[%s7455_s3] ss:$0 sm:$0xff]  ;;  %s7458_s3 = sld [smem:[#allocation14_spill]]  ;;  %s7424_s11 = smov 8  }
  0x28   :  { %v230_v22 = vld [vmem:[%s7456_s8 + $0x18] sm:$0xff]  ;;  %v229_v23 = vld [vmem:[%s7456_s8 + $0x10] sm:$0xff]  ;;  %v228_v24 = vld [vmem:[%s7456_s8 + $0x8] sm:$0xff]  ;;  %s7460_s4 = sld [smem:[#allocation10_spill]]  ;;  %s7390_s2 = smov 24  }
  0x29   :  { %5318 = vmatprep.subr.mxu0 %v230_v22  ;;  %v227_v25 = vld [vmem:[%s7456_s8] sm:$0xff]  ;;  %s7416_s7 = smov 28   ;;  %s7470_s22 = sld [smem:[#allocation17_spill]] }
  0x2a   :  { %5319 = vmatpush3.msra.mxu0 %v230_v22  ;;  %v5041_v33 = vld [vmem:[%s7457_s6] ss:$0 sm:$0xff]  ;;  %s7471_s25 = smov 16   ;;  %s7473_s24 = smov 8  }
  0x2b   :  { %5320 = vmatprep.subr.mxu0 %v229_v23  ;;  %v5043_v43 = vld [vmem:[%s7459_s30] ss:$0 sm:$0xff]  ;;  %s7474_s27 = sld [smem:[#allocation18_spill]]  ;;  %s7478_s19 = smov 124  }
  0x2c   :  { %5321 = vmatpush3.msra.mxu0 %v229_v23  ;;  %s7475_s26 = sld [smem:[#allocation19_spill]]  ;;  %s7479_s23 = smov 88  }
  0x2d   :  { %5322 = vmatprep.subr.mxu0 %v228_v24  ;;  %v5042_v35 = vld [vmem:[%s7458_s3] ss:$0 sm:$0xff]  ;;  %s7481_s18 = smov 64   ;;  %s7485_s20 = smov 52  }
  0x2e   :  { %5323 = vmatpush3.msra.mxu0 %v228_v24  ;;  %v86_v61 = vld [vmem:[%s7460_s4] sm:$0xff]  ;;  %s7461_s4 = sld [smem:[#allocation9_spill]] }
  0x2f   :  { %5324 = vmatprep.subr.mxu0 %v227_v25 }
  0x30   :  { %5325 = vmatpush3.msra.mxu0 %v227_v25 }
  0xe6   :  { %v5317_v5 = vpop.f32.mrf.mxu0 }
  0xe7   :  { %v6006_v9 = vadd.f32 %v5317_v5, %v5038_v6 }
  0xe8   :  { %v172_v7 = vpop.f32.mrf.mxu0 }
  0xe9   :  { %v6004_v8 = vadd.f32 %v5038_v6, %v172_v7  ;;  %v187_v11 = vsel %vm183_vm1, %v6006_v9, 0.0 }
  0xeb   :  { %v184_v10 = vsel %vm183_vm1, %v6004_v8, 0.0 }
  0xec   :  { %185 = vadd.xlane.f32.xlu0 %v184_v10 }
  0xf0   :  { %188 = vadd.xlane.f32.xlu0 %v187_v11 }
 0x175   :  { %v186_v12 = vpop.xlane.xlu0 %185 }
 0x176   :  { %v191_v13 = vmul.f32 0.03125, %v186_v12 }
 0x178   :  { %v193_v14 = vsub.f32 %v6004_v8, %v191_v13 }
 0x179   :  { %v189_v15 = vpop.xlane.xlu0 %188 }
 0x17a   :  { %v192_v16 = vmul.f32 0.03125, %v189_v15  ;;  %v195_v17 = vmul.f32 %v193_v14, %v193_v14 }
 0x17c   :  { %v194_v18 = vsub.f32 %v6006_v9, %v192_v16  ;;  %v197_v19 = vsel %vm183_vm1, %v195_v17, 0.0 }
 0x17d   :  { %198 = vadd.xlane.f32.xlu1 %v197_v19 }
 0x17e   :  { %v196_v20 = vmul.f32 %v194_v18, %v194_v18 }
 0x180   :  { %v200_v21 = vsel %vm183_vm1, %v196_v20, 0.0 }
 0x181   :  { %201 = vadd.xlane.f32.xlu1 %v200_v21 }
 0x206   :  { %v199_v26 = vpop.xlane.xlu1 %198 }
 0x207   :  { %v203_v27 = vmul.f32 0.03125, %v199_v26 }
 0x209   :  { %v205_v28 = vadd.f32 1e-05, %v203_v27 }
 0x20a   :  { %v202_v29 = vpop.xlane.xlu1 %201 }
 0x20b   :  { %5654 = vrsqrt.f32 %v205_v28  ;;  %v204_v30 = vmul.f32 0.03125, %v202_v29 }
 0x20d   :  { %v206_v31 = vadd.f32 1e-05, %v204_v30  ;;  %v6182_v30 = vld [vmem:[%s7461_s4] sm:$0xff] }
 0x20f   :  { %5656 = vrsqrt.f32 %v206_v31 }
 0x218   :  { %v5655_v32 = vpop.eup %5654 }
 0x219   :  { %v209_v34 = vmul.f32 %v5655_v32, %v193_v14 }
 0x21b   :  { %v217_v36 = vmul.f32 %v5041_v33, %v209_v34 }
 0x21c   :  { %v5657_v37 = vpop.eup %5656 }
 0x21d   :  { %v210_v38 = vmul.f32 %v5657_v37, %v194_v18  ;;  %v225_v39 = vadd.f32 %v5042_v35, %v217_v36 }
 0x21f   :  { %v218_v40 = vmul.f32 %v5041_v33, %v210_v38  ;;  %5326 = vmatprep.mubr.msk.f32.mxu0 %vm183_vm1, %v225_v39 }
 0x221   :  { %v226_v41 = vadd.f32 %v5042_v35, %v218_v40 }
 0x223   :  { %5327 = vmatmul.mubr.msk.f32.vlgmr.msra.gmra.mxu0 %vm183_vm1, %v226_v41 }
 0x2e3   :  { %v5328_v42 = vpop.f32.mrf.mxu0 }
 0x2e4   :  { %v6053_v46 = vadd.f32 %v5328_v42, %v5043_v43 }
 0x2e5   :  { %v310_v44 = vpop.f32.mrf.mxu0 }
 0x2e6   :  { %v6039_v45 = vadd.f32 %v5043_v43, %v310_v44 }
 0x2e8   :  { %549 = vrot.lane.b32.xlu1 %v6039_v45, %s7412_s9  ;;  %344 = vrot.lane.b32.xlu0 %v6039_v45, %s7420_s5 }
 0x2ec   :  { %529 = vrot.lane.b32.xlu1 %v6039_v45, %s7388_s28  ;;  %735 = vrot.lane.b32.xlu0 %v6039_v45, %s7384_s0 }
 0x2f0   :  { %755 = vrot.lane.b32.xlu1 %v6039_v45, %s7386_s10  ;;  %941 = vrot.lane.b32.xlu0 %v6039_v45, %s7380_s29 }
 0x2f4   :  { %961 = vrot.lane.b32.xlu1 %v6039_v45, %s7382_s1  ;;  %1373 = vrot.lane.b32.xlu0 %v6053_v46, %s7412_s9 }
 0x2f8   :  { %1175 = vrot.lane.b32.xlu1 %v6053_v46, %s7420_s5  ;;  %1573 = vrot.lane.b32.xlu0 %v6053_v46, %s7386_s10  ;;  %s7392_s10 = smov 16  }
 0x2fc   :  { %1356 = vrot.lane.b32.xlu1 %v6053_v46, %s7388_s28  ;;  %1773 = vrot.lane.b32.xlu0 %v6053_v46, %s7382_s1  ;;  %s5824_s1 = smov 32   ;;  %s7398_s28 = smov 48  }
 0x300   :  { %1556 = vrot.lane.b32.xlu1 %v6053_v46, %s7384_s0  ;;  %s7396_s0 = smov 40  }
 0x304   :  { %1756 = vrot.lane.b32.xlu1 %v6053_v46, %s7380_s29  ;;  %s7408_s29 = smov 4  }
 0x35a   :  { %v6071_v47 = vpop.permute.xlu1 %549  ;;  %v6073_v48 = vpop.permute.xlu0 %344 }
 0x35b   :  { %552 = vrot.lane.b32.xlu1 %v6071_v47, %s7424_s11  ;;  %347 = vrot.lane.b32.xlu0 %v6073_v48, %s7424_s11 }
 0x35e   :  { %v6079_v49 = vpop.permute.xlu1 %529  ;;  %v6081_v50 = vpop.permute.xlu0 %735 }
 0x35f   :  { %532 = vrot.lane.b32.xlu0 %v6079_v49, %s7424_s11 }
 0x362   :  { %v6085_v51 = vpop.permute.xlu1 %755  ;;  %v6087_v52 = vpop.permute.xlu0 %941 }
 0x363   :  { %758 = vrot.lane.b32.xlu1 %v6085_v51, %s7424_s11  ;;  %738 = vrot.lane.b32.xlu0 %v6081_v50, %s7424_s11 }
 0x366   :  { %v6093_v53 = vpop.permute.xlu1 %961  ;;  %v6095_v54 = vpop.permute.xlu0 %1373 }
 0x367   :  { %964 = vrot.lane.b32.xlu1 %v6093_v53, %s7424_s11  ;;  %944 = vrot.lane.b32.xlu0 %v6087_v52, %s7424_s11 }
 0x36a   :  { %v6101_v55 = vpop.permute.xlu1 %1175  ;;  %v6107_v56 = vpop.permute.xlu0 %1573 }
 0x36b   :  { %1178 = vrot.lane.b32.xlu1 %v6101_v55, %s7424_s11  ;;  %1376 = vrot.lane.b32.xlu0 %v6095_v54, %s7424_s11 }
 0x36e   :  { %v6109_v57 = vpop.permute.xlu1 %1356  ;;  %v6115_v58 = vpop.permute.xlu0 %1773 }
 0x36f   :  { %1359 = vrot.lane.b32.xlu1 %v6109_v57, %s7424_s11  ;;  %1576 = vrot.lane.b32.xlu0 %v6107_v56, %s7424_s11 }
 0x372   :  { %v6117_v59 = vpop.permute.xlu1 %1556 }
 0x373   :  { %1559 = vrot.lane.b32.xlu1 %v6117_v59, %s7424_s11  ;;  %1776 = vrot.lane.b32.xlu0 %v6115_v58, %s7424_s11 }
 0x376   :  { %v6123_v60 = vpop.permute.xlu1 %1756 }
 0x377   :  { %1759 = vrot.lane.b32.xlu1 %v6123_v60, %s7424_s11  ;;  %321 = vrot.lane.b32.xlu0 %v6039_v45, %s7424_s11 }
 0x37b   :  { %328 = vrot.lane.b32.xlu0 %v86_v61, %s7408_s29 }
 0x3cd   :  { %v348_v62 = vpop.permute.xlu0 %347  ;;  %v553_v0 = vpop.permute.xlu1 %552 }
 0x3ce   :  { %v349_v63 = vsel %vm320_vm2, %v348_v62, %v6073_v48  ;;  %v554_v2 = vsel %vm320_vm2, %v553_v0, %v6071_v47 }
 0x3cf   :  { %350 = vrot.lane.b32.xlu1 %v349_v63, %s7424_s11 }
 0x3d1   :  { %v533_v1 = vpop.permute.xlu0 %532 }
 0x3d2   :  { %v534_v3 = vsel %vm320_vm2, %v533_v1, %v6079_v49 }
 0x3d3   :  { %555 = vrot.lane.b32.xlu1 %v554_v2, %s7424_s11  ;;  %535 = vrot.lane.b32.xlu0 %v534_v3, %s7424_s11 }
 0x3d5   :  { %v759_v4 = vpop.permute.xlu1 %758  ;;  %v739_v5 = vpop.permute.xlu0 %738 }
 0x3d6   :  { %v760_v6 = vsel %vm320_vm2, %v759_v4, %v6085_v51  ;;  %v740_v7 = vsel %vm320_vm2, %v739_v5, %v6081_v50 }
 0x3d7   :  { %761 = vrot.lane.b32.xlu1 %v760_v6, %s7424_s11  ;;  %741 = vrot.lane.b32.xlu0 %v740_v7, %s7424_s11 }
 0x3d9   :  { %v965_v10 = vpop.permute.xlu1 %964  ;;  %v945_v11 = vpop.permute.xlu0 %944 }
 0x3da   :  { %v966_v12 = vsel %vm320_vm2, %v965_v10, %v6093_v53  ;;  %v946_v13 = vsel %vm320_vm2, %v945_v11, %v6087_v52 }
 0x3db   :  { %967 = vrot.lane.b32.xlu1 %v966_v12, %s7424_s11  ;;  %947 = vrot.lane.b32.xlu0 %v946_v13, %s7424_s11 }
 0x3dd   :  { %v1179_v14 = vpop.permute.xlu1 %1178  ;;  %v1377_v15 = vpop.permute.xlu0 %1376 }
 0x3de   :  { %v1180_v16 = vsel %vm320_vm2, %v1179_v14, %v6101_v55  ;;  %v1378_v19 = vsel %vm320_vm2, %v1377_v15, %v6095_v54  ;;  %v5836_v14 = vmov 0.0  }
 0x3df   :  { %1160 = vrot.lane.b32.xlu1 %v6053_v46, %s7424_s11  ;;  %1181 = vrot.lane.b32.xlu0 %v1180_v16, %s7424_s11 }
 0x3e0   :  { %5329 = vmatprep.subr.mxu0 %v5836_v14  ;;  %5334 = vmatprep.subr.mxu1 %v5836_v14 }
 0x3e1   :  { %v1360_v17 = vpop.permute.xlu1 %1359  ;;  %v1577_v18 = vpop.permute.xlu0 %1576  ;;  %5331 = vmatprep.mubr.msk.f32.mxu0 %vm5838_vm3, %v5836_v14  ;;  %5336 = vmatprep.mubr.msk.f32.mxu1 %vm5838_vm3, %v5836_v14 }
 0x3e2   :  { %v1361_v20 = vsel %vm320_vm2, %v1360_v17, %v6109_v57  ;;  %v1578_v23 = vsel %vm320_vm2, %v1577_v18, %v6107_v56 }
 0x3e3   :  { %1379 = vrot.lane.b32.xlu1 %v1378_v19, %s7424_s11  ;;  %1362 = vrot.lane.b32.xlu0 %v1361_v20, %s7424_s11 }
 0x3e5   :  { %v1560_v21 = vpop.permute.xlu1 %1559  ;;  %v1777_v22 = vpop.permute.xlu0 %1776 }
 0x3e6   :  { %v1561_v24 = vsel %vm320_vm2, %v1560_v21, %v6117_v59  ;;  %v1778_v26 = vsel %vm320_vm2, %v1777_v22, %v6115_v58 }
 0x3e7   :  { %1579 = vrot.lane.b32.xlu1 %v1578_v23, %s7424_s11  ;;  %1562 = vrot.lane.b32.xlu0 %v1561_v24, %s7424_s11 }
 0x3e9   :  { %v1760_v25 = vpop.permute.xlu1 %1759  ;;  %v322_v28 = vpop.permute.xlu0 %321 }
 0x3ea   :  { %v1761_v27 = vsel %vm320_vm2, %v1760_v25, %v6123_v60  ;;  %v323_v29 = vsel %vm320_vm2, %v322_v28, %v6039_v45 }
 0x3eb   :  { %1779 = vrot.lane.b32.xlu1 %v1778_v26, %s7424_s11  ;;  %1762 = vrot.lane.b32.xlu0 %v1761_v27, %s7424_s11 }
 0x3ed   :  { %v6198_v31 = vpop.permute.xlu0 %328 }
 0x3ef   :  { %324 = vrot.lane.b32.xlu1 %v323_v29, %s7424_s11  ;;  %339 = vrot.lane.b32.xlu0 %v6182_v30, %s5824_s1  ;;  %s7394_s1 = smov 56  }
 0x3f3   :  { %525 = vrot.lane.b32.xlu1 %v6182_v30, %s7424_s11  ;;  %545 = vrot.lane.b32.xlu0 %v6182_v30, %s7396_s0  ;;  %s7402_s0 = smov 20  }
 0x3f7   :  { %731 = vrot.lane.b32.xlu1 %v6182_v30, %s7392_s10  ;;  %751 = vrot.lane.b32.xlu0 %v6182_v30, %s7398_s28  ;;  %s7400_s10 = smov 12   ;;  %s7404_s28 = smov 52  }
 0x3fb   :  { %937 = vrot.lane.b32.xlu1 %v6182_v30, %s7390_s2  ;;  %957 = vrot.lane.b32.xlu0 %v6182_v30, %s7394_s1  ;;  %s7410_s2 = smov 36   ;;  %s7406_s1 = smov 44  }
 0x441   :  { %v351_v32 = vpop.permute.xlu1 %350 }
 0x442   :  { %v352_v33 = vsel %vm320_vm2, %v351_v32, %v6073_v48 }
 0x443   :  { %v353_v34 = vmul.f32 %v352_v33, %v6198_v31 }
 0x445   :  { %v556_v35 = vpop.permute.xlu1 %555  ;;  %v536_v36 = vpop.permute.xlu0 %535  ;;  %355 = vrot.lane.b32.xlu1 %v353_v34, %s7416_s7 }
 0x446   :  { %v557_v37 = vsel %vm320_vm2, %v556_v35, %v6071_v47  ;;  %v537_v38 = vsel %vm320_vm2, %v536_v36, %v6079_v49 }
 0x447   :  { %v558_v39 = vmul.f32 %v557_v37, %v6198_v31  ;;  %v538_v40 = vmul.f32 %v537_v38, %v6198_v31 }
 0x449   :  { %v762_v41 = vpop.permute.xlu1 %761  ;;  %v742_v42 = vpop.permute.xlu0 %741  ;;  %540 = vrot.lane.b32.xlu1 %v538_v40, %s7408_s29  ;;  %560 = vrot.lane.b32.xlu0 %v558_v39, %s7410_s2 }
 0x44a   :  { %v763_v43 = vsel %vm320_vm2, %v762_v41, %v6085_v51  ;;  %v743_v44 = vsel %vm320_vm2, %v742_v42, %v6081_v50 }
 0x44b   :  { %v764_v47 = vmul.f32 %v763_v43, %v6198_v31  ;;  %v744_v48 = vmul.f32 %v743_v44, %v6198_v31 }
 0x44d   :  { %v968_v49 = vpop.permute.xlu1 %967  ;;  %v948_v61 = vpop.permute.xlu0 %947  ;;  %746 = vrot.lane.b32.xlu1 %v744_v48, %s7400_s10  ;;  %766 = vrot.lane.b32.xlu0 %v764_v47, %s7406_s1 }
 0x44e   :  { %v969_v62 = vsel %vm320_vm2, %v968_v49, %v6093_v53  ;;  %v949_v51 = vsel %vm320_vm2, %v948_v61, %v6087_v52 }
 0x44f   :  { %v970_v50 = vmul.f32 %v969_v62, %v6198_v31  ;;  %v950_v63 = vmul.f32 %v949_v51, %v6198_v31 }
 0x451   :  { %v1161_v0 = vpop.permute.xlu1 %1160  ;;  %v1182_v1 = vpop.permute.xlu0 %1181  ;;  %952 = vrot.lane.b32.xlu1 %v950_v63, %s7402_s0  ;;  %972 = vrot.lane.b32.xlu0 %v970_v50, %s7404_s28 }
 0x452   :  { %v1183_v2 = vsel %vm320_vm2, %v1182_v1, %v6101_v55  ;;  %v1162_v52 = vsel %vm320_vm2, %v1161_v0, %v6053_v46 }
 0x453   :  { %v1184_v53 = vmul.f32 %v1183_v2, %v6198_v31 }
 0x455   :  { %v1380_v3 = vpop.permute.xlu1 %1379  ;;  %v1363_v4 = vpop.permute.xlu0 %1362  ;;  %1186 = vrot.lane.b32.xlu1 %v1184_v53, %s7416_s7  ;;  %1163 = vrot.lane.b32.xlu0 %v1162_v52, %s7424_s11  ;;  %s7468_s7 = smov 40  }
 0x456   :  { %v1381_v5 = vsel %vm320_vm2, %v1380_v3, %v6095_v54  ;;  %v1364_v6 = vsel %vm320_vm2, %v1363_v4, %v6109_v57 }
 0x457   :  { %v1382_v7 = vmul.f32 %v1381_v5, %v6198_v31  ;;  %v1365_v55 = vmul.f32 %v1364_v6, %v6198_v31 }
 0x459   :  { %v1580_v10 = vpop.permute.xlu1 %1579  ;;  %v1563_v11 = vpop.permute.xlu0 %1562  ;;  %1367 = vrot.lane.b32.xlu1 %v1365_v55, %s7408_s29  ;;  %1384 = vrot.lane.b32.xlu0 %v1382_v7, %s7410_s2  ;;  %s7465_s29 = smov 72   ;;  %s7466_s2 = smov 104  }
 0x45a   :  { %v1581_v12 = vsel %vm320_vm2, %v1580_v10, %v6107_v56  ;;  %v1564_v13 = vsel %vm320_vm2, %v1563_v11, %v6117_v59 }
 0x45b   :  { %v1582_v54 = vmul.f32 %v1581_v12, %v6198_v31  ;;  %v1565_v57 = vmul.f32 %v1564_v13, %v6198_v31 }
 0x45d   :  { %v1780_v15 = vpop.permute.xlu1 %1779  ;;  %v1763_v16 = vpop.permute.xlu0 %1762  ;;  %1567 = vrot.lane.b32.xlu1 %v1565_v57, %s7400_s10  ;;  %1584 = vrot.lane.b32.xlu0 %v1582_v54, %s7406_s1  ;;  %s7414_s10 = smov 124   ;;  %s7464_s1 = smov 112  }
 0x45e   :  { %v1781_v56 = vsel %vm320_vm2, %v1780_v15, %v6115_v58  ;;  %v1764_v59 = vsel %vm320_vm2, %v1763_v16, %v6123_v60 }
 0x45f   :  { %v1782_v17 = vmul.f32 %v1781_v56, %v6198_v31  ;;  %v1765_v18 = vmul.f32 %v1764_v59, %v6198_v31 }
 0x461   :  { %v325_v19 = vpop.permute.xlu1 %324  ;;  %1767 = vrot.lane.b32.xlu1 %v1765_v18, %s7402_s0  ;;  %1784 = vrot.lane.b32.xlu0 %v1782_v17, %s7404_s28  ;;  %v6265_v58 = vpop.permute.xlu0 %339  ;;  %s7462_s0 = smov 120   ;;  %s7463_s28 = smov 80  }
 0x462   :  { %v326_v20 = vsel %vm320_vm2, %v325_v19, %v6039_v45  ;;  %v342_v26 = vmul.f32 %v6265_v58, %v6039_v45  ;;  %v1173_v2 = vmul.f32 %v6265_v58, %v6053_v46 }
 0x463   :  { %v331_v21 = vmul.f32 %v6198_v31, %v326_v20 }
 0x465   :  { %333 = vrot.lane.b32.xlu0 %v331_v21, %s7414_s10  ;;  %v6267_v60 = vpop.permute.xlu1 %525  ;;  %v6269_v22 = vpop.permute.xlu0 %545 }
 0x466   :  { %v528_v32 = vmul.f32 %v6267_v60, %v6039_v45  ;;  %v548_v33 = vmul.f32 %v6269_v22, %v6039_v45  ;;  %v1355_v4 = vmul.f32 %v6267_v60, %v6053_v46  ;;  %v1372_v5 = vmul.f32 %v6269_v22, %v6053_v46 }
 0x469   :  { %v6271_v23 = vpop.permute.xlu1 %731  ;;  %v6277_v24 = vpop.permute.xlu0 %751 }
 0x46a   :  { %v734_v39 = vmul.f32 %v6271_v23, %v6039_v45  ;;  %v754_v40 = vmul.f32 %v6277_v24, %v6039_v45  ;;  %v1555_v12 = vmul.f32 %v6271_v23, %v6053_v46  ;;  %v1572_v13 = vmul.f32 %v6277_v24, %v6053_v46 }
 0x46d   :  { %v6279_v25 = vpop.permute.xlu1 %937  ;;  %v6283_v27 = vpop.permute.xlu0 %957 }
 0x46e   :  { %v940_v48 = vmul.f32 %v6279_v25, %v6039_v45  ;;  %v960_v49 = vmul.f32 %v6283_v27, %v6039_v45  ;;  %v1755_v59 = vmul.f32 %v6279_v25, %v6053_v46  ;;  %v1772_v17 = vmul.f32 %v6283_v27, %v6053_v46 }
 0x4b7   :  { %v356_v28 = vpop.permute.xlu1 %355 }
 0x4b8   :  { %v358_v29 = vadd.f32 %v356_v28, %v342_v26 }
 0x4ba   :  { %360 = vrot.lane.b32.xlu1 %v358_v29, %s7420_s5  ;;  %v319_v29 = vmul.f32 %v6039_v45, %v6182_v30 }
 0x4bb   :  { %v541_v34 = vpop.permute.xlu1 %540  ;;  %v561_v35 = vpop.permute.xlu0 %560 }
 0x4bc   :  { %v543_v36 = vadd.f32 %v541_v34, %v528_v32  ;;  %v563_v37 = vadd.f32 %v561_v35, %v548_v33 }
 0x4be   :  { %v544_v38 = vmul.f32 0.35355338, %v543_v36  ;;  %568 = vrot.lane.b32.xlu0 %v563_v37, %s7412_s9 }
 0x4bf   :  { %v747_v41 = vpop.permute.xlu1 %746  ;;  %v767_v42 = vpop.permute.xlu0 %766 }
 0x4c0   :  { %v749_v43 = vadd.f32 %v747_v41, %v734_v39  ;;  %v769_v44 = vadd.f32 %v767_v42, %v754_v40  ;;  %565 = vrot.lane.b32.xlu1 %v544_v38, %s7462_s0  ;;  %v1159_v41 = vmul.f32 %v6053_v46, %v6182_v30 }
 0x4c2   :  { %v750_v47 = vmul.f32 0.35355338, %v749_v43  ;;  %774 = vrot.lane.b32.xlu0 %v769_v44, %s7463_s28 }
 0x4c3   :  { %v953_v61 = vpop.permute.xlu1 %952  ;;  %v973_v62 = vpop.permute.xlu0 %972 }
 0x4c4   :  { %v955_v51 = vadd.f32 %v953_v61, %v940_v48  ;;  %v975_v50 = vadd.f32 %v973_v62, %v960_v49  ;;  %771 = vrot.lane.b32.xlu1 %v750_v47, %s7464_s1 }
 0x4c6   :  { %v956_v63 = vmul.f32 0.35355338, %v955_v51  ;;  %980 = vrot.lane.b32.xlu0 %v975_v50, %s7465_s29 }
 0x4c7   :  { %v1187_v0 = vpop.permute.xlu1 %1186  ;;  %v1164_v1 = vpop.permute.xlu0 %1163 }
 0x4c8   :  { %v1165_v53 = vsel %vm320_vm2, %v1164_v1, %v6053_v46  ;;  %977 = vrot.lane.b32.xlu1 %v956_v63, %s7466_s2  ;;  %v1189_v3 = vadd.f32 %v1187_v0, %v1173_v2 }
 0x4c9   :  { %v1166_v52 = vmul.f32 %v1165_v53, %v6198_v31 }
 0x4cb   :  { %v1368_v6 = vpop.permute.xlu1 %1367  ;;  %1168 = vrot.lane.b32.xlu0 %v1166_v52, %s7414_s10  ;;  %v1385_v7 = vpop.permute.xlu0 %1384  ;;  %s7467_s10 = smov 48  }
 0x4cc   :  { %v1370_v55 = vadd.f32 %v1368_v6, %v1355_v4  ;;  %v1387_v10 = vadd.f32 %v1385_v7, %v1372_v5  ;;  %1191 = vrot.lane.b32.xlu1 %v1189_v3, %s7420_s5  ;;  %s7482_s5 = smov 4  }
 0x4ce   :  { %v1371_v11 = vmul.f32 0.35355338, %v1370_v55 }
 0x4cf   :  { %v1568_v54 = vpop.permute.xlu1 %1567  ;;  %1392 = vrot.lane.b32.xlu0 %v1387_v10, %s7412_s9  ;;  %v1585_v57 = vpop.permute.xlu0 %1584  ;;  %s7418_s9 = smov 64  }
 0x4d0   :  { %v1570_v15 = vadd.f32 %v1568_v54, %v1555_v12  ;;  %v1587_v16 = vadd.f32 %v1585_v57, %v1572_v13  ;;  %1389 = vrot.lane.b32.xlu1 %v1371_v11, %s7462_s0 }
 0x4d2   :  { %v1571_v56 = vmul.f32 0.35355338, %v1570_v15 }
 0x4d3   :  { %v1768_v18 = vpop.permute.xlu1 %1767  ;;  %1592 = vrot.lane.b32.xlu0 %v1587_v16, %s7463_s28  ;;  %v1785_v19 = vpop.permute.xlu0 %1784 }
 0x4d4   :  { %v1770_v20 = vadd.f32 %v1768_v18, %v1755_v59  ;;  %v1787_v21 = vadd.f32 %v1785_v19, %v1772_v17  ;;  %1589 = vrot.lane.b32.xlu1 %v1571_v56, %s7464_s1 }
 0x4d6   :  { %v1771_v26 = vmul.f32 0.35355338, %v1770_v20 }
 0x4d7   :  { %1792 = vrot.lane.b32.xlu0 %v1787_v21, %s7465_s29  ;;  %v334_v28 = vpop.permute.xlu0 %333 }
 0x4d8   :  { %1789 = vrot.lane.b32.xlu1 %v1771_v26, %s7466_s2  ;;  %v336_v32 = vadd.f32 %v334_v28, %v319_v29 }
 0x4da   :  { %v337_v34 = vmul.f32 0.35355338, %v336_v32 }
 0x52c   :  { %v361_v33 = vpop.permute.xlu1 %360 }
 0x52d   :  { %5330 = vmatpush3.xpose.msk.msra.mxu0 %vm362_vm4, %v361_v33 }
 0x52e   :  { %5339 = vmatprep.subr.mxu0 %v5836_v14 }
 0x530   :  { %v569_v35 = vpop.permute.xlu0 %568  ;;  %5332 = vmatmul.mubr.msk.f32.vlgmr.msra.gmra.mxu0 %vm362_vm4, %v337_v34 }
 0x531   :  { %5340 = vmatpush3.xpose.msk.msra.mxu0 %vm362_vm4, %v569_v35  ;;  %5341 = vmatprep.mubr.msk.f32.mxu0 %vm5838_vm3, %v5836_v14 }
 0x532   :  { %v566_v36 = vpop.permute.xlu1 %565  ;;  %5349 = vmatprep.subr.mxu0 %v5836_v14 }
 0x534   :  { %v775_v37 = vpop.permute.xlu0 %774  ;;  %5342 = vmatmul.mubr.msk.f32.vlgmr.msra.gmra.mxu0 %vm362_vm4, %v566_v36 }
 0x535   :  { %5350 = vmatpush3.xpose.msk.msra.mxu0 %vm362_vm4, %v775_v37  ;;  %5351 = vmatprep.mubr.msk.f32.mxu0 %vm5838_vm3, %v5836_v14 }
 0x536   :  { %v772_v38 = vpop.permute.xlu1 %771  ;;  %5359 = vmatprep.subr.mxu0 %v5836_v14 }
 0x538   :  { %v981_v39 = vpop.permute.xlu0 %980  ;;  %5352 = vmatmul.mubr.msk.f32.vlgmr.msra.gmra.mxu0 %vm362_vm4, %v772_v38 }
 0x539   :  { %5360 = vmatpush3.xpose.msk.msra.mxu0 %vm362_vm4, %v981_v39  ;;  %5361 = vmatprep.mubr.msk.f32.mxu0 %vm5838_vm3, %v5836_v14 }
 0x53a   :  { %v978_v40 = vpop.permute.xlu1 %977  ;;  %5369 = vmatprep.subr.mxu0 %v5836_v14 }
 0x53c   :  { %5362 = vmatmul.mubr.msk.f32.vlgmr.msra.gmra.mxu0 %vm362_vm4, %v978_v40 }
 0x53d   :  { %v1169_v42 = vpop.permute.xlu0 %1168  ;;  %5371 = vmatprep.mubr.msk.f32.mxu0 %vm5838_vm3, %v5836_v14 }
 0x53e   :  { %v1171_v43 = vadd.f32 %v1169_v42, %v1159_v41  ;;  %v1192_v44 = vpop.permute.xlu1 %1191 }
 0x53f   :  { %5370 = vmatpush3.xpose.msk.msra.mxu0 %vm362_vm4, %v1192_v44 }
 0x540   :  { %v1172_v47 = vmul.f32 0.35355338, %v1171_v43  ;;  %5379 = vmatprep.subr.mxu0 %v5836_v14 }
 0x541   :  { %v1393_v48 = vpop.permute.xlu0 %1392 }
 0x542   :  { %v1390_v49 = vpop.permute.xlu1 %1389  ;;  %5372 = vmatmul.mubr.msk.f32.vlgmr.msra.gmra.mxu0 %vm362_vm4, %v1172_v47 }
 0x543   :  { %5380 = vmatpush3.xpose.msk.msra.mxu0 %vm362_vm4, %v1393_v48  ;;  %5381 = vmatprep.mubr.msk.f32.mxu0 %vm5838_vm3, %v5836_v14 }
 0x544   :  { %5389 = vmatprep.subr.mxu0 %v5836_v14 }
 0x545   :  { %v1593_v30 = vpop.permute.xlu0 %1592 }
 0x546   :  { %5382 = vmatmul.mubr.msk.f32.vlgmr.msra.gmra.mxu0 %vm362_vm4, %v1390_v49  ;;  %v1590_v61 = vpop.permute.xlu1 %1589 }
 0x547   :  { %5390 = vmatpush3.xpose.msk.msra.mxu0 %vm362_vm4, %v1593_v30  ;;  %5391 = vmatprep.mubr.msk.f32.mxu0 %vm5838_vm3, %v5836_v14 }
 0x548   :  { %5399 = vmatprep.subr.mxu0 %v5836_v14 }
 0x549   :  { %v1793_v62 = vpop.permute.xlu0 %1792 }
 0x54a   :  { %5392 = vmatmul.mubr.msk.f32.vlgmr.msra.gmra.mxu0 %vm362_vm4, %v1590_v61  ;;  %v1790_v51 = vpop.permute.xlu1 %1789 }
 0x54b   :  { %5400 = vmatpush3.xpose.msk.msra.mxu0 %vm362_vm4, %v1793_v62  ;;  %5401 = vmatprep.mubr.msk.f32.mxu0 %vm5838_vm3, %v5836_v14 }
 0x54e   :  { %5402 = vmatmul.mubr.msk.f32.vlgmr.msra.gmra.mxu0 %vm362_vm4, %v1790_v51 }
 0x5f0   :  { %v434_v50 = vpop.f32.mrf.mxu0 }
 0x5f1   :  { %v438_v63 = vsel %vm362_vm4, %v434_v50, -inf }
 0x5f2   :  { %439 = vmax.xlane.f32.xlu0 %v438_v63  ;;  %v5333_v0 = vpop.f32.mrf.mxu0 }
 0x5f4   :  { %v640_v1 = vpop.f32.mrf.mxu0 }
 0x5f5   :  { %v644_v2 = vsel %vm362_vm4, %v640_v1, -inf }
 0x5f6   :  { %645 = vmax.xlane.f32.xlu1 %v644_v2  ;;  %v5343_v53 = vpop.f32.mrf.mxu0 }
 0x5f8   :  { %v846_v52 = vpop.f32.mrf.mxu0 }
 0x5f9   :  { %v850_v3 = vsel %vm362_vm4, %v846_v52, -inf }
 0x5fa   :  { %851 = vmax.xlane.f32.xlu0 %v850_v3  ;;  %v5353_v4 = vpop.f32.mrf.mxu0 }
 0x5fc   :  { %v1052_v5 = vpop.f32.mrf.mxu0 }
 0x5fd   :  { %v1056_v6 = vsel %vm362_vm4, %v1052_v5, -inf }
 0x5fe   :  { %1057 = vmax.xlane.f32.xlu0 %v1056_v6  ;;  %v5363_v7 = vpop.f32.mrf.mxu0 }
 0x602   :  { %v1264_v55 = vpop.f32.mrf.mxu0 }
 0x603   :  { %v1268_v10 = vsel %vm362_vm4, %v1264_v55, -inf }
 0x604   :  { %1269 = vmax.xlane.f32.xlu0 %v1268_v10  ;;  %v5373_v11 = vpop.f32.mrf.mxu0 }
 0x606   :  { %v1464_v12 = vpop.f32.mrf.mxu0 }
 0x607   :  { %v1468_v13 = vsel %vm362_vm4, %v1464_v12, -inf }
 0x608   :  { %1469 = vmax.xlane.f32.xlu1 %v1468_v13  ;;  %v5383_v54 = vpop.f32.mrf.mxu0 }
 0x60a   :  { %v1664_v57 = vpop.f32.mrf.mxu0 }
 0x60b   :  { %v1668_v15 = vsel %vm362_vm4, %v1664_v57, -inf }
 0x60c   :  { %1669 = vmax.xlane.f32.xlu0 %v1668_v15  ;;  %v5393_v16 = vpop.f32.mrf.mxu0 }
 0x60e   :  { %v1864_v56 = vpop.f32.mrf.mxu0 }
 0x60f   :  { %v1868_v17 = vsel %vm362_vm4, %v1864_v56, -inf }
 0x610   :  { %v5403_v59 = vpop.f32.mrf.mxu0 }
 0x619   :  { %449 = vrot.lane.b32.xlu1 %v6039_v45, %s7418_s9 }
 0x63d   :  { %1869 = vmax.xlane.f32.xlu1 %v1868_v17 }
 0x64e   :  { %861 = vrot.lane.b32.xlu1 %v6039_v45, %s7467_s10 }
 0x652   :  { %1067 = vrot.lane.b32.xlu1 %v6039_v45, %s7468_s7 }
 0x656   :  { %1279 = vrot.lane.b32.xlu1 %v6053_v46, %s7418_s9  ;;  %s7469_s9 = smov 56  }
 0x67b   :  { %v440_v18 = vpop.xlane.xlu0 %439 }
 0x67c   :  { %v441_v19 = vsub.f32 %v434_v50, %v440_v18 }
 0x67e   :  { %v442_v20 = vmul.f32 1.442695, %v441_v19 }
 0x67f   :  { %v646_v21 = vpop.xlane.xlu1 %645 }
 0x680   :  { %5658 = vpow2.f32 %v442_v20  ;;  %v647_v26 = vsub.f32 %v640_v1, %v646_v21 }
 0x682   :  { %v648_v28 = vmul.f32 1.442695, %v647_v26 }
 0x683   :  { %v852_v29 = vpop.xlane.xlu0 %851 }
 0x684   :  { %5660 = vpow2.f32 %v648_v28  ;;  %v853_v43 = vsub.f32 %v846_v52, %v852_v29 }
 0x686   :  { %v854_v47 = vmul.f32 1.442695, %v853_v43 }
 0x687   :  { %v1058_v32 = vpop.xlane.xlu0 %1057 }
 0x688   :  { %v1059_v33 = vsub.f32 %v1052_v5, %v1058_v32 }
 0x68a   :  { %v1060_v34 = vmul.f32 1.442695, %v1059_v33 }
 0x68c   :  { %5662 = vpow2.f32 %v1060_v34 }
 0x68d   :  { %v5659_v35 = vpop.eup %5658  ;;  %v1270_v44 = vpop.xlane.xlu0 %1269  ;;  %5664 = vpow2.f32 %v854_v47 }
 0x68e   :  { %v444_v36 = vsel %vm362_vm4, %v5659_v35, 0.0  ;;  %v1271_v48 = vsub.f32 %v1264_v55, %v1270_v44 }
 0x68f   :  { %445 = vadd.xlane.f32.xlu0 %v444_v36 }
 0x690   :  { %v1272_v30 = vmul.f32 1.442695, %v1271_v48 }
 0x691   :  { %v5661_v37 = vpop.eup %5660  ;;  %v1470_v38 = vpop.xlane.xlu1 %1469 }
 0x692   :  { %v650_v39 = vsel %vm362_vm4, %v5661_v37, 0.0  ;;  %5666 = vpow2.f32 %v1272_v30  ;;  %v1471_v62 = vsub.f32 %v1464_v12, %v1470_v38 }
 0x693   :  { %651 = vadd.xlane.f32.xlu1 %v650_v39 }
 0x694   :  { %v1472_v50 = vmul.f32 1.442695, %v1471_v62 }
 0x695   :  { %v450_v40 = vpop.permute.xlu1 %449  ;;  %v1670_v49 = vpop.xlane.xlu0 %1669 }
 0x696   :  { %5335 = vmatpush3.msra.mxu1 %v450_v40  ;;  %v1671_v61 = vsub.f32 %v1664_v57, %v1670_v49 }
 0x697   :  { %5344 = vmatprep.subr.mxu1 %v5836_v14 }
 0x698   :  { %v1672_v51 = vmul.f32 1.442695, %v1671_v61  ;;  %v1973_v61 = vld [vmem:[%s7470_s22 + $0x18] sm:$0xff] }
 0x699   :  { %v6389_v41 = vpop.eup %5662  ;;  %5409 = vmatprep.subr.mxu0 %v1973_v61 }
 0x69a   :  { %v1062_v42 = vsel %vm362_vm4, %v6389_v41, 0.0  ;;  %5668 = vpow2.f32 %v1672_v51  ;;  %v5665_v63 = vpop.eup %5664  ;;  %5410 = vmatpush3.msra.mxu0 %v1973_v61 }
 0x69b   :  { %1063 = vadd.xlane.f32.xlu1 %v1062_v42  ;;  %5670 = vpow2.f32 %v1472_v50  ;;  %v1972_v50 = vld [vmem:[%s7470_s22 + $0x10] sm:$0xff] }
 0x69c   :  { %5411 = vmatprep.subr.mxu0 %v1972_v50 }
 0x69d   :  { %5412 = vmatpush3.msra.mxu0 %v1972_v50 }
 0x69f   :  { %v6398_v0 = vpop.eup %5666 }
 0x6a0   :  { %v1274_v53 = vsel %vm362_vm4, %v6398_v0, 0.0 }
 0x6a5   :  { %655 = vrot.lane.b32.xlu0 %v6039_v45, %s7469_s9  ;;  %v856_v45 = vsel %vm362_vm4, %v5665_v63, 0.0 }
 0x6a7   :  { %v6402_v52 = vpop.eup %5668 }
 0x6a8   :  { %v1674_v4 = vsel %vm362_vm4, %v6402_v52, 0.0  ;;  %v5671_v5 = vpop.eup %5670 }
 0x6a9   :  { %v1474_v6 = vsel %vm362_vm4, %v5671_v5, 0.0 }
 0x6ac   :  { %1479 = vrot.lane.b32.xlu1 %v6053_v46, %s7469_s9 }
 0x6c4   :  { %857 = vadd.xlane.f32.xlu0 %v856_v45 }
 0x6c6   :  { %v1870_v1 = vpop.xlane.xlu1 %1869 }
 0x6c7   :  { %v1871_v2 = vsub.f32 %v1864_v56, %v1870_v1 }
 0x6c8   :  { %1275 = vadd.xlane.f32.xlu0 %v1274_v53 }
 0x6c9   :  { %v1872_v3 = vmul.f32 1.442695, %v1871_v2 }
 0x6ca   :  { %v862_v10 = vpop.permute.xlu1 %861 }
 0x6cb   :  { %5672 = vpow2.f32 %v1872_v3 }
 0x6cc   :  { %1675 = vadd.xlane.f32.xlu0 %v1674_v4 }
 0x6ce   :  { %v1068_v11 = vpop.permute.xlu1 %1067 }
 0x6d0   :  { %1475 = vadd.xlane.f32.xlu1 %v1474_v6 }
 0x6d2   :  { %v1280_v12 = vpop.permute.xlu1 %1279 }
 0x6d8   :  { %v6407_v7 = vpop.eup %5672 }
 0x6d9   :  { %v1874_v55 = vsel %vm362_vm4, %v6407_v7, 0.0 }
 0x6da   :  { %1875 = vadd.xlane.f32.xlu0 %v1874_v55 }
 0x6e1   :  { %1879 = vrot.lane.b32.xlu1 %v6053_v46, %s7468_s7 }
 0x6f0   :  { %1679 = vrot.lane.b32.xlu0 %v6053_v46, %s7467_s10 }
 0x718   :  { %v446_v13 = vpop.xlane.xlu0 %445 }
 0x719   :  { %5674 = vrcp.f32 %v446_v13 }
 0x71c   :  { %v652_v54 = vpop.xlane.xlu1 %651  ;;  %v656_v16 = vpop.permute.xlu0 %655 }
 0x71d   :  { %5676 = vrcp.f32 %v652_v54 }
 0x724   :  { %v1064_v59 = vpop.xlane.xlu1 %1063 }
 0x726   :  { %v5675_v57 = vpop.eup %5674 }
 0x727   :  { %v448_v15 = vmul.f32 %v5675_v57, %v5659_v35 }
 0x728   :  { %v1480_v19 = vpop.permute.xlu1 %1479 }
 0x729   :  { %5337 = vmatmul.mubr.msk.f32.vlgmr.msra.gmra.mxu1 %vm362_vm4, %v448_v15 }
 0x72a   :  { %v5677_v56 = vpop.eup %5676  ;;  %5345 = vmatpush3.msra.mxu1 %v656_v16  ;;  %5346 = vmatprep.mubr.msk.f32.mxu1 %vm5838_vm3, %v5836_v14 }
 0x72b   :  { %5354 = vmatprep.subr.mxu1 %v5836_v14  ;;  %v654_v46 = vmul.f32 %v5677_v56, %v5661_v37 }
 0x72d   :  { %5347 = vmatmul.mubr.msk.f32.vlgmr.msra.gmra.mxu1 %vm362_vm4, %v654_v46 }
 0x72e   :  { %5355 = vmatpush3.msra.mxu1 %v862_v10  ;;  %5356 = vmatprep.mubr.msk.f32.mxu1 %vm5838_vm3, %v5836_v14 }
 0x72f   :  { %5364 = vmatprep.subr.mxu1 %v5836_v14 }
 0x74d   :  { %v858_v17 = vpop.xlane.xlu0 %857 }
 0x74e   :  { %5678 = vrcp.f32 %v858_v17 }
 0x74f   :  { %5680 = vrcp.f32 %v1064_v59  ;;  %v5070_v59 = vld [vmem:[%s7474_s27] ss:$0 sm:$0xff] }
 0x751   :  { %v1276_v18 = vpop.xlane.xlu0 %1275 }
 0x752   :  { %5682 = vrcp.f32 %v1276_v18 }
 0x755   :  { %v1676_v20 = vpop.xlane.xlu0 %1675 }
 0x759   :  { %v1476_v21 = vpop.xlane.xlu1 %1475 }
 0x75a   :  { %5684 = vrcp.f32 %v1476_v21 }
 0x75b   :  { %v5679_v26 = vpop.eup %5678  ;;  %5686 = vrcp.f32 %v1676_v20 }
 0x75c   :  { %v860_v28 = vmul.f32 %v5679_v26, %v5665_v63  ;;  %v5681_v29 = vpop.eup %5680  ;;  %v1971_v63 = vld [vmem:[%s7470_s22 + $0x8] sm:$0xff] }
 0x75d   :  { %v1066_v32 = vmul.f32 %v5681_v29, %v6389_v41  ;;  %v1880_v41 = vpop.permute.xlu1 %1879  ;;  %5413 = vmatprep.subr.mxu0 %v1971_v63 }
 0x75e   :  { %5357 = vmatmul.mubr.msk.f32.vlgmr.msra.gmra.mxu1 %vm362_vm4, %v860_v28  ;;  %5414 = vmatpush3.msra.mxu0 %v1971_v63  ;;  %v5074_v63 = vld [vmem:[%s7354_s12] ss:$0 sm:$0xff]  ;;  %s7484_s12 = smov 12  }
 0x75f   :  { %5365 = vmatpush3.msra.mxu1 %v1068_v11  ;;  %5366 = vmatprep.mubr.msk.f32.mxu1 %vm5838_vm3, %v5836_v14  ;;  %v5683_v33 = vpop.eup %5682 }
 0x760   :  { %5374 = vmatprep.subr.mxu1 %v5836_v14  ;;  %v1278_v35 = vmul.f32 %v5683_v33, %v6398_v0  ;;  %v1970_v0 = vld [vmem:[%s7470_s22] sm:$0xff] }
 0x761   :  { %5415 = vmatprep.subr.mxu0 %v1970_v0 }
 0x762   :  { %5367 = vmatmul.mubr.msk.f32.vlgmr.msra.gmra.mxu1 %vm362_vm4, %v1066_v32  ;;  %5416 = vmatpush3.msra.mxu0 %v1970_v0 }
 0x763   :  { %5375 = vmatpush3.msra.mxu1 %v1280_v12  ;;  %v1876_v34 = vpop.xlane.xlu0 %1875  ;;  %5376 = vmatprep.mubr.msk.f32.mxu1 %vm5838_vm3, %v5836_v14 }
 0x764   :  { %5688 = vrcp.f32 %v1876_v34  ;;  %5384 = vmatprep.subr.mxu1 %v5836_v14 }
 0x766   :  { %5377 = vmatmul.mubr.msk.f32.vlgmr.msra.gmra.mxu1 %vm362_vm4, %v1278_v35 }
 0x767   :  { %v5685_v36 = vpop.eup %5684  ;;  %5385 = vmatpush3.msra.mxu1 %v1480_v19  ;;  %5386 = vmatprep.mubr.msk.f32.mxu1 %vm5838_vm3, %v5836_v14  ;;  %v1680_v39 = vpop.permute.xlu0 %1679 }
 0x768   :  { %5394 = vmatprep.subr.mxu1 %v5836_v14  ;;  %v1478_v37 = vmul.f32 %v5685_v36, %v5671_v5  ;;  %v5687_v38 = vpop.eup %5686 }
 0x769   :  { %v1678_v40 = vmul.f32 %v5687_v38, %v6402_v52 }
 0x76a   :  { %5387 = vmatmul.mubr.msk.f32.vlgmr.msra.gmra.mxu1 %vm362_vm4, %v1478_v37 }
 0x76b   :  { %5395 = vmatpush3.msra.mxu1 %v1680_v39  ;;  %5396 = vmatprep.mubr.msk.f32.mxu1 %vm5838_vm3, %v5836_v14 }
 0x76c   :  { %5404 = vmatprep.subr.mxu1 %v5836_v14 }
 0x76e   :  { %5397 = vmatmul.mubr.msk.f32.vlgmr.msra.gmra.mxu1 %vm362_vm4, %v1678_v40  ;;  %v2111_v40 = vld [vmem:[%s7355_s13 + $0x18] sm:$0xff] }
 0x76f   :  { %5405 = vmatpush3.msra.mxu1 %v1880_v41  ;;  %5406 = vmatprep.mubr.msk.f32.mxu1 %vm5838_vm3, %v5836_v14  ;;  %v2110_v41 = vld [vmem:[%s7355_s13 + $0x10] sm:$0xff] }
 0x770   :  { %5420 = vmatprep.subr.mxu1 %v2111_v40 }
 0x771   :  { %v5689_v42 = vpop.eup %5688 }
 0x772   :  { %v1878_v43 = vmul.f32 %v5689_v42, %v6407_v7  ;;  %v2109_v42 = vld [vmem:[%s7355_s13 + $0x8] sm:$0xff] }
 0x774   :  { %5407 = vmatmul.mubr.msk.f32.vlgmr.msra.gmra.mxu1 %vm362_vm4, %v1878_v43  ;;  %v2108_v43 = vld [vmem:[%s7355_s13] sm:$0xff] }
 0x775   :  { %5421 = vmatpush3.msra.mxu1 %v2111_v40 }
 0x776   :  { %5422 = vmatprep.subr.mxu1 %v2110_v41 }
 0x777   :  { %5423 = vmatpush3.msra.mxu1 %v2110_v41 }
 0x778   :  { %5424 = vmatprep.subr.mxu1 %v2109_v42 }
 0x779   :  { %5425 = vmatpush3.msra.mxu1 %v2109_v42 }
 0x77a   :  { %5426 = vmatprep.subr.mxu1 %v2108_v43 }
 0x77b   :  { %5427 = vmatpush3.msra.mxu1 %v2108_v43 }
 0x7e9   :  { %v521_v44 = vpop.f32.mrf.mxu1 }
 0x7eb   :  { %v5338_v47 = vpop.f32.mrf.mxu1 }
 0x7ed   :  { %v727_v48 = vpop.f32.mrf.mxu1 }
 0x7ee   :  { %1144 = vrot.lane.b32.xlu0 %v727_v48, %s7424_s11  ;;  %s7472_s11 = smov 24  }
 0x7ef   :  { %v5348_v49 = vpop.f32.mrf.mxu1 }
 0x81e   :  { %v933_v30 = vpop.f32.mrf.mxu1 }
 0x81f   :  { %1148 = vrot.lane.b32.xlu1 %v933_v30, %s7471_s25 }
 0x820   :  { %v5358_v62 = vpop.f32.mrf.mxu1 }
 0x822   :  { %v1139_v51 = vpop.f32.mrf.mxu1 }
 0x823   :  { %1152 = vrot.lane.b32.xlu1 %v1139_v51, %s7472_s11  ;;  %v5073_v51 = vld [vmem:[%s7475_s26] ss:$0 sm:$0xff] }
 0x824   :  { %v5368_v45 = vpop.f32.mrf.mxu1 }
 0x826   :  { %v1351_v1 = vpop.f32.mrf.mxu1 }
 0x828   :  { %v5378_v2 = vpop.f32.mrf.mxu1 }
 0x82a   :  { %v1551_v53 = vpop.f32.mrf.mxu1 }
 0x82b   :  { %1956 = vrot.lane.b32.xlu0 %v1551_v53, %s7473_s24 }
 0x82c   :  { %v5388_v52 = vpop.f32.mrf.mxu1 }
 0x82e   :  { %v1751_v3 = vpop.f32.mrf.mxu1 }
 0x82f   :  { %1960 = vrot.lane.b32.xlu0 %v1751_v3, %s7471_s25  ;;  %v2269_v3 = vld [vmem:[%s7357_s15 + $0x78] sm:$0xff] }
 0x830   :  { %v5398_v4 = vpop.f32.mrf.mxu1  ;;  %5431 = vmatprep.subr.mxu0 %v2269_v3 }
 0x831   :  { %v2268_v4 = vld [vmem:[%s7357_s15 + $0x70] sm:$0xff] }
 0x834   :  { %v1951_v5 = vpop.f32.mrf.mxu1 }
 0x835   :  { %1964 = vrot.lane.b32.xlu1 %v1951_v5, %s7472_s11  ;;  %v2267_v5 = vld [vmem:[%s7357_s15 + $0x68] sm:$0xff] }
 0x836   :  { %v5408_v6 = vpop.f32.mrf.mxu1 }
 0x837   :  { %v2266_v6 = vld [vmem:[%s7357_s15 + $0x60] sm:$0xff] }
 0x860   :  { %v1145_v7 = vpop.permute.xlu0 %1144 }
 0x861   :  { %v1155_v10 = vsel %vm362_vm4, %v521_v44, %v1145_v7  ;;  %v2265_v7 = vld [vmem:[%s7357_s15 + $0x58] sm:$0xff] }
 0x891   :  { %v1149_v55 = vpop.permute.xlu1 %1148 }
 0x892   :  { %v1157_v11 = vsel %vm1156_vm5, %v1155_v10, %v1149_v55  ;;  %v2264_v55 = vld [vmem:[%s7357_s15 + $0x50] sm:$0xff]  ;;  %v2263_v10 = vld [vmem:[%s7357_s15 + $0x48] sm:$0xff] }
 0x895   :  { %v1153_v12 = vpop.permute.xlu1 %1152 }
 0x896   :  { %v1158_v13 = vsel %vm99_vm0, %v1157_v11, %v1153_v12  ;;  %v2262_v11 = vld [vmem:[%s7357_s15 + $0x40] sm:$0xff]  ;;  %v2261_v12 = vld [vmem:[%s7357_s15 + $0x38] sm:$0xff] }
 0x897   :  { %5417 = vmatprep.mubr.msk.f32.mxu0 %vm183_vm1, %v1158_v13  ;;  %v2260_v13 = vld [vmem:[%s7357_s15 + $0x30] sm:$0xff] }
 0x89d   :  { %v1957_v54 = vpop.permute.xlu0 %1956 }
 0x89e   :  { %v1967_v15 = vsel %vm362_vm4, %v1351_v1, %v1957_v54  ;;  %v2259_v54 = vld [vmem:[%s7357_s15 + $0x28] sm:$0xff] }
 0x8a1   :  { %v1961_v57 = vpop.permute.xlu0 %1960 }
 0x8a2   :  { %v1968_v16 = vsel %vm1156_vm5, %v1967_v15, %v1961_v57  ;;  %v2258_v57 = vld [vmem:[%s7357_s15 + $0x20] sm:$0xff]  ;;  %v2257_v15 = vld [vmem:[%s7357_s15 + $0x18] sm:$0xff] }
 0x8a7   :  { %v1965_v56 = vpop.permute.xlu1 %1964 }
 0x8a8   :  { %v1969_v46 = vsel %vm99_vm0, %v1968_v16, %v1965_v56  ;;  %v2256_v16 = vld [vmem:[%s7357_s15 + $0x10] sm:$0xff]  ;;  %v2255_v56 = vld [vmem:[%s7357_s15 + $0x8] sm:$0xff] }
 0x8a9   :  { %5418 = vmatmul.mubr.msk.f32.vlgmr.msra.gmra.mxu0 %vm183_vm1, %v1969_v46  ;;  %v2254_v46 = vld [vmem:[%s7357_s15] sm:$0xff] }
 0x8aa   :  { %5432 = vmatpush3.msra.mxu0 %v2269_v3 }
 0x8ab   :  { %5433 = vmatprep.subr.mxu0 %v2268_v4 }
 0x8ac   :  { %5434 = vmatpush3.msra.mxu0 %v2268_v4 }
 0x8ad   :  { %5435 = vmatprep.subr.mxu0 %v2267_v5 }
 0x8ae   :  { %5436 = vmatpush3.msra.mxu0 %v2267_v5 }
 0x8af   :  { %5437 = vmatprep.subr.mxu0 %v2266_v6 }
 0x8b0   :  { %5438 = vmatpush3.msra.mxu0 %v2266_v6 }
 0x8b1   :  { %5439 = vmatprep.subr.mxu0 %v2265_v7 }
 0x8b2   :  { %5440 = vmatpush3.msra.mxu0 %v2265_v7 }
 0x8b3   :  { %5441 = vmatprep.subr.mxu0 %v2264_v55 }
 0x8b4   :  { %5442 = vmatpush3.msra.mxu0 %v2264_v55 }
 0x8b5   :  { %5443 = vmatprep.subr.mxu0 %v2263_v10 }
 0x8b6   :  { %5444 = vmatpush3.msra.mxu0 %v2263_v10 }
 0x8b7   :  { %5445 = vmatprep.subr.mxu0 %v2262_v11 }
 0x8b8   :  { %5446 = vmatpush3.msra.mxu0 %v2262_v11 }
 0x8b9   :  { %5447 = vmatprep.subr.mxu0 %v2261_v12 }
 0x8ba   :  { %5448 = vmatpush3.msra.mxu0 %v2261_v12 }
 0x8bb   :  { %5449 = vmatprep.subr.mxu0 %v2260_v13 }
 0x8bc   :  { %5450 = vmatpush3.msra.mxu0 %v2260_v13 }
 0x8bd   :  { %5451 = vmatprep.subr.mxu0 %v2259_v54 }
 0x8be   :  { %5452 = vmatpush3.msra.mxu0 %v2259_v54 }
 0x8bf   :  { %5453 = vmatprep.subr.mxu0 %v2258_v57 }
 0x8c0   :  { %5454 = vmatpush3.msra.mxu0 %v2258_v57 }
 0x8c1   :  { %5455 = vmatprep.subr.mxu0 %v2257_v15 }
 0x8c2   :  { %5456 = vmatpush3.msra.mxu0 %v2257_v15 }
 0x8c3   :  { %5457 = vmatprep.subr.mxu0 %v2256_v16 }
 0x8c4   :  { %5458 = vmatpush3.msra.mxu0 %v2256_v16 }
 0x8c5   :  { %5459 = vmatprep.subr.mxu0 %v2255_v56 }
 0x8c6   :  { %5460 = vmatpush3.msra.mxu0 %v2255_v56 }
 0x8c7   :  { %5461 = vmatprep.subr.mxu0 %v2254_v46 }
 0x8c8   :  { %5462 = vmatpush3.msra.mxu0 %v2254_v46 }
 0x8c9   :  { %5507 = vmatprep.subr.mxu0 %v5836_v14 }
 0x969   :  { %v5419_v17 = vpop.f32.mrf.mxu0 }
 0x96a   :  { %v2059_v18 = vadd.f32 %v5419_v17, %v5070_v59 }
 0x96b   :  { %v2053_v19 = vpop.f32.mrf.mxu0 }
 0x96c   :  { %v6477_v20 = vadd.f32 %v2059_v18, %v6006_v9  ;;  %v2054_v21 = vadd.f32 %v5070_v59, %v2053_v19  ;;  %v5075_v59 = vld [vmem:[%s7356_s14] ss:$0 sm:$0xff] }
 0x96e   :  { %v6480_v26 = vadd.f32 %v2054_v21, %v6004_v8  ;;  %v2069_v28 = vsel %vm183_vm1, %v6477_v20, 0.0 }
 0x96f   :  { %2070 = vadd.xlane.f32.xlu1 %v2069_v28 }
 0x970   :  { %v2066_v29 = vsel %vm183_vm1, %v6480_v26, 0.0 }
 0x971   :  { %2067 = vadd.xlane.f32.xlu0 %v2066_v29 }
 0x9f8   :  { %v2071_v32 = vpop.xlane.xlu1 %2070 }
 0x9f9   :  { %v2073_v33 = vmul.f32 0.03125, %v2071_v32 }
 0x9fa   :  { %v2068_v34 = vpop.xlane.xlu0 %2067 }
 0x9fb   :  { %v2072_v35 = vmul.f32 0.03125, %v2068_v34  ;;  %v2075_v36 = vsub.f32 %v6477_v20, %v2073_v33 }
 0x9fd   :  { %v2074_v9 = vsub.f32 %v6480_v26, %v2072_v35  ;;  %v2077_v38 = vmul.f32 %v2075_v36, %v2075_v36 }
 0x9ff   :  { %v2076_v37 = vmul.f32 %v2074_v9, %v2074_v9  ;;  %v2081_v39 = vsel %vm183_vm1, %v2077_v38, 0.0 }
 0xa01   :  { %v2078_v8 = vsel %vm183_vm1, %v2076_v37, 0.0 }
 0xa02   :  { %2079 = vadd.xlane.f32.xlu0 %v2078_v8 }
 0xa06   :  { %2082 = vadd.xlane.f32.xlu0 %v2081_v39 }
 0xa8b   :  { %v2080_v44 = vpop.xlane.xlu0 %2079 }
 0xa8c   :  { %v2084_v47 = vmul.f32 0.03125, %v2080_v44 }
 0xa8e   :  { %v2086_v48 = vadd.f32 1e-05, %v2084_v47 }
 0xa8f   :  { %v2083_v49 = vpop.xlane.xlu0 %2082 }
 0xa90   :  { %5690 = vrsqrt.f32 %v2086_v48  ;;  %v2085_v30 = vmul.f32 0.03125, %v2083_v49 }
 0xa92   :  { %v2087_v61 = vadd.f32 1e-05, %v2085_v30 }
 0xa94   :  { %5692 = vrsqrt.f32 %v2087_v61 }
 0xa9d   :  { %v5691_v62 = vpop.eup %5690 }
 0xa9e   :  { %v2090_v50 = vmul.f32 %v5691_v62, %v2074_v9 }
 0xaa0   :  { %v2098_v45 = vmul.f32 %v5073_v51, %v2090_v50 }
 0xaa1   :  { %v5693_v0 = vpop.eup %5692 }
 0xaa2   :  { %v2091_v1 = vmul.f32 %v5693_v0, %v2075_v36  ;;  %v2106_v2 = vadd.f32 %v5074_v63, %v2098_v45 }
 0xaa4   :  { %v2099_v53 = vmul.f32 %v5073_v51, %v2091_v1  ;;  %5428 = vmatprep.mubr.msk.f32.mxu1 %vm183_vm1, %v2106_v2 }
 0xaa6   :  { %v2107_v52 = vadd.f32 %v5074_v63, %v2099_v53 }
 0xaa8   :  { %5429 = vmatmul.mubr.msk.f32.vlgmr.msra.gmra.mxu1 %vm183_vm1, %v2107_v52 }
 0xb68   :  { %v5430_v17 = vpop.f32.mrf.mxu1 }
 0xb69   :  { %v2197_v18 = vadd.f32 %v5430_v17, %v5075_v59 }
 0xb6a   :  { %v2191_v19 = vpop.f32.mrf.mxu1 }
 0xb6b   :  { %v2203_v21 = vmul.f32 0.70710677, %v2197_v18  ;;  %v2192_v28 = vadd.f32 %v5075_v59, %v2191_v19  ;;  %v2201_v46 = vmul.f32 0.5, %v2197_v18  ;;  %v5078_v19 = vld [vmem:[%s7358_s16] ss:$0 sm:$0xff] }
 0xb6d   :  { %v2205_v29 = vand.u32 2147483647, %v2203_v21  ;;  %v2202_v32 = vmul.f32 0.70710677, %v2192_v28  ;;  %vm2245_vm6 = vcmp.ge.f32.partialorder %v2203_v21, 0.0  ;;  %v2200_v16 = vmul.f32 0.5, %v2192_v28 }
 0xb6f   :  { %v2207_v33 = vmul.f32 0.3275911, %v2205_v29  ;;  %v2204_v34 = vand.u32 2147483647, %v2202_v32  ;;  %v2233_v37 = vsub.f32 0.0, %v2205_v29  ;;  %vm2244_vm7 = vcmp.ge.f32.partialorder %v2202_v32, 0.0 }
 0xb71   :  { %v2209_v35 = vadd.f32 1.0, %v2207_v33  ;;  %v2206_v36 = vmul.f32 0.3275911, %v2204_v34  ;;  %v2232_v8 = vsub.f32 0.0, %v2204_v34  ;;  %v2235_v38 = vmul.f32 %v2233_v37, %v2205_v29 }
 0xb73   :  { %5694 = vrcp.f32 %v2209_v35  ;;  %v2208_v9 = vadd.f32 1.0, %v2206_v36  ;;  %v2234_v40 = vmul.f32 %v2232_v8, %v2204_v34  ;;  %v2238_v42 = vmul.f32 1.442695, %v2235_v38 }
 0xb75   :  { %5696 = vrcp.f32 %v2208_v9  ;;  %v2236_v47 = vmul.f32 1.442695, %v2234_v40 }
 0xb76   :  { %5698 = vpow2.f32 %v2238_v42  ;;  %v5086_v42 = vld [vmem:[%s7456_s8 + $0x38] sm:$0xff] }
 0xb77   :  { %5700 = vpow2.f32 %v2236_v47  ;;  %5466 = vmatprep.subr.mxu1 %v5086_v42  ;;  %v5083_v47 = vld [vmem:[%s7456_s8 + $0x20] sm:$0xff] }
 0xb78   :  { %5467 = vmatpush3.msra.mxu1 %v5086_v42 }
 0xb80   :  { %v5695_v39 = vpop.eup %5694 }
 0xb81   :  { %v2215_v41 = vmul.f32 1.0614054, %v5695_v39 }
 0xb82   :  { %v5697_v43 = vpop.eup %5696 }
 0xb83   :  { %v2217_v44 = vadd.f32 -1.4531521, %v2215_v41  ;;  %v2214_v48 = vmul.f32 1.0614054, %v5697_v43  ;;  %v5699_v3 = vpop.eup %5698 }
 0xb84   :  { %v5701_v7 = vpop.eup %5700 }
 0xb85   :  { %v2219_v49 = vmul.f32 %v5695_v39, %v2217_v44  ;;  %v2216_v30 = vadd.f32 -1.4531521, %v2214_v48  ;;  %v5084_v44 = vld [vmem:[%s7456_s8 + $0x28] sm:$0xff] }
 0xb87   :  { %v2221_v61 = vadd.f32 1.4214138, %v2219_v49  ;;  %v2218_v62 = vmul.f32 %v5697_v43, %v2216_v30 }
 0xb89   :  { %v2223_v51 = vmul.f32 %v5695_v39, %v2221_v61  ;;  %v2220_v50 = vadd.f32 1.4214138, %v2218_v62 }
 0xb8b   :  { %v2225_v63 = vadd.f32 -0.28449672, %v2223_v51  ;;  %v2222_v45 = vmul.f32 %v5697_v43, %v2220_v50 }
 0xb8d   :  { %v2227_v0 = vmul.f32 %v5695_v39, %v2225_v63  ;;  %v2224_v1 = vadd.f32 -0.28449672, %v2222_v45  ;;  %v5081_v63 = vld [vmem:[%s7457_s6 + $0x1] ss:$0 sm:$0xff]  ;;  %s7486_s6 = smov 20  }
 0xb8f   :  { %v2229_v2 = vadd.f32 0.2548296, %v2227_v0  ;;  %v2226_v53 = vmul.f32 %v5697_v43, %v2224_v1 }
 0xb91   :  { %v2231_v52 = vmul.f32 %v5695_v39, %v2229_v2  ;;  %v2228_v4 = vadd.f32 0.2548296, %v2226_v53  ;;  %v5082_v53 = vld [vmem:[%s7458_s3 + $0x1] ss:$0 sm:$0xff]  ;;  %s7476_s3 = smov 96  }
 0xb93   :  { %v2241_v5 = vmul.f32 %v5699_v3, %v2231_v52  ;;  %v2230_v6 = vmul.f32 %v5697_v43, %v2228_v4  ;;  %v5085_v43 = vld [vmem:[%s7456_s8 + $0x30] sm:$0xff]  ;;  %s7483_s8 = smov 44  }
 0xb94   :  { %5468 = vmatprep.subr.mxu1 %v5085_v43 }
 0xb95   :  { %v2243_v55 = vsub.f32 1.0, %v2241_v5  ;;  %v2240_v10 = vmul.f32 %v5701_v7, %v2230_v6  ;;  %5469 = vmatpush3.msra.mxu1 %v5085_v43  ;;  %v5088_v5 = vld [vmem:[%s7459_s30 + $0x1] ss:$0 sm:$0xff]  ;;  %s7477_s30 = smov 28  }
 0xb96   :  { %5470 = vmatprep.subr.mxu1 %v5084_v44 }
 0xb97   :  { %v2247_v11 = vsub.f32 0.0, %v2243_v55  ;;  %v2242_v12 = vsub.f32 1.0, %v2240_v10  ;;  %5471 = vmatpush3.msra.mxu1 %v5084_v44 }
 0xb98   :  { %5472 = vmatprep.subr.mxu1 %v5083_v47 }
 0xb99   :  { %v2249_v13 = vsel %vm2245_vm6, %v2243_v55, %v2247_v11  ;;  %v2246_v54 = vsub.f32 0.0, %v2242_v12  ;;  %5473 = vmatpush3.msra.mxu1 %v5083_v47 }
 0xb9a   :  { %v2251_v57 = vadd.f32 1.0, %v2249_v13  ;;  %5477 = vmatprep.subr.mxu1 %v5836_v14 }
 0xb9b   :  { %v2248_v15 = vsel %vm2244_vm7, %v2242_v12, %v2246_v54 }
 0xb9c   :  { %v2250_v56 = vadd.f32 1.0, %v2248_v15  ;;  %v2253_v17 = vmul.f32 %v2251_v57, %v2201_v46 }
 0xb9e   :  { %v2252_v59 = vmul.f32 %v2250_v56, %v2200_v16 }
 0xba0   :  { %5463 = vmatprep.mubr.f32.mxu0 %v2252_v59 }
 0xba1   :  { %5464 = vmatmul.mubr.f32.vlgmr.msra.gmra.mxu0 %v2253_v17 }
 0xba2   :  { %5509 = vmatprep.mubr.msk.f32.mxu0 %vm5838_vm3, %v5836_v14 }
 0xc61   :  { %v5465_v21 = vpop.f32.mrf.mxu0 }
 0xc62   :  { %v2349_v29 = vadd.f32 %v5465_v21, %v5078_v19 }
 0xc63   :  { %v2343_v33 = vpop.f32.mrf.mxu0 }
 0xc64   :  { %v6568_v32 = vadd.f32 %v2349_v29, %v6477_v20  ;;  %v2344_v28 = vadd.f32 %v5078_v19, %v2343_v33 }
 0xc66   :  { %v6571_v18 = vadd.f32 %v2344_v28, %v6480_v26  ;;  %v2361_v34 = vsel %vm183_vm1, %v6568_v32, 0.0 }
 0xc67   :  { %2362 = vadd.xlane.f32.xlu1 %v2361_v34  ;;  %v6639_v34 = vld [vmem:[%s7461_s4] sm:$0xff]  ;;  %s7480_s4 = smov 36  }
 0xc68   :  { %v2358_v35 = vsel %vm183_vm1, %v6571_v18, 0.0 }
 0xc69   :  { %2359 = vadd.xlane.f32.xlu0 %v2358_v35 }
 0xcf0   :  { %v2363_v36 = vpop.xlane.xlu1 %2362 }
 0xcf1   :  { %v2365_v9 = vmul.f32 0.03125, %v2363_v36 }
 0xcf2   :  { %v2360_v37 = vpop.xlane.xlu0 %2359 }
 0xcf3   :  { %v2367_v8 = vsub.f32 %v6568_v32, %v2365_v9  ;;  %v2364_v38 = vmul.f32 0.03125, %v2360_v37 }
 0xcf5   :  { %v2366_v20 = vsub.f32 %v6571_v18, %v2364_v38  ;;  %v2369_v39 = vmul.f32 %v2367_v8, %v2367_v8 }
 0xcf7   :  { %v2373_v26 = vsel %vm183_vm1, %v2369_v39, 0.0  ;;  %v2368_v40 = vmul.f32 %v2366_v20, %v2366_v20 }
 0xcf8   :  { %2374 = vadd.xlane.f32.xlu1 %v2373_v26 }
 0xcf9   :  { %v2370_v41 = vsel %vm183_vm1, %v2368_v40, 0.0 }
 0xcfa   :  { %2371 = vadd.xlane.f32.xlu0 %v2370_v41 }
 0xd81   :  { %v2375_v48 = vpop.xlane.xlu1 %2374 }
 0xd82   :  { %v2377_v49 = vmul.f32 0.03125, %v2375_v48 }
 0xd83   :  { %v2372_v30 = vpop.xlane.xlu0 %2371 }
 0xd84   :  { %v2379_v61 = vadd.f32 1e-05, %v2377_v49  ;;  %v2376_v62 = vmul.f32 0.03125, %v2372_v30 }
 0xd86   :  { %5702 = vrsqrt.f32 %v2379_v61  ;;  %v2378_v51 = vadd.f32 1e-05, %v2376_v62 }
 0xd88   :  { %5704 = vrsqrt.f32 %v2378_v51 }
 0xd93   :  { %v5703_v50 = vpop.eup %5702 }
 0xd94   :  { %v2383_v45 = vmul.f32 %v5703_v50, %v2367_v8 }
 0xd95   :  { %v5705_v0 = vpop.eup %5704 }
 0xd96   :  { %v2382_v1 = vmul.f32 %v5705_v0, %v2366_v20  ;;  %v2391_v2 = vmul.f32 %v5081_v63, %v2383_v45 }
 0xd98   :  { %v2390_v52 = vmul.f32 %v5081_v63, %v2382_v1  ;;  %v2399_v4 = vadd.f32 %v5082_v53, %v2391_v2 }
 0xd9a   :  { %v2398_v3 = vadd.f32 %v5082_v53, %v2390_v52 }
 0xd9c   :  { %5474 = vmatprep.mubr.msk.f32.mxu1 %vm183_vm1, %v2398_v3 }
 0xd9d   :  { %5475 = vmatmul.mubr.msk.f32.vlgmr.msra.gmra.mxu1 %vm183_vm1, %v2399_v4 }
 0xd9e   :  { %5479 = vmatprep.mubr.msk.f32.mxu1 %vm5838_vm3, %v5836_v14 }
 0xe5d   :  { %v5476_v6 = vpop.f32.mrf.mxu1 }
 0xe5e   :  { %v6607_v7 = vadd.f32 %v5476_v6, %v5088_v5 }
 0xe5f   :  { %v2485_v55 = vpop.f32.mrf.mxu1 }
 0xe60   :  { %v6609_v10 = vadd.f32 %v5088_v5, %v2485_v55 }
 0xe62   :  { %2510 = vrot.lane.b32.xlu0 %v6609_v10, %s7476_s3  ;;  %v2508_v19 = vmul.f32 %v6609_v10, %v6265_v58  ;;  %v2494_v35 = vmul.f32 %v6639_v34, %v6609_v10  ;;  %v2690_v45 = vmul.f32 %v6609_v10, %v6267_v60  ;;  %v2707_v3 = vmul.f32 %v6609_v10, %v6269_v22 }
 0xed4   :  { %v2511_v11 = vpop.permute.xlu0 %2510 }
 0xed5   :  { %2513 = vrot.lane.b32.xlu1 %v2511_v11, %s7473_s24 }
 0xed9   :  { %2495 = vrot.lane.b32.xlu1 %v6609_v10, %s7473_s24 }
 0xf47   :  { %v2514_v12 = vpop.permute.xlu1 %2513 }
 0xf48   :  { %v2515_v13 = vsel %vm320_vm2, %v2514_v12, %v2511_v11 }
 0xf49   :  { %2516 = vrot.lane.b32.xlu1 %v2515_v13, %s7473_s24 }
 0xf4b   :  { %v2496_v54 = vpop.permute.xlu1 %2495 }
 0xf4c   :  { %v2497_v57 = vsel %vm320_vm2, %v2496_v54, %v6609_v10 }
 0xf4d   :  { %2498 = vrot.lane.b32.xlu0 %v2497_v57, %s7473_s24 }
 0xfbb   :  { %v2517_v15 = vpop.permute.xlu1 %2516 }
 0xfbc   :  { %v2518_v16 = vsel %vm320_vm2, %v2517_v15, %v2511_v11 }
 0xfbd   :  { %v2519_v56 = vmul.f32 %v2518_v16, %v6198_v31 }
 0xfbf   :  { %v2499_v46 = vpop.permute.xlu0 %2498  ;;  %2521 = vrot.lane.b32.xlu1 %v2519_v56, %s7477_s30 }
 0xfc0   :  { %v2500_v59 = vsel %vm320_vm2, %v2499_v46, %v6609_v10 }
 0xfc1   :  { %v2501_v17 = vmul.f32 %v2500_v59, %v6198_v31 }
 0xfc3   :  { %2503 = vrot.lane.b32.xlu0 %v2501_v17, %s7478_s19 }
 0xfc7   :  { %2708 = vrot.lane.b32.xlu0 %v6609_v10, %s7479_s23 }
0x1031   :  { %v2522_v21 = vpop.permute.xlu1 %2521 }
0x1032   :  { %v2524_v29 = vadd.f32 %v2522_v21, %v2508_v19 }
0x1034   :  { %2526 = vrot.lane.b32.xlu1 %v2524_v29, %s7476_s3 }
0x1035   :  { %v2504_v33 = vpop.permute.xlu0 %2503 }
0x1036   :  { %v2506_v36 = vadd.f32 %v2504_v33, %v2494_v35 }
0x1038   :  { %2691 = vrot.lane.b32.xlu1 %v6609_v10, %s7462_s0  ;;  %v2507_v37 = vmul.f32 0.35355338, %v2506_v36 }
0x1039   :  { %v2709_v28 = vpop.permute.xlu0 %2708 }
0x103a   :  { %2711 = vrot.lane.b32.xlu0 %v2709_v28, %s7473_s24 }
0x10a6   :  { %v2527_v9 = vpop.permute.xlu1 %2526 }
0x10a7   :  { %5478 = vmatpush3.xpose.msk.msra.mxu1 %vm362_vm4, %v2527_v9 }
0x10a8   :  { %5482 = vmatprep.subr.mxu1 %v5836_v14 }
0x10aa   :  { %v2692_v8 = vpop.permute.xlu1 %2691  ;;  %5480 = vmatmul.mubr.msk.f32.vlgmr.msra.gmra.mxu1 %vm362_vm4, %v2507_v37 }
0x10ab   :  { %2694 = vrot.lane.b32.xlu1 %v2692_v8, %s7473_s24  ;;  %5484 = vmatprep.mubr.msk.f32.mxu1 %vm5838_vm3, %v5836_v14 }
0x10ac   :  { %v2712_v38 = vpop.permute.xlu0 %2711 }
0x10ad   :  { %v2713_v20 = vsel %vm320_vm2, %v2712_v38, %v2709_v28 }
0x10ae   :  { %2714 = vrot.lane.b32.xlu0 %v2713_v20, %s7473_s24 }
0x111d   :  { %v2695_v39 = vpop.permute.xlu1 %2694 }
0x111e   :  { %v2696_v26 = vsel %vm320_vm2, %v2695_v39, %v2692_v8 }
0x111f   :  { %2697 = vrot.lane.b32.xlu1 %v2696_v26, %s7473_s24 }
0x1120   :  { %v2715_v40 = vpop.permute.xlu0 %2714 }
0x1121   :  { %v2716_v41 = vsel %vm320_vm2, %v2715_v40, %v2709_v28 }
0x1122   :  { %v2717_v42 = vmul.f32 %v2716_v41, %v6198_v31 }
0x1124   :  { %2719 = vrot.lane.b32.xlu1 %v2717_v42, %s7480_s4 }
0x116a   :  { %v2599_v43 = vpop.f32.mrf.mxu1 }
0x116b   :  { %v2603_v44 = vsel %vm362_vm4, %v2599_v43, -inf }
0x116c   :  { %2604 = vmax.xlane.f32.xlu0 %v2603_v44  ;;  %v5481_v47 = vpop.f32.mrf.mxu1 }
0x1182   :  { %2614 = vrot.lane.b32.xlu0 %v6609_v10, %s7481_s18 }
0x1191   :  { %v2698_v48 = vpop.permute.xlu1 %2697 }
0x1192   :  { %v2699_v49 = vsel %vm320_vm2, %v2698_v48, %v2692_v8 }
0x1193   :  { %v2700_v30 = vmul.f32 %v2699_v49, %v6198_v31 }
0x1195   :  { %2702 = vrot.lane.b32.xlu1 %v2700_v30, %s7482_s5 }
0x1196   :  { %v2720_v63 = vpop.permute.xlu1 %2719 }
0x1197   :  { %v2722_v4 = vadd.f32 %v2720_v63, %v2707_v3 }
0x11f5   :  { %v2605_v61 = vpop.xlane.xlu0 %2604 }
0x11f6   :  { %v2606_v62 = vsub.f32 %v2599_v43, %v2605_v61 }
0x11f8   :  { %v2607_v51 = vmul.f32 1.442695, %v2606_v62 }
0x11f9   :  { %v2615_v50 = vpop.permute.xlu0 %2614 }
0x11fa   :  { %5706 = vpow2.f32 %v2607_v51  ;;  %5483 = vmatpush3.msra.mxu1 %v2615_v50 }
0x11fb   :  { %5487 = vmatprep.subr.mxu1 %v5836_v14 }
0x1207   :  { %v5707_v0 = vpop.eup %5706  ;;  %v2703_v1 = vpop.permute.xlu1 %2702 }
0x1208   :  { %v2705_v2 = vadd.f32 %v2703_v1, %v2690_v45  ;;  %v2609_v53 = vsel %vm362_vm4, %v5707_v0, 0.0 }
0x1209   :  { %2610 = vadd.xlane.f32.xlu1 %v2609_v53 }
0x120a   :  { %v2706_v52 = vmul.f32 0.35355338, %v2705_v2 }
0x120c   :  { %2724 = vrot.lane.b32.xlu0 %v2706_v52, %s7462_s0 }
0x1210   :  { %2908 = vrot.lane.b32.xlu0 %v6609_v10, %s7463_s28 }
0x1214   :  { %2891 = vrot.lane.b32.xlu0 %v6609_v10, %s7464_s1 }
0x1218   :  { %3091 = vrot.lane.b32.xlu0 %v6609_v10, %s7466_s2 }
0x121a   :  { %2727 = vrot.lane.b32.xlu1 %v2722_v4, %s7479_s23 }
0x121c   :  { %3519 = vrot.lane.b32.xlu0 %v6607_v7, %s7479_s23 }
0x121e   :  { %3108 = vrot.lane.b32.xlu1 %v6609_v10, %s7465_s29 }
0x1220   :  { %3719 = vrot.lane.b32.xlu0 %v6607_v7, %s7463_s28 }
0x1222   :  { %3321 = vrot.lane.b32.xlu1 %v6607_v7, %s7476_s3 }
0x1224   :  { %3919 = vrot.lane.b32.xlu0 %v6607_v7, %s7465_s29 }
0x1226   :  { %3502 = vrot.lane.b32.xlu1 %v6607_v7, %s7462_s0 }
0x122a   :  { %3702 = vrot.lane.b32.xlu1 %v6607_v7, %s7464_s1 }
0x122e   :  { %3902 = vrot.lane.b32.xlu1 %v6607_v7, %s7466_s2 }
0x127e   :  { %v2725_v5 = vpop.permute.xlu0 %2724 }
0x1282   :  { %v6692_v6 = vpop.permute.xlu0 %2908 }
0x1283   :  { %2911 = vrot.lane.b32.xlu0 %v6692_v6, %s7473_s24 }
0x1286   :  { %v6696_v55 = vpop.permute.xlu0 %2891 }
0x1287   :  { %2894 = vrot.lane.b32.xlu1 %v6696_v55, %s7473_s24 }
0x128a   :  { %v6700_v11 = vpop.permute.xlu0 %3091 }
0x128b   :  { %3094 = vrot.lane.b32.xlu1 %v6700_v11, %s7473_s24 }
0x128e   :  { %v6704_v12 = vpop.permute.xlu0 %3519 }
0x128f   :  { %3522 = vrot.lane.b32.xlu1 %v6704_v12, %s7473_s24 }
0x1292   :  { %v2611_v13 = vpop.xlane.xlu1 %2610  ;;  %v6708_v54 = vpop.permute.xlu0 %3719 }
0x1293   :  { %5708 = vrcp.f32 %v2611_v13  ;;  %3722 = vrot.lane.b32.xlu1 %v6708_v54, %s7473_s24 }
0x1296   :  { %v2728_v57 = vpop.permute.xlu1 %2727  ;;  %v6712_v15 = vpop.permute.xlu0 %3919 }
0x1297   :  { %3922 = vrot.lane.b32.xlu1 %v6712_v15, %s7473_s24 }
0x129a   :  { %v6716_v16 = vpop.permute.xlu1 %3108 }
0x129b   :  { %3111 = vrot.lane.b32.xlu0 %v6716_v16, %s7473_s24 }
0x129e   :  { %v6720_v56 = vpop.permute.xlu1 %3321 }
0x129f   :  { %3324 = vrot.lane.b32.xlu0 %v6720_v56, %s7473_s24 }
0x12a0   :  { %v5709_v46 = vpop.eup %5708 }
0x12a1   :  { %v2613_v59 = vmul.f32 %v5709_v46, %v5707_v0 }
0x12a2   :  { %v6724_v17 = vpop.permute.xlu1 %3502 }
0x12a3   :  { %5485 = vmatmul.mubr.msk.f32.vlgmr.msra.gmra.mxu1 %vm362_vm4, %v2613_v59  ;;  %3505 = vrot.lane.b32.xlu0 %v6724_v17, %s7473_s24 }
0x12a4   :  { %5488 = vmatpush3.xpose.msk.msra.mxu1 %vm362_vm4, %v2728_v57  ;;  %5489 = vmatprep.mubr.msk.f32.mxu1 %vm5838_vm3, %v5836_v14 }
0x12a5   :  { %5492 = vmatprep.subr.mxu1 %v5836_v14 }
0x12a6   :  { %v6733_v19 = vpop.permute.xlu1 %3702 }
0x12a7   :  { %5490 = vmatmul.mubr.msk.f32.vlgmr.msra.gmra.mxu1 %vm362_vm4, %v2725_v5  ;;  %3705 = vrot.lane.b32.xlu0 %v6733_v19, %s7473_s24 }
0x12a8   :  { %5494 = vmatprep.mubr.msk.f32.mxu1 %vm5838_vm3, %v5836_v14 }
0x12aa   :  { %v6740_v21 = vpop.permute.xlu1 %3902 }
0x12ab   :  { %3905 = vrot.lane.b32.xlu0 %v6740_v21, %s7473_s24 }
0x12f5   :  { %v2912_v29 = vpop.permute.xlu0 %2911 }
0x12f6   :  { %v2913_v33 = vsel %vm320_vm2, %v2912_v29, %v6692_v6 }
0x12f7   :  { %2914 = vrot.lane.b32.xlu1 %v2913_v33, %s7473_s24 }
0x12f9   :  { %v2895_v28 = vpop.permute.xlu1 %2894 }
0x12fa   :  { %v2896_v35 = vsel %vm320_vm2, %v2895_v28, %v6696_v55 }
0x12fb   :  { %2897 = vrot.lane.b32.xlu0 %v2896_v35, %s7473_s24 }
0x12fd   :  { %v3095_v37 = vpop.permute.xlu1 %3094 }
0x12fe   :  { %v3096_v8 = vsel %vm320_vm2, %v3095_v37, %v6700_v11 }
0x1301   :  { %v3523_v39 = vpop.permute.xlu1 %3522 }
0x1302   :  { %v3524_v26 = vsel %vm320_vm2, %v3523_v39, %v6704_v12 }
0x1305   :  { %v3723_v42 = vpop.permute.xlu1 %3722 }
0x1306   :  { %v3724_v43 = vsel %vm320_vm2, %v3723_v42, %v6708_v54 }
0x1309   :  { %v3923_v48 = vpop.permute.xlu1 %3922 }
0x130a   :  { %v3924_v49 = vsel %vm320_vm2, %v3923_v48, %v6712_v15 }
0x130d   :  { %v3112_v36 = vpop.permute.xlu0 %3111 }
0x130e   :  { %v3113_v9 = vsel %vm320_vm2, %v3112_v36, %v6716_v16 }
0x130f   :  { %3114 = vrot.lane.b32.xlu0 %v3113_v9, %s7473_s24 }
0x1311   :  { %v3325_v38 = vpop.permute.xlu0 %3324 }
0x1312   :  { %v3326_v20 = vsel %vm320_vm2, %v3325_v38, %v6720_v56 }
0x1313   :  { %3097 = vrot.lane.b32.xlu0 %v3096_v8, %s7473_s24 }
0x1315   :  { %v3506_v40 = vpop.permute.xlu0 %3505 }
0x1316   :  { %v3507_v41 = vsel %vm320_vm2, %v3506_v40, %v6724_v17 }
0x1317   :  { %3306 = vrot.lane.b32.xlu0 %v6607_v7, %s7473_s24 }
0x1319   :  { %v3706_v44 = vpop.permute.xlu0 %3705 }
0x131a   :  { %v3707_v47 = vsel %vm320_vm2, %v3706_v44, %v6733_v19 }
0x131b   :  { %3327 = vrot.lane.b32.xlu0 %v3326_v20, %s7473_s24 }
0x131d   :  { %v3906_v51 = vpop.permute.xlu0 %3905 }
0x131e   :  { %v3907_v3 = vsel %vm320_vm2, %v3906_v51, %v6740_v21 }
0x131f   :  { %3525 = vrot.lane.b32.xlu0 %v3524_v26, %s7473_s24 }
0x1323   :  { %3508 = vrot.lane.b32.xlu0 %v3507_v41, %s7473_s24 }
0x1327   :  { %3725 = vrot.lane.b32.xlu0 %v3724_v43, %s7473_s24 }
0x132b   :  { %3708 = vrot.lane.b32.xlu0 %v3707_v47, %s7473_s24 }
0x132f   :  { %3925 = vrot.lane.b32.xlu0 %v3924_v49, %s7473_s24  ;;  %v2890_v49 = vmul.f32 %v6609_v10, %v6271_v23 }
0x1363   :  { %v6776_v30 = vpop.f32.mrf.mxu1 }
0x1365   :  { %v5486_v61 = vpop.f32.mrf.mxu1 }
0x1367   :  { %v2799_v62 = vpop.f32.mrf.mxu1 }
0x1368   :  { %v2803_v50 = vsel %vm362_vm4, %v2799_v62, -inf }
0x1369   :  { %v2915_v63 = vpop.permute.xlu1 %2914  ;;  %2804 = vmax.xlane.f32.xlu1 %v2803_v50  ;;  %v5491_v45 = vpop.f32.mrf.mxu1 }
0x136a   :  { %v2916_v0 = vsel %vm320_vm2, %v2915_v63, %v6692_v6 }
0x136b   :  { %v2917_v1 = vmul.f32 %v2916_v0, %v6198_v31  ;;  %v3107_v0 = vmul.f32 %v6609_v10, %v6283_v27 }
0x136d   :  { %2919 = vrot.lane.b32.xlu0 %v2917_v1, %s7483_s8  ;;  %v2898_v2 = vpop.permute.xlu0 %2897  ;;  %v3090_v1 = vmul.f32 %v6609_v10, %v6279_v25 }
0x136e   :  { %v2899_v53 = vsel %vm320_vm2, %v2898_v2, %v6696_v55 }
0x136f   :  { %v2900_v52 = vmul.f32 %v2899_v53, %v6198_v31 }
0x1371   :  { %2902 = vrot.lane.b32.xlu0 %v2900_v52, %s7484_s12 }
0x137a   :  { %3908 = vrot.lane.b32.xlu1 %v3907_v3, %s7473_s24 }
0x1381   :  { %v3115_v4 = vpop.permute.xlu0 %3114 }
0x1382   :  { %v3116_v5 = vsel %vm320_vm2, %v3115_v4, %v6716_v16 }
0x1383   :  { %v3117_v6 = vmul.f32 %v3116_v5, %v6198_v31 }
0x1385   :  { %3119 = vrot.lane.b32.xlu0 %v3117_v6, %s7485_s20  ;;  %v3098_v13 = vpop.permute.xlu0 %3097 }
0x1386   :  { %v3099_v55 = vsel %vm320_vm2, %v3098_v13, %v6700_v11  ;;  %v3319_v13 = vmul.f32 %v6607_v7, %v6265_v58  ;;  %v3718_v58 = vmul.f32 %v6607_v7, %v6277_v24 }
0x1387   :  { %v3100_v57 = vmul.f32 %v3099_v55, %v6198_v31 }
0x1389   :  { %3102 = vrot.lane.b32.xlu0 %v3100_v57, %s7486_s6  ;;  %v3307_v46 = vpop.permute.xlu0 %3306 }
0x138a   :  { %v3308_v59 = vsel %vm320_vm2, %v3307_v46, %v6607_v7  ;;  %v3501_v46 = vmul.f32 %v6607_v7, %v6267_v60 }
0x138d   :  { %3309 = vrot.lane.b32.xlu0 %v3308_v59, %s7473_s24  ;;  %v3328_v29 = vpop.permute.xlu0 %3327 }
0x138e   :  { %v3329_v16 = vsel %vm320_vm2, %v3328_v29, %v6720_v56  ;;  %v3518_v29 = vmul.f32 %v6607_v7, %v6269_v22 }
0x138f   :  { %v3330_v33 = vmul.f32 %v3329_v16, %v6198_v31 }
0x1391   :  { %v3526_v28 = vpop.permute.xlu0 %3525  ;;  %3332 = vrot.lane.b32.xlu1 %v3330_v33, %s7477_s30 }
0x1392   :  { %v3527_v11 = vsel %vm320_vm2, %v3526_v28, %v6704_v12 }
0x1393   :  { %v3528_v35 = vmul.f32 %v3527_v11, %v6198_v31 }
0x1395   :  { %3530 = vrot.lane.b32.xlu0 %v3528_v35, %s7480_s4  ;;  %v3509_v36 = vpop.permute.xlu0 %3508  ;;  %v3701_v35 = vmul.f32 %v6607_v7, %v6271_v23  ;;  %v3901_v23 = vmul.f32 %v6607_v7, %v6279_v25  ;;  %v3305_v25 = vmul.f32 %v6639_v34, %v6607_v7 }
0x1396   :  { %v3510_v9 = vsel %vm320_vm2, %v3509_v36, %v6724_v17 }
0x1397   :  { %v3511_v37 = vmul.f32 %v3510_v9, %v6198_v31 }
0x1399   :  { %v3726_v8 = vpop.permute.xlu0 %3725  ;;  %3513 = vrot.lane.b32.xlu1 %v3511_v37, %s7482_s5  ;;  %v3918_v37 = vmul.f32 %v6607_v7, %v6283_v27 }
0x139a   :  { %v3727_v56 = vsel %vm320_vm2, %v3726_v8, %v6708_v54 }
0x139b   :  { %v3728_v38 = vmul.f32 %v3727_v56, %v6198_v31 }
0x139d   :  { %3730 = vrot.lane.b32.xlu0 %v3728_v38, %s7483_s8  ;;  %v3709_v12 = vpop.permute.xlu0 %3708 }
0x139e   :  { %v3710_v20 = vsel %vm320_vm2, %v3709_v12, %v6733_v19 }
0x139f   :  { %v3711_v39 = vmul.f32 %v3710_v20, %v6198_v31 }
0x13a1   :  { %v3926_v26 = vpop.permute.xlu0 %3925  ;;  %3713 = vrot.lane.b32.xlu1 %v3711_v39, %s7484_s12 }
0x13a2   :  { %v3927_v17 = vsel %vm320_vm2, %v3926_v26, %v6712_v15  ;;  %v2907_v15 = vmul.f32 %v6609_v10, %v6277_v24 }
0x13a3   :  { %v3928_v40 = vmul.f32 %v3927_v17, %v6198_v31 }
0x13a5   :  { %3930 = vrot.lane.b32.xlu0 %v3928_v40, %s7485_s20  ;;  %s7487_s20 = sld [smem:[#allocation20_spill]] }
0x13df   :  { %v2920_v42 = vpop.permute.xlu0 %2919 }
0x13e3   :  { %v2903_v48 = vpop.permute.xlu0 %2902 }
0x13e4   :  { %v2905_v51 = vadd.f32 %v2903_v48, %v2890_v49 }
0x13e6   :  { %v2906_v50 = vmul.f32 0.35355338, %v2905_v51 }
0x13f2   :  { %v2805_v54 = vpop.xlane.xlu1 %2804 }
0x13f3   :  { %v2806_v41 = vsub.f32 %v2799_v62, %v2805_v54  ;;  %v2922_v62 = vadd.f32 %v2920_v42, %v2907_v15 }
0x13f5   :  { %v2807_v43 = vmul.f32 1.442695, %v2806_v41 }
0x13f6   :  { %v3909_v44 = vpop.permute.xlu1 %3908 }
0x13f7   :  { %5710 = vpow2.f32 %v2807_v43  ;;  %v3910_v19 = vsel %vm320_vm2, %v3909_v44, %v6740_v21  ;;  %v3120_v61 = vpop.permute.xlu0 %3119 }
0x13f8   :  { %v3911_v47 = vmul.f32 %v3910_v19, %v6198_v31  ;;  %v3122_v2 = vadd.f32 %v3120_v61, %v3107_v0 }
0x13fa   :  { %3913 = vrot.lane.b32.xlu1 %v3911_v47, %s7486_s6 }
0x13fb   :  { %v3103_v63 = vpop.permute.xlu0 %3102 }
0x13fc   :  { %v3105_v53 = vadd.f32 %v3103_v63, %v3090_v1 }
0x13fe   :  { %2814 = vrot.lane.b32.xlu1 %v6609_v10, %s7469_s9  ;;  %v3106_v3 = vmul.f32 0.35355338, %v3105_v53 }
0x13ff   :  { %v3310_v52 = vpop.permute.xlu0 %3309 }
0x1400   :  { %v3311_v4 = vsel %vm320_vm2, %v3310_v52, %v6607_v7 }
0x1401   :  { %v3312_v6 = vmul.f32 %v3311_v4, %v6198_v31 }
0x1402   :  { %2927 = vrot.lane.b32.xlu1 %v2922_v62, %s7463_s28 }
0x1403   :  { %v3333_v5 = vpop.permute.xlu1 %3332 }
0x1404   :  { %v6836_v21 = vpop.eup %5710  ;;  %v3335_v57 = vadd.f32 %v3333_v5, %v3319_v13 }
0x1405   :  { %v2809_v45 = vsel %vm362_vm4, %v6836_v21, 0.0 }
0x1406   :  { %2810 = vadd.xlane.f32.xlu0 %v2809_v45  ;;  %2924 = vrot.lane.b32.xlu1 %v2906_v50, %s7464_s1 }
0x1407   :  { %v3531_v59 = vpop.permute.xlu0 %3530 }
0x1408   :  { %v3533_v33 = vadd.f32 %v3531_v59, %v3518_v29 }
0x140a   :  { %3127 = vrot.lane.b32.xlu1 %v3122_v2, %s7465_s29 }
0x140b   :  { %v3514_v55 = vpop.permute.xlu1 %3513 }
0x140c   :  { %v3516_v16 = vadd.f32 %v3514_v55, %v3501_v46 }
0x140e   :  { %3124 = vrot.lane.b32.xlu1 %v3106_v3, %s7466_s2  ;;  %v3517_v11 = vmul.f32 0.35355338, %v3516_v16 }
0x140f   :  { %v3731_v28 = vpop.permute.xlu0 %3730 }
0x1410   :  { %v3733_v60 = vadd.f32 %v3731_v28, %v3718_v58 }
0x1412   :  { %3314 = vrot.lane.b32.xlu1 %v3312_v6, %s7478_s19 }
0x1413   :  { %v3714_v31 = vpop.permute.xlu1 %3713 }
0x1414   :  { %v3716_v36 = vadd.f32 %v3714_v31, %v3701_v35 }
0x1416   :  { %3337 = vrot.lane.b32.xlu1 %v3335_v57, %s7476_s3  ;;  %v3717_v22 = vmul.f32 0.35355338, %v3716_v36  ;;  %s7489_s3 = sld [smem:[#allocation27_spill]] }
0x1417   :  { %v3931_v9 = vpop.permute.xlu0 %3930 }
0x1418   :  { %v3933_v8 = vadd.f32 %v3931_v9, %v3918_v37 }
0x141a   :  { %3538 = vrot.lane.b32.xlu1 %v3533_v33, %s7479_s23 }
0x141c   :  { %3535 = vrot.lane.b32.xlu0 %v3517_v11, %s7462_s0 }
0x141e   :  { %3738 = vrot.lane.b32.xlu1 %v3733_v60, %s7463_s28  ;;  %s7495_s28 = sld [smem:[#allocation31_spill]] }
0x1422   :  { %3735 = vrot.lane.b32.xlu1 %v3717_v22, %s7464_s1  ;;  %s7488_s1 = sld [smem:[#allocation23_spill]] }
0x1426   :  { %3938 = vrot.lane.b32.xlu1 %v3933_v8, %s7465_s29  ;;  %s5840_s29 = smov [#allocation2]  }
0x146c   :  { %v3914_v24 = vpop.permute.xlu1 %3913 }
0x146d   :  { %v3916_v56 = vadd.f32 %v3914_v24, %v3901_v23 }
0x146f   :  { %v3917_v38 = vmul.f32 0.35355338, %v3916_v56 }
0x1470   :  { %v2815_v12 = vpop.permute.xlu1 %2814 }
0x1471   :  { %3935 = vrot.lane.b32.xlu1 %v3917_v38, %s7466_s2  ;;  %5493 = vmatpush3.msra.mxu1 %v2815_v12 }
0x1472   :  { %5497 = vmatprep.subr.mxu1 %v5836_v14 }
0x1474   :  { %v2928_v20 = vpop.permute.xlu1 %2927 }
0x1478   :  { %v2925_v39 = vpop.permute.xlu1 %2924 }
0x147c   :  { %v3128_v27 = vpop.permute.xlu1 %3127 }
0x147d   :  { %5508 = vmatpush3.xpose.msk.msra.mxu0 %vm362_vm4, %v3128_v27 }
0x147e   :  { %5517 = vmatprep.subr.mxu0 %v5836_v14 }
0x1480   :  { %v3125_v26 = vpop.permute.xlu1 %3124 }
0x1481   :  { %5510 = vmatmul.mubr.msk.f32.vlgmr.msra.gmra.mxu0 %vm362_vm4, %v3125_v26 }
0x1482   :  { %5519 = vmatprep.mubr.msk.f32.mxu0 %vm5838_vm3, %v5836_v14 }
0x1484   :  { %v3315_v17 = vpop.permute.xlu1 %3314 }
0x1485   :  { %v3317_v40 = vadd.f32 %v3315_v17, %v3305_v25 }
0x1487   :  { %v3318_v41 = vmul.f32 0.35355338, %v3317_v40 }
0x1488   :  { %v3338_v54 = vpop.permute.xlu1 %3337 }
0x1489   :  { %5518 = vmatpush3.xpose.msk.msra.mxu0 %vm362_vm4, %v3338_v54 }
0x148a   :  { %5527 = vmatprep.subr.mxu0 %v5836_v14 }
0x148c   :  { %5520 = vmatmul.mubr.msk.f32.vlgmr.msra.gmra.mxu0 %vm362_vm4, %v3318_v41  ;;  %v3539_v42 = vpop.permute.xlu1 %3538 }
0x148d   :  { %5528 = vmatpush3.xpose.msk.msra.mxu0 %vm362_vm4, %v3539_v42  ;;  %5529 = vmatprep.mubr.msk.f32.mxu0 %vm5838_vm3, %v5836_v14 }
0x148e   :  { %5537 = vmatprep.subr.mxu0 %v5836_v14 }
0x148f   :  { %v2811_v43 = vpop.xlane.xlu0 %2810 }
0x1490   :  { %5712 = vrcp.f32 %v2811_v43  ;;  %v3739_v34 = vpop.permute.xlu1 %3738 }
0x1493   :  { %v3536_v44 = vpop.permute.xlu0 %3535 }
0x1494   :  { %5530 = vmatmul.mubr.msk.f32.vlgmr.msra.gmra.mxu0 %vm362_vm4, %v3536_v44  ;;  %v3736_v19 = vpop.permute.xlu1 %3735 }
0x1495   :  { %5538 = vmatpush3.xpose.msk.msra.mxu0 %vm362_vm4, %v3739_v34  ;;  %5539 = vmatprep.mubr.msk.f32.mxu0 %vm5838_vm3, %v5836_v14 }
0x1496   :  { %5547 = vmatprep.subr.mxu0 %v5836_v14 }
0x1498   :  { %5540 = vmatmul.mubr.msk.f32.vlgmr.msra.gmra.mxu0 %vm362_vm4, %v3736_v19  ;;  %v3939_v47 = vpop.permute.xlu1 %3938 }
0x1499   :  { %5548 = vmatpush3.xpose.msk.msra.mxu0 %vm362_vm4, %v3939_v47  ;;  %5549 = vmatprep.mubr.msk.f32.mxu0 %vm5838_vm3, %v5836_v14 }
0x149d   :  { %v5713_v48 = vpop.eup %5712 }
0x149e   :  { %v2813_v15 = vmul.f32 %v5713_v48, %v6836_v21 }
0x14a0   :  { %5495 = vmatmul.mubr.msk.f32.vlgmr.msra.gmra.mxu1 %vm362_vm4, %v2813_v15 }
0x14a1   :  { %5498 = vmatpush3.xpose.msk.msra.mxu1 %vm362_vm4, %v2928_v20  ;;  %5499 = vmatprep.mubr.msk.f32.mxu1 %vm5838_vm3, %v5836_v14 }
0x14a2   :  { %5502 = vmatprep.subr.mxu1 %v5836_v14 }
0x14a4   :  { %5500 = vmatmul.mubr.msk.f32.vlgmr.msra.gmra.mxu1 %vm362_vm4, %v2925_v39 }
0x14a5   :  { %5504 = vmatprep.mubr.msk.f32.mxu1 %vm5838_vm3, %v5836_v14 }
0x14e3   :  { %v3936_v49 = vpop.permute.xlu1 %3935 }
0x14e4   :  { %5550 = vmatmul.mubr.msk.f32.vlgmr.msra.gmra.mxu0 %vm362_vm4, %v3936_v49 }
0x1541   :  { %v3199_v61 = vpop.f32.mrf.mxu0 }
0x1542   :  { %v3203_v62 = vsel %vm362_vm4, %v3199_v61, -inf }
0x1543   :  { %3204 = vmax.xlane.f32.xlu0 %v3203_v62  ;;  %v5511_v51 = vpop.f32.mrf.mxu0 }
0x154c   :  { %v3410_v21 = vpop.f32.mrf.mxu0 }
0x154d   :  { %v3414_v50 = vsel %vm362_vm4, %v3410_v21, -inf }
0x154e   :  { %3415 = vmax.xlane.f32.xlu0 %v3414_v50  ;;  %v5521_v63 = vpop.f32.mrf.mxu0 }
0x1554   :  { %v3610_v45 = vpop.f32.mrf.mxu0 }
0x1555   :  { %v3614_v13 = vsel %vm362_vm4, %v3610_v45, -inf }
0x1556   :  { %v5531_v0 = vpop.f32.mrf.mxu0 }
0x1558   :  { %v3810_v1 = vpop.f32.mrf.mxu0 }
0x1559   :  { %v3814_v2 = vsel %vm362_vm4, %v3810_v1, -inf }
0x155a   :  { %3815 = vmax.xlane.f32.xlu0 %v3814_v2  ;;  %v5541_v53 = vpop.f32.mrf.mxu0 }
0x1560   :  { %v2886_v52 = vpop.f32.mrf.mxu1 }
0x1562   :  { %v5496_v3 = vpop.f32.mrf.mxu1 }
0x1564   :  { %v2999_v4 = vpop.f32.mrf.mxu1 }
0x1565   :  { %v3003_v5 = vsel %vm362_vm4, %v2999_v4, -inf }
0x1566   :  { %3004 = vmax.xlane.f32.xlu1 %v3003_v5  ;;  %v5501_v6 = vpop.f32.mrf.mxu1 }
0x156a   :  { %3615 = vmax.xlane.f32.xlu1 %v3614_v13  ;;  %v5118_v13 = vld [vmem:[%s7470_s22 + $0x38] sm:$0xff] }
0x156b   :  { %5557 = vmatprep.subr.mxu0 %v5118_v13 }
0x156c   :  { %5558 = vmatpush3.msra.mxu0 %v5118_v13 }
0x15a4   :  { %v4010_v55 = vpop.f32.mrf.mxu0 }
0x15a5   :  { %v4014_v57 = vsel %vm362_vm4, %v4010_v55, -inf }
0x15a6   :  { %v5551_v46 = vpop.f32.mrf.mxu0  ;;  %4015 = vmax.xlane.f32.xlu1 %v4014_v57 }
0x15a7   :  { %v5116_v46 = vld [vmem:[%s7470_s22 + $0x28] sm:$0xff] }
0x15cc   :  { %v3205_v59 = vpop.xlane.xlu0 %3204 }
0x15cd   :  { %v3206_v29 = vsub.f32 %v3199_v61, %v3205_v59  ;;  %v5115_v59 = vld [vmem:[%s7470_s22 + $0x20] sm:$0xff] }
0x15cf   :  { %v3207_v16 = vmul.f32 1.442695, %v3206_v29 }
0x15d1   :  { %5714 = vpow2.f32 %v3207_v16 }
0x15d7   :  { %v3416_v33 = vpop.xlane.xlu0 %3415 }
0x15d8   :  { %v3417_v28 = vsub.f32 %v3410_v21, %v3416_v33 }
0x15da   :  { %v3418_v31 = vmul.f32 1.442695, %v3417_v28 }
0x15dc   :  { %5716 = vpow2.f32 %v3418_v31 }
0x15de   :  { %v5715_v11 = vpop.eup %5714 }
0x15df   :  { %v3209_v58 = vsel %vm362_vm4, %v5715_v11, 0.0 }
0x15e0   :  { %3210 = vadd.xlane.f32.xlu1 %v3209_v58 }
0x15e3   :  { %v3816_v35 = vpop.xlane.xlu0 %3815 }
0x15e4   :  { %v3817_v60 = vsub.f32 %v3810_v1, %v3816_v35 }
0x15e6   :  { %v3818_v36 = vmul.f32 1.442695, %v3817_v60 }
0x15e8   :  { %5718 = vpow2.f32 %v3818_v36 }
0x15e9   :  { %v5717_v22 = vpop.eup %5716 }
0x15ea   :  { %v3420_v9 = vsel %vm362_vm4, %v5717_v22, 0.0 }
0x15eb   :  { %3421 = vadd.xlane.f32.xlu0 %v3420_v9 }
0x15ef   :  { %v3005_v37 = vpop.xlane.xlu1 %3004 }
0x15f0   :  { %v3006_v8 = vsub.f32 %v2999_v4, %v3005_v37 }
0x15f2   :  { %v3007_v23 = vmul.f32 1.442695, %v3006_v8 }
0x15f3   :  { %v3616_v24 = vpop.xlane.xlu1 %3615 }
0x15f4   :  { %5720 = vpow2.f32 %v3007_v23  ;;  %v3617_v56 = vsub.f32 %v3610_v45, %v3616_v24 }
0x15f5   :  { %v6914_v38 = vpop.eup %5718 }
0x15f6   :  { %v3618_v12 = vmul.f32 1.442695, %v3617_v56  ;;  %v3820_v20 = vsel %vm362_vm4, %v6914_v38, 0.0 }
0x15f7   :  { %3821 = vadd.xlane.f32.xlu0 %v3820_v20 }
0x15f8   :  { %5722 = vpow2.f32 %v3618_v12 }
0x1601   :  { %v5721_v39 = vpop.eup %5720 }
0x1602   :  { %v3009_v27 = vsel %vm362_vm4, %v5721_v39, 0.0 }
0x1603   :  { %3010 = vadd.xlane.f32.xlu0 %v3009_v27 }
0x1605   :  { %v5723_v26 = vpop.eup %5722 }
0x1606   :  { %v3620_v25 = vsel %vm362_vm4, %v5723_v26, 0.0 }
0x1607   :  { %3621 = vadd.xlane.f32.xlu1 %v3620_v25 }
0x1619   :  { %3014 = vrot.lane.b32.xlu0 %v6609_v10, %s7467_s10 }
0x161d   :  { %3825 = vrot.lane.b32.xlu0 %v6607_v7, %s7467_s10 }
0x1621   :  { %3291 = vrot.lane.b32.xlu0 %v2886_v52, %s7473_s24 }
0x162f   :  { %v4016_v17 = vpop.xlane.xlu1 %4015 }
0x1630   :  { %v4017_v40 = vsub.f32 %v4010_v55, %v4016_v17  ;;  %v5117_v55 = vld [vmem:[%s7470_s22 + $0x30] sm:$0xff] }
0x1631   :  { %5559 = vmatprep.subr.mxu0 %v5117_v55 }
0x1632   :  { %v4018_v54 = vmul.f32 1.442695, %v4017_v40  ;;  %5560 = vmatpush3.msra.mxu0 %v5117_v55 }
0x1633   :  { %5561 = vmatprep.subr.mxu0 %v5116_v46 }
0x1634   :  { %5724 = vpow2.f32 %v4018_v54  ;;  %5562 = vmatpush3.msra.mxu0 %v5116_v46  ;;  %v5149_v46 = vld [vmem:[%s7357_s15 + $0xf0] sm:$0xff] }
0x1635   :  { %5563 = vmatprep.subr.mxu0 %v5115_v59 }
0x1636   :  { %5564 = vmatpush3.msra.mxu0 %v5115_v59  ;;  %v5148_v59 = vld [vmem:[%s7357_s15 + $0xe8] sm:$0xff] }
0x1641   :  { %v5725_v41 = vpop.eup %5724 }
0x1642   :  { %v4020_v42 = vsel %vm362_vm4, %v5725_v41, 0.0 }
0x1643   :  { %4021 = vadd.xlane.f32.xlu1 %v4020_v42 }
0x1654   :  { %3214 = vrot.lane.b32.xlu1 %v6609_v10, %s7468_s7 }
0x1658   :  { %3425 = vrot.lane.b32.xlu1 %v6607_v7, %s7481_s18 }
0x165c   :  { %3625 = vrot.lane.b32.xlu1 %v6607_v7, %s7469_s9 }
0x1660   :  { %4025 = vrot.lane.b32.xlu1 %v6607_v7, %s7468_s7 }
0x1669   :  { %v3211_v10 = vpop.xlane.xlu1 %3210 }
0x1674   :  { %v3422_v43 = vpop.xlane.xlu0 %3421 }
0x1680   :  { %v3822_v34 = vpop.xlane.xlu0 %3821 }
0x168c   :  { %v3011_v44 = vpop.xlane.xlu0 %3010 }
0x168d   :  { %5726 = vrcp.f32 %v3011_v44 }
0x168e   :  { %5728 = vrcp.f32 %v3211_v10 }
0x168f   :  { %5730 = vrcp.f32 %v3422_v43 }
0x1690   :  { %v3015_v19 = vpop.permute.xlu0 %3014  ;;  %v3622_v15 = vpop.xlane.xlu1 %3621 }
0x1691   :  { %5503 = vmatpush3.msra.mxu1 %v3015_v19  ;;  %5732 = vrcp.f32 %v3622_v15 }
0x1692   :  { %5512 = vmatprep.subr.mxu1 %v5836_v14  ;;  %5734 = vrcp.f32 %v3822_v34 }
0x1694   :  { %v3826_v2 = vpop.permute.xlu0 %3825 }
0x1698   :  { %v3292_v36 = vpop.permute.xlu0 %3291 }
0x1699   :  { %v3302_v9 = vsel %vm362_vm4, %v6776_v30, %v3292_v36  ;;  %v5120_v30 = vld [vmem:[%s7474_s27 + $0x1] ss:$0 sm:$0xff]  ;;  %v5138_v36 = vld [vmem:[%s7357_s15 + $0x98] sm:$0xff] }
0x169a   :  { %v5727_v47 = vpop.eup %5726 }
0x169b   :  { %v3013_v48 = vmul.f32 %v5727_v47, %v5721_v39  ;;  %v5729_v49 = vpop.eup %5728 }
0x169c   :  { %v3213_v62 = vmul.f32 %v5729_v49, %v5715_v11  ;;  %v5731_v51 = vpop.eup %5730  ;;  %v5129_v49 = vld [vmem:[%s7355_s13 + $0x30] sm:$0xff] }
0x169d   :  { %5505 = vmatmul.mubr.msk.f32.vlgmr.msra.gmra.mxu1 %vm362_vm4, %v3013_v48  ;;  %v3424_v50 = vmul.f32 %v5731_v51, %v5717_v22 }
0x169e   :  { %5514 = vmatprep.mubr.msk.f32.mxu1 %vm5838_vm3, %v5836_v14  ;;  %v5733_v63 = vpop.eup %5732 }
0x169f   :  { %v3624_v0 = vmul.f32 %v5733_v63, %v5723_v26  ;;  %v5735_v1 = vpop.eup %5734 }
0x16a0   :  { %v3824_v52 = vmul.f32 %v5735_v1, %v6914_v38 }
0x16cc   :  { %v4022_v7 = vpop.xlane.xlu1 %4021 }
0x16cd   :  { %5736 = vrcp.f32 %v4022_v7  ;;  %v5130_v7 = vld [vmem:[%s7355_s13 + $0x38] sm:$0xff] }
0x16d0   :  { %v3215_v61 = vpop.permute.xlu1 %3214 }
0x16d1   :  { %5513 = vmatpush3.msra.mxu1 %v3215_v61  ;;  %v5128_v61 = vld [vmem:[%s7355_s13 + $0x28] sm:$0xff] }
0x16d2   :  { %5515 = vmatmul.mubr.msk.f32.vlgmr.msra.gmra.mxu1 %vm362_vm4, %v3213_v62  ;;  %5522 = vmatprep.subr.mxu1 %v5836_v14  ;;  %v5127_v62 = vld [vmem:[%s7355_s13 + $0x20] sm:$0xff] }
0x16d3   :  { %5524 = vmatprep.mubr.msk.f32.mxu1 %vm5838_vm3, %v5836_v14 }
0x16d4   :  { %v3426_v21 = vpop.permute.xlu1 %3425 }
0x16d5   :  { %5523 = vmatpush3.msra.mxu1 %v3426_v21 }
0x16d6   :  { %5525 = vmatmul.mubr.msk.f32.vlgmr.msra.gmra.mxu1 %vm362_vm4, %v3424_v50  ;;  %5532 = vmatprep.subr.mxu1 %v5836_v14 }
0x16d7   :  { %5534 = vmatprep.mubr.msk.f32.mxu1 %vm5838_vm3, %v5836_v14 }
0x16d8   :  { %v3626_v45 = vpop.permute.xlu1 %3625 }
0x16d9   :  { %5533 = vmatpush3.msra.mxu1 %v3626_v45 }
0x16da   :  { %5535 = vmatmul.mubr.msk.f32.vlgmr.msra.gmra.mxu1 %vm362_vm4, %v3624_v0  ;;  %5542 = vmatprep.subr.mxu1 %v5836_v14  ;;  %v5737_v3 = vpop.eup %5736 }
0x16db   :  { %5543 = vmatpush3.msra.mxu1 %v3826_v2  ;;  %5544 = vmatprep.mubr.msk.f32.mxu1 %vm5838_vm3, %v5836_v14  ;;  %v4024_v4 = vmul.f32 %v5737_v3, %v5725_v41  ;;  %v5125_v2 = vld [vmem:[%s7475_s26 + $0x1] ss:$0 sm:$0xff]  ;;  %s7494_s26 = sld [smem:[#allocation28_spill]] }
0x16dc   :  { %v4026_v53 = vpop.permute.xlu1 %4025  ;;  %5552 = vmatprep.subr.mxu1 %v5836_v14 }
0x16de   :  { %5545 = vmatmul.mubr.msk.f32.vlgmr.msra.gmra.mxu1 %vm362_vm4, %v3824_v52  ;;  %v5126_v52 = vld [vmem:[%s7487_s20 + $0x1] ss:$0 sm:$0xff]  ;;  %s7493_s20 = sld [smem:[#allocation24_spill]] }
0x16df   :  { %5553 = vmatpush3.msra.mxu1 %v4026_v53  ;;  %5554 = vmatprep.mubr.msk.f32.mxu1 %vm5838_vm3, %v5836_v14 }
0x16e0   :  { %5568 = vmatprep.subr.mxu1 %v5130_v7 }
0x16e2   :  { %5555 = vmatmul.mubr.msk.f32.vlgmr.msra.gmra.mxu1 %vm362_vm4, %v4024_v4 }
0x16e3   :  { %5569 = vmatpush3.msra.mxu1 %v5130_v7 }
0x16e4   :  { %5570 = vmatprep.subr.mxu1 %v5129_v49 }
0x16e5   :  { %5571 = vmatpush3.msra.mxu1 %v5129_v49 }
0x16e6   :  { %5572 = vmatprep.subr.mxu1 %v5128_v61 }
0x16e7   :  { %5573 = vmatpush3.msra.mxu1 %v5128_v61 }
0x16e8   :  { %5574 = vmatprep.subr.mxu1 %v5127_v62 }
0x16e9   :  { %5575 = vmatpush3.msra.mxu1 %v5127_v62 }
0x175d   :  { %v3086_v5 = vpop.f32.mrf.mxu1 }
0x175e   :  { %3295 = vrot.lane.b32.xlu1 %v3086_v5, %s7471_s25 }
0x175f   :  { %v5506_v6 = vpop.f32.mrf.mxu1 }
0x1792   :  { %v3286_v57 = vpop.f32.mrf.mxu1 }
0x1793   :  { %3299 = vrot.lane.b32.xlu1 %v3286_v57, %s7472_s11  ;;  %v5150_v57 = vld [vmem:[%s7357_s15 + $0xf8] sm:$0xff] }
0x1794   :  { %v5516_v29 = vpop.f32.mrf.mxu1  ;;  %5579 = vmatprep.subr.mxu0 %v5150_v57 }
0x1795   :  { %v5147_v29 = vld [vmem:[%s7357_s15 + $0xe0] sm:$0xff] }
0x1796   :  { %v3497_v16 = vpop.f32.mrf.mxu1 }
0x1798   :  { %v5526_v33 = vpop.f32.mrf.mxu1 }
0x1799   :  { %v5145_v33 = vld [vmem:[%s7357_s15 + $0xd0] sm:$0xff] }
0x179a   :  { %v3697_v28 = vpop.f32.mrf.mxu1 }
0x179b   :  { %4102 = vrot.lane.b32.xlu0 %v3697_v28, %s7473_s24  ;;  %v5144_v28 = vld [vmem:[%s7357_s15 + $0xc8] sm:$0xff] }
0x179c   :  { %v5536_v31 = vpop.f32.mrf.mxu1 }
0x179d   :  { %v5143_v31 = vld [vmem:[%s7357_s15 + $0xc0] sm:$0xff] }
0x179e   :  { %v3897_v11 = vpop.f32.mrf.mxu1 }
0x179f   :  { %4106 = vrot.lane.b32.xlu0 %v3897_v11, %s7471_s25  ;;  %v5142_v11 = vld [vmem:[%s7357_s15 + $0xb8] sm:$0xff] }
0x17a0   :  { %v5546_v58 = vpop.f32.mrf.mxu1 }
0x17a1   :  { %v5141_v58 = vld [vmem:[%s7357_s15 + $0xb0] sm:$0xff] }
0x17a2   :  { %v4097_v35 = vpop.f32.mrf.mxu1 }
0x17a3   :  { %4110 = vrot.lane.b32.xlu1 %v4097_v35, %s7472_s11  ;;  %v5140_v35 = vld [vmem:[%s7357_s15 + $0xa8] sm:$0xff]  ;;  %s7492_s11 = sld [smem:[#allocation25_spill]] }
0x17a4   :  { %v5556_v60 = vpop.f32.mrf.mxu1 }
0x17a5   :  { %v5139_v60 = vld [vmem:[%s7357_s15 + $0xa0] sm:$0xff] }
0x17d0   :  { %v3296_v22 = vpop.permute.xlu1 %3295 }
0x17d1   :  { %v3303_v37 = vsel %vm1156_vm5, %v3302_v9, %v3296_v22  ;;  %v5137_v22 = vld [vmem:[%s7357_s15 + $0x90] sm:$0xff]  ;;  %v5136_v9 = vld [vmem:[%s7357_s15 + $0x88] sm:$0xff] }
0x1805   :  { %v3300_v8 = vpop.permute.xlu1 %3299 }
0x1806   :  { %v3304_v23 = vsel %vm99_vm0, %v3303_v37, %v3300_v8  ;;  %v5135_v37 = vld [vmem:[%s7357_s15 + $0x80] sm:$0xff] }
0x1807   :  { %5565 = vmatprep.mubr.msk.f32.mxu0 %vm183_vm1, %v3304_v23  ;;  %v5132_v8 = vld [vmem:[%s7356_s14 + $0x1] ss:$0 sm:$0xff]  ;;  %s5007_s14 = sshll.u32 %s5840_s29, 4  ;;  %s5008_s14 = int_to_ptr.vmem [resolvable:$true] %s5007_s14 }
0x1808   :  { %p5776_p1 = scmp.lt.s32.totalorder %s5008_s14, %s5008_s14 }
0x180d   :  { %v4103_v24 = vpop.permute.xlu0 %4102 }
0x180e   :  { %v4113_v38 = vsel %vm362_vm4, %v3497_v16, %v4103_v24  ;;  %v5146_v16 = vld [vmem:[%s7357_s15 + $0xd8] sm:$0xff]  ;;  %s7490_s15 = sld [smem:[#allocation21_spill]] }
0x1811   :  { %v4107_v56 = vpop.permute.xlu0 %4106 }
0x1812   :  { %v4114_v12 = vsel %vm1156_vm5, %v4113_v38, %v4107_v56 }
0x1815   :  { %v4111_v20 = vpop.permute.xlu1 %4110 }
0x1816   :  { %v4115_v39 = vsel %vm99_vm0, %v4114_v12, %v4111_v20 }
0x1817   :  { %5566 = vmatmul.mubr.msk.f32.vlgmr.msra.gmra.mxu0 %vm183_vm1, %v4115_v39 }
0x1818   :  { %5580 = vmatpush3.msra.mxu0 %v5150_v57 }
0x1819   :  { %5581 = vmatprep.subr.mxu0 %v5149_v46 }
0x181a   :  { %5582 = vmatpush3.msra.mxu0 %v5149_v46 }
0x181b   :  { %5583 = vmatprep.subr.mxu0 %v5148_v59 }
0x181c   :  { %5584 = vmatpush3.msra.mxu0 %v5148_v59 }
0x181d   :  { %5585 = vmatprep.subr.mxu0 %v5147_v29 }
0x181e   :  { %5586 = vmatpush3.msra.mxu0 %v5147_v29 }
0x181f   :  { %5587 = vmatprep.subr.mxu0 %v5146_v16 }
0x1820   :  { %5588 = vmatpush3.msra.mxu0 %v5146_v16 }
0x1821   :  { %5589 = vmatprep.subr.mxu0 %v5145_v33 }
0x1822   :  { %5590 = vmatpush3.msra.mxu0 %v5145_v33 }
0x1823   :  { %5591 = vmatprep.subr.mxu0 %v5144_v28 }
0x1824   :  { %5592 = vmatpush3.msra.mxu0 %v5144_v28 }
0x1825   :  { %5593 = vmatprep.subr.mxu0 %v5143_v31 }
0x1826   :  { %5594 = vmatpush3.msra.mxu0 %v5143_v31 }
0x1827   :  { %5595 = vmatprep.subr.mxu0 %v5142_v11 }
0x1828   :  { %5596 = vmatpush3.msra.mxu0 %v5142_v11 }
0x1829   :  { %5597 = vmatprep.subr.mxu0 %v5141_v58 }
0x182a   :  { %5598 = vmatpush3.msra.mxu0 %v5141_v58 }
0x182b   :  { %5599 = vmatprep.subr.mxu0 %v5140_v35 }
0x182c   :  { %5600 = vmatpush3.msra.mxu0 %v5140_v35  ;;  %v5152_v35 = vld [vmem:[%s7358_s16 + $0x1] ss:$0 sm:$0xff] }
0x182d   :  { %5601 = vmatprep.subr.mxu0 %v5139_v60 }
0x182e   :  { %5602 = vmatpush3.msra.mxu0 %v5139_v60 }
0x182f   :  { %5603 = vmatprep.subr.mxu0 %v5138_v36 }
0x1830   :  { %5604 = vmatpush3.msra.mxu0 %v5138_v36 }
0x1831   :  { %5605 = vmatprep.subr.mxu0 %v5137_v22 }
0x1832   :  { %5606 = vmatpush3.msra.mxu0 %v5137_v22 }
0x1833   :  { %5607 = vmatprep.subr.mxu0 %v5136_v9 }
0x1834   :  { %5608 = vmatpush3.msra.mxu0 %v5136_v9 }
0x1835   :  { %5609 = vmatprep.subr.mxu0 %v5135_v37 }
0x1836   :  { %5610 = vmatpush3.msra.mxu0 %v5135_v37 }
0x18d7   :  { %v5567_v27 = vpop.f32.mrf.mxu0 }
0x18d8   :  { %v4207_v26 = vadd.f32 %v5567_v27, %v5120_v30 }
0x18d9   :  { %v4201_v25 = vpop.f32.mrf.mxu0 }
0x18da   :  { %v6986_v17 = vadd.f32 %v4207_v26, %v6568_v32  ;;  %v4202_v40 = vadd.f32 %v5120_v30, %v4201_v25 }
0x18dc   :  { %v6989_v54 = vadd.f32 %v4202_v40, %v6571_v18  ;;  %v4219_v41 = vsel %vm183_vm1, %v6986_v17, 0.0 }
0x18dd   :  { %4220 = vadd.xlane.f32.xlu1 %v4219_v41 }
0x18de   :  { %v4216_v42 = vsel %vm183_vm1, %v6989_v54, 0.0 }
0x18df   :  { %4217 = vadd.xlane.f32.xlu0 %v4216_v42 }
0x1966   :  { %v4221_v43 = vpop.xlane.xlu1 %4220 }
0x1967   :  { %v4223_v34 = vmul.f32 0.03125, %v4221_v43 }
0x1968   :  { %v4218_v44 = vpop.xlane.xlu0 %4217 }
0x1969   :  { %v4222_v19 = vmul.f32 0.03125, %v4218_v44  ;;  %v4225_v47 = vsub.f32 %v6986_v17, %v4223_v34 }
0x196b   :  { %v4224_v32 = vsub.f32 %v6989_v54, %v4222_v19  ;;  %v4227_v10 = vmul.f32 %v4225_v47, %v4225_v47 }
0x196d   :  { %v4226_v48 = vmul.f32 %v4224_v32, %v4224_v32  ;;  %v4231_v15 = vsel %vm183_vm1, %v4227_v10, 0.0 }
0x196f   :  { %v4228_v18 = vsel %vm183_vm1, %v4226_v48, 0.0 }
0x1970   :  { %4229 = vadd.xlane.f32.xlu0 %v4228_v18 }
0x1974   :  { %4232 = vadd.xlane.f32.xlu0 %v4231_v15 }
0x19f9   :  { %v4230_v51 = vpop.xlane.xlu0 %4229 }
0x19fa   :  { %v4234_v21 = vmul.f32 0.03125, %v4230_v51 }
0x19fc   :  { %v4236_v50 = vadd.f32 1e-05, %v4234_v21 }
0x19fd   :  { %v4233_v63 = vpop.xlane.xlu0 %4232 }
0x19fe   :  { %5738 = vrsqrt.f32 %v4236_v50  ;;  %v4235_v45 = vmul.f32 0.03125, %v4233_v63 }
0x1a00   :  { %v4237_v0 = vadd.f32 1e-05, %v4235_v45 }
0x1a02   :  { %5740 = vrsqrt.f32 %v4237_v0 }
0x1a0b   :  { %v5739_v1 = vpop.eup %5738 }
0x1a0c   :  { %v4240_v53 = vmul.f32 %v5739_v1, %v4224_v32 }
0x1a0e   :  { %v4248_v3 = vmul.f32 %v5125_v2, %v4240_v53 }
0x1a0f   :  { %v5741_v4 = vpop.eup %5740 }
0x1a10   :  { %v4241_v5 = vmul.f32 %v5741_v4, %v4225_v47  ;;  %v4256_v6 = vadd.f32 %v5126_v52, %v4248_v3 }
0x1a12   :  { %v4249_v13 = vmul.f32 %v5125_v2, %v4241_v5  ;;  %5576 = vmatprep.mubr.msk.f32.mxu1 %vm183_vm1, %v4256_v6 }
0x1a14   :  { %v4257_v55 = vadd.f32 %v5126_v52, %v4249_v13 }
0x1a16   :  { %5577 = vmatmul.mubr.msk.f32.vlgmr.msra.gmra.mxu1 %vm183_vm1, %v4257_v55 }
0x1a17   :  { %4644 = vmatprep.mubr.f32.mxu1 %v5836_v14 }
0x1ad6   :  { %v5578_v23 = vpop.f32.mrf.mxu1 }
0x1ad7   :  { %v4349_v24 = vadd.f32 %v5578_v23, %v5132_v8 }
0x1ad8   :  { %v4343_v56 = vpop.f32.mrf.mxu1 }
0x1ad9   :  { %v4355_v38 = vmul.f32 0.70710677, %v4349_v24  ;;  %v4344_v12 = vadd.f32 %v5132_v8, %v4343_v56  ;;  %v4353_v31 = vmul.f32 0.5, %v4349_v24 }
0x1adb   :  { %v4357_v20 = vand.u32 2147483647, %v4355_v38  ;;  %v4354_v39 = vmul.f32 0.70710677, %v4344_v12  ;;  %vm4397_vm8 = vcmp.ge.f32.partialorder %v4355_v38, 0.0  ;;  %v4352_v33 = vmul.f32 0.5, %v4344_v12 }
0x1add   :  { %v4359_v30 = vmul.f32 0.3275911, %v4357_v20  ;;  %v4356_v27 = vand.u32 2147483647, %v4354_v39  ;;  %v4385_v41 = vsub.f32 0.0, %v4357_v20  ;;  %vm4396_vm9 = vcmp.ge.f32.partialorder %v4354_v39, 0.0 }
0x1adf   :  { %v4361_v26 = vadd.f32 1.0, %v4359_v30  ;;  %v4358_v25 = vmul.f32 0.3275911, %v4356_v27  ;;  %v4384_v42 = vsub.f32 0.0, %v4356_v27  ;;  %v4387_v43 = vmul.f32 %v4385_v41, %v4357_v20  ;;  %v4916_v41 = vld [vmem:[%s7489_s3 + $0x18] sm:$0xff] }
0x1ae0   :  { %5614 = vmatprep.subr.mxu0 %v4916_v41 }
0x1ae1   :  { %5742 = vrcp.f32 %v4361_v26  ;;  %v4360_v40 = vadd.f32 1.0, %v4358_v25  ;;  %v4386_v44 = vmul.f32 %v4384_v42, %v4356_v27  ;;  %v4390_v47 = vmul.f32 1.442695, %v4387_v43  ;;  %v4559_v42 = vld [vmem:[%s7488_s1 + $0x28] sm:$0xff]  ;;  %v4558_v43 = vld [vmem:[%s7488_s1 + $0x20] sm:$0xff] }
0x1ae3   :  { %5744 = vrcp.f32 %v4360_v40  ;;  %v4388_v18 = vmul.f32 1.442695, %v4386_v44  ;;  %v4560_v40 = vld [vmem:[%s7488_s1 + $0x30] sm:$0xff]  ;;  %v4557_v44 = vld [vmem:[%s7488_s1 + $0x18] sm:$0xff] }
0x1ae4   :  { %5746 = vpow2.f32 %v4390_v47  ;;  %v4556_v47 = vld [vmem:[%s7488_s1 + $0x10] sm:$0xff] }
0x1ae5   :  { %5748 = vpow2.f32 %v4388_v18  ;;  %v4554_v18 = vld [vmem:[%s7488_s1] sm:$0xff] }
0x1aee   :  { %v5743_v34 = vpop.eup %5742 }
0x1aef   :  { %v4367_v19 = vmul.f32 1.0614054, %v5743_v34 }
0x1af0   :  { %v5745_v32 = vpop.eup %5744 }
0x1af1   :  { %v4369_v48 = vadd.f32 -1.4531521, %v4367_v19  ;;  %v4366_v10 = vmul.f32 1.0614054, %v5745_v32  ;;  %v5747_v53 = vpop.eup %5746  ;;  %v4914_v19 = vld [vmem:[%s7489_s3 + $0x8] sm:$0xff] }
0x1af2   :  { %v5749_v5 = vpop.eup %5748 }
0x1af3   :  { %v4371_v15 = vmul.f32 %v5743_v34, %v4369_v48  ;;  %v4368_v7 = vadd.f32 -1.4531521, %v4366_v10  ;;  %v4913_v48 = vld [vmem:[%s7489_s3] sm:$0xff] }
0x1af5   :  { %v4373_v49 = vadd.f32 1.4214138, %v4371_v15  ;;  %v4370_v61 = vmul.f32 %v5745_v32, %v4368_v7 }
0x1af7   :  { %v4375_v62 = vmul.f32 %v5743_v34, %v4373_v49  ;;  %v4372_v51 = vadd.f32 1.4214138, %v4370_v61 }
0x1af9   :  { %v4377_v21 = vadd.f32 -0.28449672, %v4375_v62  ;;  %v4374_v50 = vmul.f32 %v5745_v32, %v4372_v51 }
0x1afb   :  { %v4379_v63 = vmul.f32 %v5743_v34, %v4377_v21  ;;  %v4376_v45 = vadd.f32 -0.28449672, %v4374_v50  ;;  %v5153_v21 = vld [vmem:[%s7490_s15] ss:$0 sm:$0xff]  ;;  %s5771_s15 = scalar_lea.vmem %s5008_s14, 256 }
0x1afc   :  { %p5772_p0 = scmp.ne.s32.totalorder %s5008_s14, %s5771_s15  ;;  %p5777_p2 = scmp.lt.s32.totalorder %s5771_s15, %s5771_s15 }
0x1afd   :  { %v4381_v0 = vadd.f32 0.2548296, %v4379_v63  ;;  %v4378_v1 = vmul.f32 %v5745_v32, %v4376_v45 }
0x1afe   :  { %p5778_p3 = por %p5777_p2, %p5776_p1 }
0x1aff   :  { %v4383_v2 = vmul.f32 %v5743_v34, %v4381_v0  ;;  %v4380_v52 = vadd.f32 0.2548296, %v4378_v1  ;;  %v4915_v34 = vld [vmem:[%s7489_s3 + $0x10] sm:$0xff] }
0x1b00   :  { %p5779_p4 = pnand %p5778_p3, %p5772_p0 }
0x1b01   :  { %v4393_v3 = vmul.f32 %v5747_v53, %v4383_v2  ;;  %v4382_v4 = vmul.f32 %v5745_v32, %v4380_v52  ;;  %v4555_v32 = vld [vmem:[%s7488_s1 + $0x8] sm:$0xff] }
0x1b03   :  { %v4395_v6 = vsub.f32 1.0, %v4393_v3  ;;  %v4392_v13 = vmul.f32 %v5749_v5, %v4382_v4  ;;  %v4796_v3 = vld [vmem:[%s7492_s11 + $0xf8] sm:$0xff]  ;;  %v4795_v4 = vld [vmem:[%s7492_s11 + $0xf0] sm:$0xff]  ;;  %v4794_v5 = vld [vmem:[%s7492_s11 + $0xe8] sm:$0xff] }
0x1b05   :  { %v4399_v55 = vsub.f32 0.0, %v4395_v6  ;;  %v4394_v57 = vsub.f32 1.0, %v4392_v13  ;;  %v4791_v13 = vld [vmem:[%s7492_s11 + $0xd0] sm:$0xff] }
0x1b07   :  { %v4401_v46 = vsel %vm4397_vm8, %v4395_v6, %v4399_v55  ;;  %v4398_v59 = vsub.f32 0.0, %v4394_v57  ;;  %v4792_v6 = vld [vmem:[%s7492_s11 + $0xd8] sm:$0xff]  ;;  %v4790_v55 = vld [vmem:[%s7492_s11 + $0xc8] sm:$0xff] }
0x1b08   :  { %v4403_v29 = vadd.f32 1.0, %v4401_v46  ;;  %v4788_v46 = vld [vmem:[%s7492_s11 + $0xb8] sm:$0xff] }
0x1b09   :  { %v4400_v16 = vsel %vm4396_vm9, %v4394_v57, %v4398_v59  ;;  %v4789_v57 = vld [vmem:[%s7492_s11 + $0xc0] sm:$0xff]  ;;  %v4787_v59 = vld [vmem:[%s7492_s11 + $0xb0] sm:$0xff] }
0x1b0a   :  { %v4402_v28 = vadd.f32 1.0, %v4400_v16  ;;  %v4405_v58 = vmul.f32 %v4403_v29, %v4353_v31  ;;  %v4786_v29 = vld [vmem:[%s7492_s11 + $0xa8] sm:$0xff]  ;;  %v4785_v16 = vld [vmem:[%s7492_s11 + $0xa0] sm:$0xff] }
0x1b0b   :  { %v4782_v31 = vld [vmem:[%s7492_s11 + $0x88] sm:$0xff] }
0x1b0c   :  { %v4404_v11 = vmul.f32 %v4402_v28, %v4352_v33  ;;  %v4784_v33 = vld [vmem:[%s7492_s11 + $0x98] sm:$0xff]  ;;  %v4783_v28 = vld [vmem:[%s7492_s11 + $0x90] sm:$0xff] }
0x1b0e   :  { %5611 = vmatprep.mubr.f32.mxu0 %v4404_v11  ;;  %v4781_v11 = vld [vmem:[%s7492_s11 + $0x80] sm:$0xff] }
0x1b0f   :  { %5612 = vmatmul.mubr.f32.vlgmr.msra.gmra.mxu0 %v4405_v58  ;;  %v4780_v58 = vld [vmem:[%s7492_s11 + $0x78] sm:$0xff] }
0x1b10   :  { %5615 = vmatpush3.msra.mxu0 %v4916_v41  ;;  %v4806_v41 = vld [vmem:[%s7492_s11 + $0x148] sm:$0xff] }
0x1b11   :  { %5616 = vmatprep.subr.mxu0 %v4915_v34 }
0x1b12   :  { %5617 = vmatpush3.msra.mxu0 %v4915_v34  ;;  %v4803_v34 = vld [vmem:[%s7492_s11 + $0x130] sm:$0xff] }
0x1b13   :  { %5618 = vmatprep.subr.mxu0 %v4914_v19 }
0x1b14   :  { %5619 = vmatpush3.msra.mxu0 %v4914_v19  ;;  %v4801_v19 = vld [vmem:[%s7492_s11 + $0x120] sm:$0xff] }
0x1b15   :  { %5620 = vmatprep.subr.mxu0 %v4913_v48 }
0x1b16   :  { %5621 = vmatpush3.msra.mxu0 %v4913_v48  ;;  %v4798_v48 = vld [vmem:[%s7492_s11 + $0x108] sm:$0xff] }
0x1bcf   :  { %v5613_v60 = vpop.f32.mrf.mxu0 }
0x1bd0   :  { %v4503_v36 = vadd.f32 %v5613_v60, %v5152_v35  ;;  %v4778_v60 = vld [vmem:[%s7492_s11 + $0x68] sm:$0xff] }
0x1bd1   :  { %v4497_v22 = vpop.f32.mrf.mxu0 }
0x1bd2   :  { %v4507_v9 = vadd.f32 %v4503_v36, %v6986_v17  ;;  %v4498_v37 = vadd.f32 %v5152_v35, %v4497_v22  ;;  %v4779_v35 = vld [vmem:[%s7492_s11 + $0x70] sm:$0xff]  ;;  %v4777_v36 = vld [vmem:[%s7492_s11 + $0x60] sm:$0xff]  ;;  %v4776_v22 = vld [vmem:[%s7492_s11 + $0x58] sm:$0xff] }
0x1bd4   :  { %v4506_v8 = vadd.f32 %v4498_v37, %v6989_v54  ;;  %v4513_v23 = vsel %vm183_vm1, %v4507_v9, 0.0  ;;  %v4561_v54 = vld [vmem:[%s7488_s1 + $0x38] sm:$0xff]  ;;  %s7491_s1 = sld [smem:[#allocation22_spill]]  ;;  %v4774_v37 = vld [vmem:[%s7492_s11 + $0x48] sm:$0xff] }
0x1bd5   :  { %4514 = vadd.xlane.f32.xlu1 %v4513_v23  ;;  %4604 = vmatprep.subr.mxu1 %v4561_v54  ;;  %v4772_v23 = vld [vmem:[%s7492_s11 + $0x38] sm:$0xff] }
0x1bd6   :  { %v4510_v24 = vsel %vm183_vm1, %v4506_v8, 0.0  ;;  %4605 = vmatpush1.msra.mxu1 %v4560_v40  ;;  %v4808_v54 = vld [vmem:[%s7492_s11 + $0x158] sm:$0xff]  ;;  %v4807_v40 = vld [vmem:[%s7492_s11 + $0x150] sm:$0xff] }
0x1bd7   :  { %4511 = vadd.xlane.f32.xlu0 %v4510_v24  ;;  %4606 = vmatprep.subr.mxu1 %v4559_v42  ;;  %v4771_v24 = vld [vmem:[%s7492_s11 + $0x30] sm:$0xff]  ;;  %v4805_v42 = vld [vmem:[%s7492_s11 + $0x140] sm:$0xff] }
0x1bd8   :  { %4607 = vmatpush1.msra.mxu1 %v4558_v43  ;;  %v4804_v43 = vld [vmem:[%s7492_s11 + $0x138] sm:$0xff] }
0x1bd9   :  { %4608 = vmatprep.subr.mxu1 %v4557_v44  ;;  %v4802_v44 = vld [vmem:[%s7492_s11 + $0x128] sm:$0xff] }
0x1bda   :  { %4609 = vmatpush1.msra.mxu1 %v4556_v47  ;;  %v5154_v45 = vld [vmem:[%s7491_s1] ss:$0 sm:$0xff]  ;;  %v4800_v47 = vld [vmem:[%s7492_s11 + $0x118] sm:$0xff] }
0x1bdb   :  { %4610 = vmatprep.subr.mxu1 %v4555_v32  ;;  %v4799_v32 = vld [vmem:[%s7492_s11 + $0x110] sm:$0xff] }
0x1bdc   :  { %4611 = vmatpush1.msra.mxu1 %v4554_v18  ;;  %v4797_v18 = vld [vmem:[%s7492_s11 + $0x100] sm:$0xff] }
0x1bdd   :  { %4832 = vmatprep.subr.mxu1 %v4796_v3 }
0x1c5e   :  { %v4515_v56 = vpop.xlane.xlu1 %4514 }
0x1c5f   :  { %v4517_v38 = vmul.f32 0.03125, %v4515_v56  ;;  %v4770_v56 = vld [vmem:[%s7492_s11 + $0x28] sm:$0xff] }
0x1c60   :  { %v4512_v12 = vpop.xlane.xlu0 %4511 }
0x1c61   :  { %v4519_v20 = vsub.f32 %v4507_v9, %v4517_v38  ;;  %v4516_v39 = vmul.f32 0.03125, %v4512_v12  ;;  %v4775_v9 = vld [vmem:[%s7492_s11 + $0x50] sm:$0xff]  ;;  %v4769_v38 = vld [vmem:[%s7492_s11 + $0x20] sm:$0xff]  ;;  %v4768_v12 = vld [vmem:[%s7492_s11 + $0x18] sm:$0xff] }
0x1c63   :  { %v4518_v30 = vsub.f32 %v4506_v8, %v4516_v39  ;;  %v4521_v27 = vmul.f32 %v4519_v20, %v4519_v20  ;;  %v4773_v8 = vld [vmem:[%s7492_s11 + $0x40] sm:$0xff]  ;;  %v4766_v39 = vld [vmem:[%s7492_s11 + $0x8] sm:$0xff] }
0x1c65   :  { %v4525_v26 = vsel %vm183_vm1, %v4521_v27, 0.0  ;;  %v4520_v25 = vmul.f32 %v4518_v30, %v4518_v30  ;;  %v4812_v27 = vld [vmem:[%s7492_s11 + $0x178] sm:$0xff] }
0x1c66   :  { %4526 = vadd.xlane.f32.xlu1 %v4525_v26  ;;  %v4811_v26 = vld [vmem:[%s7492_s11 + $0x170] sm:$0xff] }
0x1c67   :  { %v4522_v17 = vsel %vm183_vm1, %v4520_v25, 0.0  ;;  %v4810_v25 = vld [vmem:[%s7492_s11 + $0x168] sm:$0xff] }
0x1c68   :  { %4523 = vadd.xlane.f32.xlu0 %v4522_v17  ;;  %v4809_v17 = vld [vmem:[%s7492_s11 + $0x160] sm:$0xff] }
0x1cef   :  { %v4527_v10 = vpop.xlane.xlu1 %4526 }
0x1cf0   :  { %v4529_v15 = vmul.f32 0.03125, %v4527_v10  ;;  %v4564_v10 = vlaneseq }
0x1cf1   :  { %v4524_v7 = vpop.xlane.xlu0 %4523 }
0x1cf2   :  { %v4531_v49 = vadd.f32 1e-05, %v4529_v15  ;;  %v4528_v61 = vmul.f32 0.03125, %v4524_v7  ;;  %v7273_v15 = vshrl.u32 %v4564_v10, 7 }
0x1cf4   :  { %5750 = vrsqrt.f32 %v4531_v49  ;;  %v4530_v62 = vadd.f32 1e-05, %v4528_v61  ;;  %v4566_v7 = vsub.s32 0, %v7273_v15  ;;  %v4562_v49 = vld [vmem:[%s7493_s20] sm:$0x3]  ;;  %v4570_v61 = vsub.s32 1, %v7273_v15 }
0x1cf6   :  { %5752 = vrsqrt.f32 %v4530_v62  ;;  %v4567_v62 = vrot.slane %v4562_v49, %v4566_v7 }
0x1d01   :  { %v5751_v51 = vpop.eup %5750 }
0x1d02   :  { %v4535_v50 = vmul.f32 %v5751_v51, %v4519_v20  ;;  %v4767_v20 = vld [vmem:[%s7492_s11 + $0x10] sm:$0xff]  ;;  %v5159_v51 = vld [vmem:[%s7494_s26] ss:$0 sm:$0xff] }
0x1d03   :  { %v5753_v63 = vpop.eup %5752 }
0x1d04   :  { %v4534_v0 = vmul.f32 %v5753_v63, %v4518_v30  ;;  %v4543_v1 = vmul.f32 %v5153_v21, %v4535_v50  ;;  %v4765_v30 = vld [vmem:[%s7492_s11] sm:$0xff] }
0x1d06   :  { %v4542_v2 = vmul.f32 %v5153_v21, %v4534_v0  ;;  %v4551_v53 = vadd.f32 %v5154_v45, %v4543_v1  ;;  %v4571_v21 = vrot.slane %v4562_v49, %v4570_v61 }
0x1d08   :  { %v4550_v52 = vadd.f32 %v5154_v45, %v4542_v2  ;;  %4553 = vst.msk [vmem:[#allocation2 + $0x8] sm:$0xff] %vm183_vm1, %v4551_v53 }
0x1d0a   :  { %5155 = vmatmul.mubr.msk.f32.vlgmr.msra.gmra.mxu1 %vm183_vm1, %v4550_v52  ;;  %4552 = vst.msk [vmem:[#allocation2] sm:$0xff] %vm183_vm1, %v4550_v52  ;;  %5622 = vmatprep.mubr.msk.f32.mxu0 %vm183_vm1, %v4550_v52 }
0x1d0b   :  { %5623 = vmatmul.mubr.msk.f32.vlgmr.msra.gmra.mxu0 %vm183_vm1, %v4551_v53  ;;  %4650 = vmatprep.mubr.f32.mxu1 %v5836_v14  ;;  %v4793_v14 = vld [vmem:[%s7492_s11 + $0xe0] sm:$0xff] }
0x1d0c   :  { %4833 = vmatpush1.msra.mxu1 %v4795_v4 }
0x1d0d   :  { %4834 = vmatprep.subr.mxu1 %v4794_v5 }
0x1d0e   :  { %5156 = vmatmul.mubr.msk.f32.gmra.mxu1 %vm183_vm1, %v4551_v53 }
0x1d0f   :  { %4835 = vmatpush1.msra.mxu1 %v4793_v14 }
0x1d10   :  { %4836 = vmatprep.subr.mxu1 %v4792_v6 }
0x1d11   :  { %4837 = vmatpush1.msra.mxu1 %v4791_v13 }
0x1d12   :  { %4838 = vmatprep.subr.mxu1 %v4790_v55 }
0x1d13   :  { %4839 = vmatpush1.msra.mxu1 %v4789_v57 }
0x1d14   :  { %4840 = vmatprep.subr.mxu1 %v4788_v46 }
0x1d15   :  { %4841 = vmatpush1.msra.mxu1 %v4787_v59 }
0x1d16   :  { %4842 = vmatprep.subr.mxu1 %v4786_v29 }
0x1d17   :  { %4843 = vmatpush1.msra.mxu1 %v4785_v16 }
0x1d18   :  { %4844 = vmatprep.subr.mxu1 %v4784_v33 }
0x1d19   :  { %4845 = vmatpush1.msra.mxu1 %v4783_v28 }
0x1d1a   :  { %4846 = vmatprep.subr.mxu1 %v4782_v31 }
0x1d1b   :  { %4847 = vmatpush1.msra.mxu1 %v4781_v11 }
0x1d1c   :  { %4848 = vmatprep.subr.mxu1 %v4780_v58 }
0x1d1d   :  { %4849 = vmatpush1.msra.mxu1 %v4779_v35 }
0x1d1e   :  { %4850 = vmatprep.subr.mxu1 %v4778_v60 }
0x1d1f   :  { %4851 = vmatpush1.msra.mxu1 %v4777_v36 }
0x1d20   :  { %4852 = vmatprep.subr.mxu1 %v4776_v22 }
0x1d21   :  { %4853 = vmatpush1.msra.mxu1 %v4775_v9 }
0x1d22   :  { %4854 = vmatprep.subr.mxu1 %v4774_v37 }
0x1d23   :  { %4855 = vmatpush1.msra.mxu1 %v4773_v8 }
0x1d24   :  { %4856 = vmatprep.subr.mxu1 %v4772_v23 }
0x1d25   :  { %4857 = vmatpush1.msra.mxu1 %v4771_v24 }
0x1d26   :  { %4858 = vmatprep.subr.mxu1 %v4770_v56 }
0x1d27   :  { %4859 = vmatpush1.msra.mxu1 %v4769_v38 }
0x1d28   :  { %4860 = vmatprep.subr.mxu1 %v4768_v12 }
0x1d29   :  { %4861 = vmatpush1.msra.mxu1 %v4767_v20 }
0x1d2a   :  { %4862 = vmatprep.subr.mxu1 %v4766_v39 }
0x1d2b   :  { %4863 = vmatpush1.msra.mxu1 %v4765_v30 }
0x1d2c   :  { %4880 = vmatprep.subr.mxu1 %v4812_v27 }
0x1d2d   :  { %4881 = vmatpush2.msra.mxu1 %v4811_v26 }
0x1d2e   :  { %4882 = vmatprep.subr.mxu1 %v4810_v25 }
0x1d2f   :  { %4883 = vmatpush2.msra.mxu1 %v4809_v17 }
0x1d30   :  { %4884 = vmatprep.subr.mxu1 %v4808_v54 }
0x1d31   :  { %4885 = vmatpush2.msra.mxu1 %v4807_v40 }
0x1d32   :  { %4886 = vmatprep.subr.mxu1 %v4806_v41 }
0x1d33   :  { %4887 = vmatpush2.msra.mxu1 %v4805_v42 }
0x1d34   :  { %4888 = vmatprep.subr.mxu1 %v4804_v43 }
0x1d35   :  { %4889 = vmatpush2.msra.mxu1 %v4803_v34 }
0x1d36   :  { %4890 = vmatprep.subr.mxu1 %v4802_v44 }
0x1d37   :  { %4891 = vmatpush2.msra.mxu1 %v4801_v19 }
0x1d38   :  { %4892 = vmatprep.subr.mxu1 %v4800_v47 }
0x1d39   :  { %4893 = vmatpush2.msra.mxu1 %v4799_v32 }
0x1d3a   :  { %4894 = vmatprep.subr.mxu1 %v4798_v48 }
0x1d3b   :  { %4895 = vmatpush2.msra.mxu1 %v4797_v18 }
0x1dca   :  { %v4646_v50 = vpop.f32.mrf.mxu1 }
0x1dcb   :  { %v7287_v63 = vadd.f32 %v4646_v50, %v4567_v62  ;;  %v5624_v45 = vpop.f32.mrf.mxu0 }
0x1dcc   :  { %v4996_v0 = vadd.f32 %v5624_v45, %v5159_v51  ;;  %v4648_v1 = vpop.f32.mrf.mxu1 }
0x1dcd   :  { %v7290_v2 = vmul.f32 0.70710677, %v7287_v63  ;;  %v7292_v53 = vadd.f32 %v4648_v1, %v4571_v21  ;;  %v4990_v52 = vpop.f32.mrf.mxu0 }
0x1dce   :  { %5001 = vst.msk [vmem:[%s7495_s28 + $0x8] sm:$0xff] %vm4999_vm10, %v4996_v0  ;;  %v4991_v3 = vadd.f32 %v5159_v51, %v4990_v52  ;;  %v4652_v4 = vpop.f32.mrf.mxu1 }
0x1dcf   :  { %v4665_v5 = vand.u32 2147483647, %v7290_v2  ;;  %v7299_v14 = vmul.f32 0.70710677, %v7292_v53  ;;  %v7304_v6 = vadd.f32 %v4652_v4, %v4567_v62  ;;  %vm4745_vm11 = vcmp.ge.f32.partialorder %v7290_v2, 0.0 }
0x1dd0   :  { %5000 = vst.msk [vmem:[%s7495_s28] sm:$0xff] %vm4999_vm10, %v4991_v3  ;;  %v4654_v13 = vpop.f32.mrf.mxu1  ;;  %v4657_v2 = vmul.f32 0.5, %v7287_v63 }
0x1dd1   :  { %v4669_v55 = vmul.f32 0.3275911, %v4665_v5  ;;  %v4666_v57 = vand.u32 2147483647, %v7299_v14  ;;  %v7308_v46 = vmul.f32 0.70710677, %v7304_v6  ;;  %v7310_v59 = vadd.f32 %v4654_v13, %v4571_v21 }
0x1dd2   :  { %v4721_v22 = vsub.f32 0.0, %v4665_v5  ;;  %vm4746_vm12 = vcmp.ge.f32.partialorder %v7299_v14, 0.0 }
0x1dd3   :  { %v4673_v29 = vadd.f32 1.0, %v4669_v55  ;;  %v4670_v16 = vmul.f32 0.3275911, %v4666_v57  ;;  %v4667_v33 = vand.u32 2147483647, %v7308_v46  ;;  %v4722_v9 = vsub.f32 0.0, %v4666_v57 }
0x1dd4   :  { %v7314_v28 = vmul.f32 0.70710677, %v7310_v59  ;;  %v4725_v37 = vmul.f32 %v4721_v22, %v4665_v5  ;;  %vm4747_vm13 = vcmp.ge.f32.partialorder %v7308_v46, 0.0 }
0x1dd5   :  { %5754 = vrcp.f32 %v4673_v29  ;;  %v4674_v31 = vadd.f32 1.0, %v4670_v16  ;;  %v4671_v11 = vmul.f32 0.3275911, %v4667_v33  ;;  %v4723_v8 = vsub.f32 0.0, %v4667_v33 }
0x1dd6   :  { %v4668_v58 = vand.u32 2147483647, %v7314_v28  ;;  %v4726_v24 = vmul.f32 %v4722_v9, %v4666_v57  ;;  %v4729_v38 = vmul.f32 1.442695, %v4725_v37  ;;  %vm4748_vm15 = vcmp.ge.f32.partialorder %v7314_v28, 0.0 }
0x1dd7   :  { %5756 = vrcp.f32 %v4674_v31  ;;  %v4675_v35 = vadd.f32 1.0, %v4671_v11  ;;  %v4727_v20 = vmul.f32 %v4723_v8, %v4667_v33 }
0x1dd8   :  { %v4672_v60 = vmul.f32 0.3275911, %v4668_v58  ;;  %v4724_v12 = vsub.f32 0.0, %v4668_v58  ;;  %v4731_v26 = vmul.f32 1.442695, %v4726_v24 }
0x1dd9   :  { %5758 = vrcp.f32 %v4675_v35  ;;  %v4733_v41 = vmul.f32 1.442695, %v4727_v20 }
0x1dda   :  { %v4676_v36 = vadd.f32 1.0, %v4672_v60  ;;  %v4728_v54 = vmul.f32 %v4724_v12, %v4668_v58 }
0x1ddc   :  { %5760 = vrcp.f32 %v4676_v36  ;;  %v4735_v48 = vmul.f32 1.442695, %v4728_v54 }
0x1ddd   :  { %5762 = vpow2.f32 %v4729_v38 }
0x1dde   :  { %5764 = vpow2.f32 %v4731_v26 }
0x1ddf   :  { %5766 = vpow2.f32 %v4733_v41 }
0x1de0   :  { %5768 = vpow2.f32 %v4735_v48 }
0x1de2   :  { %v5755_v23 = vpop.eup %5754 }
0x1de3   :  { %v4685_v56 = vmul.f32 1.0614054, %v5755_v23 }
0x1de4   :  { %v5757_v39 = vpop.eup %5756 }
0x1de5   :  { %v4689_v30 = vadd.f32 -1.4531521, %v4685_v56  ;;  %v4686_v27 = vmul.f32 1.0614054, %v5757_v39 }
0x1de6   :  { %v5759_v25 = vpop.eup %5758 }
0x1de7   :  { %v4693_v17 = vmul.f32 %v5755_v23, %v4689_v30  ;;  %v4690_v40 = vadd.f32 -1.4531521, %v4686_v27  ;;  %v4687_v42 = vmul.f32 1.0614054, %v5759_v25 }
0x1de9   :  { %v4697_v43 = vadd.f32 1.4214138, %v4693_v17  ;;  %v5761_v34 = vpop.eup %5760  ;;  %v4694_v44 = vmul.f32 %v5757_v39, %v4690_v40  ;;  %v4691_v19 = vadd.f32 -1.4531521, %v4687_v42 }
0x1dea   :  { %v4688_v32 = vmul.f32 1.0614054, %v5761_v34  ;;  %v5763_v57 = vpop.eup %5762 }
0x1deb   :  { %v4701_v47 = vmul.f32 %v5755_v23, %v4697_v43  ;;  %v4698_v18 = vadd.f32 1.4214138, %v4694_v44  ;;  %v4695_v10 = vmul.f32 %v5759_v25, %v4691_v19  ;;  %v5765_v35 = vpop.eup %5764 }
0x1dec   :  { %v4692_v62 = vadd.f32 -1.4531521, %v4688_v32  ;;  %v5767_v37 = vpop.eup %5766 }
0x1ded   :  { %v4705_v49 = vadd.f32 -0.28449672, %v4701_v47  ;;  %v4702_v51 = vmul.f32 %v5757_v39, %v4698_v18  ;;  %v4699_v21 = vadd.f32 1.4214138, %v4695_v10  ;;  %v5769_v20 = vpop.eup %5768  ;;  %v4660_v47 = vmul.f32 0.5, %v7310_v59 }
0x1dee   :  { %v4696_v45 = vmul.f32 %v5761_v34, %v4692_v62 }
0x1def   :  { %v4709_v50 = vmul.f32 %v5755_v23, %v4705_v49  ;;  %v4706_v0 = vadd.f32 -0.28449672, %v4702_v51  ;;  %v4703_v1 = vmul.f32 %v5759_v25, %v4699_v21 }
0x1df0   :  { %v4700_v3 = vadd.f32 1.4214138, %v4696_v45 }
0x1df1   :  { %v4713_v52 = vadd.f32 0.2548296, %v4709_v50  ;;  %v4710_v4 = vmul.f32 %v5757_v39, %v4706_v0  ;;  %v4707_v5 = vadd.f32 -0.28449672, %v4703_v1 }
0x1df2   :  { %v4704_v55 = vmul.f32 %v5761_v34, %v4700_v3 }
0x1df3   :  { %v4717_v13 = vmul.f32 %v5755_v23, %v4713_v52  ;;  %v4714_v29 = vadd.f32 0.2548296, %v4710_v4  ;;  %v4711_v16 = vmul.f32 %v5759_v25, %v4707_v5 }
0x1df4   :  { %v4708_v31 = vadd.f32 -0.28449672, %v4704_v55 }
0x1df5   :  { %v4737_v33 = vmul.f32 %v5763_v57, %v4717_v13  ;;  %v4718_v11 = vmul.f32 %v5757_v39, %v4714_v29  ;;  %v4715_v58 = vadd.f32 0.2548296, %v4711_v16 }
0x1df6   :  { %v4712_v36 = vmul.f32 %v5761_v34, %v4708_v31 }
0x1df7   :  { %v4741_v60 = vsub.f32 1.0, %v4737_v33  ;;  %v4738_v22 = vmul.f32 %v5765_v35, %v4718_v11  ;;  %v4719_v9 = vmul.f32 %v5759_v25, %v4715_v58  ;;  %v4658_v25 = vmul.f32 0.5, %v7292_v53 }
0x1df8   :  { %v4716_v24 = vadd.f32 0.2548296, %v4712_v36  ;;  %v4659_v53 = vmul.f32 0.5, %v7304_v6 }
0x1df9   :  { %v4749_v8 = vsub.f32 0.0, %v4741_v60  ;;  %v4742_v56 = vsub.f32 1.0, %v4738_v22  ;;  %v4739_v23 = vmul.f32 %v5767_v37, %v4719_v9 }
0x1dfa   :  { %v4720_v12 = vmul.f32 %v5761_v34, %v4716_v24 }
0x1dfb   :  { %v4753_v38 = vsel %vm4745_vm11, %v4741_v60, %v4749_v8  ;;  %v4750_v30 = vsub.f32 0.0, %v4742_v56  ;;  %v4743_v27 = vsub.f32 1.0, %v4739_v23 }
0x1dfc   :  { %v4740_v39 = vmul.f32 %v5769_v20, %v4720_v12  ;;  %v4757_v26 = vadd.f32 1.0, %v4753_v38 }
0x1dfd   :  { %v4754_v17 = vsel %vm4746_vm12, %v4742_v56, %v4750_v30  ;;  %v4751_v54 = vsub.f32 0.0, %v4743_v27 }
0x1dfe   :  { %v4758_v40 = vadd.f32 1.0, %v4754_v17  ;;  %v4744_v41 = vsub.f32 1.0, %v4740_v39  ;;  %v4761_v44 = vmul.f32 %v4757_v26, %v4657_v2 }
0x1dff   :  { %v4755_v42 = vsel %vm4747_vm13, %v4743_v27, %v4751_v54 }
0x1e00   :  { %v4762_v43 = vmul.f32 %v4758_v40, %v4658_v25  ;;  %v4752_v34 = vsub.f32 0.0, %v4744_v41  ;;  %v4759_v19 = vadd.f32 1.0, %v4755_v42 }
0x1e02   :  { %v4756_v14 = vsel %vm4748_vm15, %v4744_v41, %v4752_v34  ;;  %5157 = vmatprep.mubr.msk.f32.mxu1 %vm4825_vm14, %v4762_v43  ;;  %v4763_v48 = vmul.f32 %v4759_v19, %v4659_v53 }
0x1e03   :  { %v4760_v32 = vadd.f32 1.0, %v4756_v14  ;;  %4897 = vmatmul.mubr.f32.vlgmr.msra.gmra.mxu1 %v4761_v44 }
0x1e05   :  { %v4764_v46 = vmul.f32 %v4760_v32, %v4660_v47 }
0x1e07   :  { %5158 = vmatprep.mubr.msk.f32.mxu1 %vm4825_vm14, %v4764_v46 }
0x1e08   :  { %4903 = vmatmul.mubr.f32.gmra.mxu1 %v4763_v48 }
0x1e09   :  { %5782 = shalt.err (!%p5779_p4)
}
0x1e0a   :  { %s5841_s16 = smov 128   ;;  %s7496_s7 = sld [smem:[#allocation29_spill]] }
0x1e0b   :  { %s7497_s3 = sld [smem:[#allocation26_spill]]  ;;  %s5842_s30 = smov [#allocation4]  }
0x1e10   :  { %5013 = dma.vmem_to_hbm [thread:$0]  %s5008_s14, 256, %s7496_s7, [#allocation3], %s5841_s16, %s5841_s16, %s7473_s24  }
0x1e11   :  { %v4813_v63 = vld [vmem:[%s7497_s3] sm:$0x3]  ;;  %s5019_s24 = sshll.u32 %s5842_s30, 4  ;;  %s5020_s24 = int_to_ptr.vmem [resolvable:$true] %s5019_s24 }
0x1e12   :  { %v4818_v6 = vrot.slane %v4813_v63, %v4566_v7  ;;  %v4822_v59 = vrot.slane %v4813_v63, %v4570_v61  ;;  %s5791_s19 = scalar_lea.vmem %s5020_s24, 512  ;;  %p5796_p6 = scmp.lt.s32.totalorder %s5020_s24, %s5020_s24 }
0x1e13   :  { %p5792_p5 = scmp.ne.s32.totalorder %s5020_s24, %s5791_s19  ;;  %p5797_p7 = scmp.lt.s32.totalorder %s5791_s19, %s5791_s19 }
0x1e15   :  { %p5798_p8 = por %p5797_p7, %p5796_p6 }
0x1e17   :  { %p5799_p9 = pnand %p5798_p8, %p5792_p5 }
0x1ec3   :  { %v4898_v28 = vpop.f32.mrf.mxu1 }
0x1ec4   :  { %v4899_v18 = vadd.f32 %v4898_v28, %v4818_v6 }
0x1ec5   :  { %v4900_v10 = vpop.f32.mrf.mxu1 }
0x1ec6   :  { %4909 = vst [vmem:[#allocation4] sm:$0xff] %v4899_v18  ;;  %v4901_v49 = vadd.f32 %v4900_v10, %v4822_v59 }
0x1ec8   :  { %4910 = vst.msk [vmem:[#allocation4 + $0x8] sm:$0xff] %vm99_vm0, %v4901_v49  ;;  %v4904_v62 = vpop.f32.mrf.mxu1 }
0x1ec9   :  { %v4905_v51 = vadd.f32 %v4904_v62, %v4818_v6 }
0x1eca   :  { %v4906_v21 = vpop.f32.mrf.mxu1 }
0x1ecb   :  { %4911 = vst [vmem:[#allocation4 + $0x10] sm:$0xff] %v4905_v51  ;;  %v4907_v50 = vadd.f32 %v4906_v21, %v4822_v59 }
0x1ecd   :  { %4912 = vst.msk [vmem:[#allocation4 + $0x18] sm:$0xff] %vm99_vm0, %v4907_v50 }
0x1ece   :  { %5802 = shalt.err (!%p5799_p9)
}
0x1ecf   :  { %s5843_s23 = smov 256   ;;  %s7498_s4 = sld [smem:[#allocation30_spill]] }
0x1ed5   :  { %5025 = dma.vmem_to_hbm [thread:$0]  %s5020_s24, 512, %s7498_s4, [#allocation5], %s5843_s23, %s5843_s23, %s7471_s25  }
0x1ed6   :  { %5811 = dma.done.wait [#allocation3], 256  }
0x1ed7   :  { %5812 = vsyncadd [#allocation3], 4294967040 }
0x1ed8   :  { %5813 = dma.done.wait [#allocation5], 512  }
0x1ed9   :  { %5814 = vsyncadd [#allocation5], 4294966784 }
0x1eda   :  { %5036 = vsyncpa [#allocation3], 1 }
0x1edb   :  { %5037 = vsyncpa [#allocation5], 1 }

</bundles_post_ra>
